<compile_context>
chip_gen: v6e
topology: v6e:2x2x1
jax: 0.10.0
libtpu: 0.0.40
codegen_flags: <defaults>
</compile_context>

<pallas_src>
import functools
import math

import jax
import jax.numpy as jnp
from jax.experimental import pallas as pl
from jax.experimental.pallas import tpu as pltpu

# ----------------------------- configuration (small TPU-friendly stand-ins) ----
B = 2                 # batch
IMG_C = 3             # image channels
IMG_HW = 64           # image spatial size (stand-in for 224)
IMG_FEAT = 128        # image feature dim (as in the module)
SEQ = 8               # token sequence length
MAX_POS = 16          # max position embeddings
VOCAB = 120           # vocab size (stand-in for MuRIL vocab)
HID = 128             # hidden size (stand-in for 768) -- one vreg wide
NHEADS = 2            # attention heads (stand-in for 12)
DH = HID // NHEADS    # head dim = 64
FFN = 256             # intermediate size (stand-in for 3072)
NUM_LAYERS = 2        # encoder layers (stand-in for 12)
CLS_H1 = 512
CLS_H2 = 256
NUM_CLASSES = 2
CLS_OUT_PAD = 128     # lane-dense padded logits width
LN_EPS = 1e-12


# ----------------------------- small helpers -----------------------------------
def _gelu(x):
    # tanh approximation (EUP-friendly); BERT default is erf-gelu -> tiny divergence.
    return 0.5 * x * (1.0 + jnp.tanh(0.7978845608028654 * (x + 0.044715 * x * x * x)))


def _ln(x, g, b, eps=LN_EPS):
    mu = jnp.mean(x, axis=-1, keepdims=True)
    var = jnp.mean(jnp.square(x - mu), axis=-1, keepdims=True)
    return (x - mu) * jax.lax.rsqrt(var + eps) * g + b


def _round_up(n, m):
    return ((n + m - 1) // m) * m


# ----------------------------- fused transformer encoder -----------------------
def _encoder_kernel(emb_ref, mask_ref, eg_ref, ebeta_ref,
                    qkvw_ref, qkvb_ref, ow_ref, ob_ref, g1_ref, b1_ref,
                    f1w_ref, f1b_ref, f2w_ref, f2b_ref, g2_ref, b2_ref,
                    cls_ref, h_scr):
    layer = pl.program_id(1)

    @pl.when(layer == 0)
    def _():
        # embedding LayerNorm fused into the layer-0 prologue
        h_scr[...] = _ln(emb_ref[...].astype(jnp.float32), eg_ref[...], ebeta_ref[...])

    h = h_scr[...]                                                # (S, HID) f32
    # fused QKV projection: one (HID, 3*HID) bf16 matmul, f32 accumulation
    qkv = jnp.dot(h.astype(jnp.bfloat16), qkvw_ref[...],
                  preferred_element_type=jnp.float32) + qkvb_ref[...]

    m = mask_ref[...].astype(jnp.float32)                         # (1, S) additive bias
    scale = 1.0 / math.sqrt(DH)
    heads = []
    for hd in range(NHEADS):                                      # static lane slices, no transposes
        qh = qkv[:, hd * DH:(hd + 1) * DH].astype(jnp.bfloat16)
        kh = qkv[:, HID + hd * DH:HID + (hd + 1) * DH].astype(jnp.bfloat16)
        vh = qkv[:, 2 * HID + hd * DH:2 * HID + (hd + 1) * DH].astype(jnp.bfloat16)
        s = jax.lax.dot_general(qh, kh, (((1,), (1,)), ((), ())),
                                preferred_element_type=jnp.float32) * scale + m
        s = s - jnp.max(s, axis=-1, keepdims=True)
        p = jnp.exp(s)
        p = p / jnp.sum(p, axis=-1, keepdims=True)                # exact f32 softmax
        heads.append(jnp.dot(p.astype(jnp.bfloat16), vh,
                             preferred_element_type=jnp.float32))
    ctx = jnp.concatenate(heads, axis=1)                          # (S, HID) in-lane head merge

    # attention output projection + residual + LayerNorm (fused)
    y = jnp.dot(ctx.astype(jnp.bfloat16), ow_ref[...],
                preferred_element_type=jnp.float32) + ob_ref[...] + h
    h1 = _ln(y, g1_ref[...], b1_ref[...])

    # FFN (both matmuls) + residual + LayerNorm (fused)
    u = _gelu(jnp.dot(h1.astype(jnp.bfloat16), f1w_ref[...],
                      preferred_element_type=jnp.float32) + f1b_ref[...])
    y2 = jnp.dot(u.astype(jnp.bfloat16), f2w_ref[...],
                 preferred_element_type=jnp.float32) + f2b_ref[...] + h1
    h2 = _ln(y2, g2_ref[...], b2_ref[...])

    h_scr[...] = h2                                               # carry to next layer
    cls_ref[...] = h2[0:1, :].astype(cls_ref.dtype)               # [CLS] row (final at last layer)


def pallas_encoder(emb, mask_bias, p):
    """emb: (B,S,HID) f32; mask_bias: (B,1,S) f32.  Returns [CLS] hidden (B, HID) f32."""
    Bb, S, H = emb.shape
    L, F = NUM_LAYERS, FFN

    def batch_spec(shape):     # indexed by batch, layer-invariant
        return pl.BlockSpec((None,) + shape, lambda b, l: (b, 0, 0))

    def layer_spec(shape):     # per-layer stacked weights, indexed by layer
        return pl.BlockSpec((None,) + shape, lambda b, l: (l, 0, 0))

    def const_spec(shape):
        return pl.BlockSpec(shape, lambda b, l: (0, 0))

    out = pl.pallas_call(
        _encoder_kernel,
        out_shape=jax.ShapeDtypeStruct((Bb, 1, H), jnp.float32),
        grid=(Bb, L),
        in_specs=[batch_spec((S, H)),            # emb (word+pos+type)
                  batch_spec((1, S)),            # attention mask bias
                  const_spec((1, H)),            # embedding LN gamma
                  const_spec((1, H)),            # embedding LN beta
                  layer_spec((H, 3 * H)),        # qkv_w  (bf16)
                  layer_spec((1, 3 * H)),        # qkv_b
                  layer_spec((H, H)),            # o_w    (bf16)
                  layer_spec((1, H)),            # o_b
                  layer_spec((1, H)),            # ln1_g
                  layer_spec((1, H)),            # ln1_b
                  layer_spec((H, F)),            # f1_w   (bf16)
                  layer_spec((1, F)),            # f1_b
                  layer_spec((F, H)),            # f2_w   (bf16)
                  layer_spec((1, H)),            # f2_b
                  layer_spec((1, H)),            # ln2_g
                  layer_spec((1, H))],           # ln2_b
        out_specs=pl.BlockSpec((None, 1, H), lambda b, l: (b, 0, 0)),
        scratch_shapes=[pltpu.VMEM((S, H), jnp.float32)],
        compiler_params=pltpu.CompilerParams(
            dimension_semantics=("parallel", "arbitrary")),
    )(emb, mask_bias, p["emb_ln_g"], p["emb_ln_b"],
      p["qkv_w"], p["qkv_b"], p["o_w"], p["o_b"], p["ln1_g"], p["ln1_b"],
      p["f1_w"], p["f1_b"], p["f2_w"], p["f2_b"], p["ln2_g"], p["ln2_b"])
    return out.reshape(Bb, H)


# ----------------------------- image encoder kernels ---------------------------
def _conv_relu_kernel(x_ref, w_ref, b_ref, o_ref):
    y = jnp.dot(x_ref[...], w_ref[...], preferred_element_type=jnp.float32) + b_ref[...]
    o_ref[...] = jnp.maximum(y, 0.0).astype(o_ref.dtype)


def pallas_conv_relu(cols, w, b, tile_m=None):
    """ReLU(cols @ w + b); cols:(M,K) bf16, w:(K,N) bf16, b:(N,) f32 -> (M,N) bf16."""
    M, K = cols.shape
    N = w.shape[1]
    if tile_m is not None and M > tile_m and M % tile_m == 0:
        tm, gm = tile_m, M // tile_m
    else:
        tm, gm = M, 1
    return pl.pallas_call(
        _conv_relu_kernel,
        out_shape=jax.ShapeDtypeStruct((M, N), jnp.bfloat16),
        grid=(gm,),
        in_specs=[pl.BlockSpec((tm, K), lambda i: (i, 0)),
                  pl.BlockSpec((K, N), lambda i: (0, 0)),
                  pl.BlockSpec((1, N), lambda i: (0, 0))],
        out_specs=pl.BlockSpec((tm, N), lambda i: (i, 0)),
        compiler_params=pltpu.CompilerParams(dimension_semantics=("parallel",)),
    )(cols, w, b.reshape(1, N))


def _conv_relu_gap_kernel(x_ref, w_ref, b_ref, o_ref, *, batch, hw):
    # conv-as-matmul + ReLU + AdaptiveAvgPool2d((1,1)) + Flatten; pool is a per-batch
    # sublane mean (free under the matmul -- no MXU pool matmul / iota mask build).
    y = jnp.dot(x_ref[...], w_ref[...], preferred_element_type=jnp.float32) + b_ref[...]
    y = jnp.maximum(y, 0.0)                                        # (batch*hw, Cout)
    feats = [jnp.mean(y[i * hw:(i + 1) * hw, :], axis=0, keepdims=True)
             for i in range(batch)]
    o_ref[...] = jnp.concatenate(feats, axis=0).astype(o_ref.dtype)


def pallas_conv_relu_gap(cols, w, b, batch, hw):
    M, K = cols.shape
    Cout = w.shape[1]
    return pl.pallas_call(
        functools.partial(_conv_relu_gap_kernel, batch=batch, hw=hw),
        out_shape=jax.ShapeDtypeStruct((batch, Cout), jnp.float32),
        grid=(1,),
        in_specs=[pl.BlockSpec((M, K), lambda i: (0, 0)),
                  pl.BlockSpec((K, Cout), lambda i: (0, 0)),
                  pl.BlockSpec((1, Cout), lambda i: (0, 0))],
        out_specs=pl.BlockSpec((batch, Cout), lambda i: (0, 0)),
    )(cols, w, b.reshape(1, Cout))


# ----------------------------- fused classifier --------------------------------
def _classifier_kernel(t_ref, i_ref, w1t_ref, w1i_ref, b1_ref, w2_ref, b2_ref,
                       w3_ref, b3_ref, o_ref):
    # concat(text, image) folded into two partial matmuls; Dropout = identity (eval).
    h = (jnp.dot(t_ref[...].astype(jnp.bfloat16), w1t_ref[...],
                 preferred_element_type=jnp.float32)
         + jnp.dot(i_ref[...].astype(jnp.bfloat16), w1i_ref[...],
                   preferred_element_type=jnp.float32)
         + b1_ref[...])
    h = jnp.maximum(h, 0.0)
    h = jnp.dot(h.astype(jnp.bfloat16), w2_ref[...],
                preferred_element_type=jnp.float32) + b2_ref[...]
    h = jnp.maximum(h, 0.0)
    o_ref[...] = (jnp.dot(h.astype(jnp.bfloat16), w3_ref[...],
                          preferred_element_type=jnp.float32) + b3_ref[...]).astype(o_ref.dtype)


def pallas_classifier(text_feat, img_feat, p):
    M = text_feat.shape[0]
    N1, N2, N3 = CLS_H1, CLS_H2, CLS_OUT_PAD
    return pl.pallas_call(
        _classifier_kernel,
        out_shape=jax.ShapeDtypeStruct((M, N3), jnp.float32),
        grid=(1,),
        in_specs=[pl.BlockSpec((M, HID), lambda i: (0, 0)),
                  pl.BlockSpec((M, IMG_FEAT), lambda i: (0, 0)),
                  pl.BlockSpec((HID, N1), lambda i: (0, 0)),
                  pl.BlockSpec((IMG_FEAT, N1), lambda i: (0, 0)),
                  pl.BlockSpec((1, N1), lambda i: (0, 0)),
                  pl.BlockSpec((N1, N2), lambda i: (0, 0)),
                  pl.BlockSpec((1, N2), lambda i: (0, 0)),
                  pl.BlockSpec((N2, N3), lambda i: (0, 0)),
                  pl.BlockSpec((1, N3), lambda i: (0, 0))],
        out_specs=pl.BlockSpec((M, N3), lambda i: (0, 0)),
    )(text_feat, img_feat, p["c1t_w"], p["c1i_w"], p["c1_b"].reshape(1, N1),
      p["c2_w"], p["c2_b"].reshape(1, N2), p["c3_w"], p["c3_b"].reshape(1, N3))


# ----------------------------- conv glue (patch extraction, maxpool) -----------
def im2col(x, kh, kw, stride, padding, k_pad):
    """x: (B,H,W,C) NHWC -> cols (B*Ho*Wo, k_pad) with feature order (C, kh, kw)."""
    Bb = x.shape[0]
    patches = jax.lax.conv_general_dilated_patches(
        x, filter_shape=(kh, kw), window_strides=(stride, stride),
        padding=((padding, padding), (padding, padding)),
        dimension_numbers=("NHWC", "HWIO", "NHWC"))
    Ho, Wo, K = patches.shape[1], patches.shape[2], patches.shape[3]
    cols = patches.reshape(Bb * Ho * Wo, K)
    if k_pad > K:
        cols = jnp.pad(cols, ((0, 0), (0, k_pad - K)))   # MXU contraction-dim alignment
    return cols, Ho, Wo


def maxpool2x2(x):
    # TODO(synk): could be fused into the conv kernel epilogue with a lane-dense
    # (rows, W*C) out_spec; kept as cheap bf16 XLA glue for lowering robustness.
    Bb, H, W, C = x.shape
    return jnp.max(x.reshape(Bb, H // 2, 2, W // 2, 2, C), axis=(2, 4))


def image_encoder_forward(p, image_nchw):
    x = jnp.transpose(image_nchw, (0, 2, 3, 1)).astype(jnp.bfloat16)       # NCHW -> NHWC bf16
    Bb = x.shape[0]
    # Conv(3,32,k3,s2,p1) + ReLU -> (B,32,32,32)
    cols, Ho, Wo = im2col(x, 3, 3, 2, 1, k_pad=p["conv1_w"].shape[0])
    x = pallas_conv_relu(cols, p["conv1_w"], p["conv1_b"], tile_m=1024).reshape(Bb, Ho, Wo, 32)
    x = maxpool2x2(x)                                                       # (B,16,16,32)
    # Conv(32,64,k3,s2,p1) + ReLU -> (B,8,8,64)
    cols, Ho, Wo = im2col(x, 3, 3, 2, 1, k_pad=p["conv2_w"].shape[0])
    x = pallas_conv_relu(cols, p["conv2_w"], p["conv2_b"]).reshape(Bb, Ho, Wo, 64)
    x = maxpool2x2(x)                                                       # (B,4,4,64)
    # Conv(64,128,k3,s2,p1) + ReLU + AdaptiveAvgPool((1,1)) + Flatten, fused
    cols, Ho, Wo = im2col(x, 3, 3, 2, 1, k_pad=p["conv3_w"].shape[0])
    return pallas_conv_relu_gap(cols, p["conv3_w"], p["conv3_b"], batch=Bb, hw=Ho * Wo)


# ----------------------------- model -------------------------------------------
def muril_forward(p, input_ids, attention_mask, token_type_ids):
    we = jnp.take(p["word_emb"], input_ids, axis=0)                         # (B,S,H) gather
    pe = p["pos_emb"][:input_ids.shape[1]][None, :, :]
    te = jnp.take(p["type_emb"], token_type_ids, axis=0)
    emb = we + pe + te                                                      # (B,S,H) f32
    mask_bias = ((1.0 - attention_mask.astype(jnp.float32)) * -10000.0)[:, None, :]
    return pallas_encoder(emb, mask_bias, p)                                # last_hidden[:,0,:]


def muril_image_classifier(p, input_ids, attention_mask, token_type_ids, image):
    muril_embeddings = muril_forward(p, input_ids, attention_mask, token_type_ids)  # (B, HID)
    image_features = image_encoder_forward(p, image)                                 # (B, 128)
    logits_pad = pallas_classifier(muril_embeddings, image_features, p)              # (B, 128)
    return logits_pad[:, :NUM_CLASSES]


# ----------------------------- deterministic parameter init --------------------
def init_params(key):
    keys = iter(jax.random.split(key, 64))

    def nrm(shape, scale=0.02, dtype=jnp.float32):
        return (scale * jax.random.normal(next(keys), shape, dtype=jnp.float32)).astype(dtype)

    def zeros(shape, dtype=jnp.float32):
        return jnp.zeros(shape, dtype)

    def ones(shape, dtype=jnp.float32):
        return jnp.ones(shape, dtype)

    def conv_w2d(cin, cout, k=3, scale=0.05):
        # PyTorch OIHW -> im2col 2-D (K=cin*k*k, cout) matching the (C,kh,kw) feature
        # order of conv_general_dilated_patches; K padded to a multiple of 32; bf16.
        w = scale * jax.random.normal(next(keys), (cout, cin, k, k), dtype=jnp.float32)
        w2d = jnp.transpose(w, (1, 2, 3, 0)).reshape(cin * k * k, cout)
        kp = _round_up(cin * k * k, 32)
        if kp != cin * k * k:
            w2d = jnp.pad(w2d, ((0, kp - cin * k * k), (0, 0)))
        return w2d.astype(jnp.bfloat16)

    p = {}
    # image encoder
    p["conv1_w"] = conv_w2d(IMG_C, 32);    p["conv1_b"] = zeros((32,))
    p["conv2_w"] = conv_w2d(32, 64);       p["conv2_b"] = zeros((64,))
    p["conv3_w"] = conv_w2d(64, IMG_FEAT); p["conv3_b"] = zeros((IMG_FEAT,))
    # MuRIL (scaled-down) embeddings
    p["word_emb"] = nrm((VOCAB, HID))
    p["pos_emb"] = nrm((MAX_POS, HID))
    p["type_emb"] = nrm((2, HID))
    p["emb_ln_g"] = ones((1, HID)); p["emb_ln_b"] = zeros((1, HID))
    # encoder layers, stacked on a leading layer axis (bf16 matmul weights, f32 rest)
    L = NUM_LAYERS
    p["qkv_w"] = nrm((L, HID, 3 * HID), dtype=jnp.bfloat16)
    p["qkv_b"] = zeros((L, 1, 3 * HID))
    p["o_w"] = nrm((L, HID, HID), dtype=jnp.bfloat16)
    p["o_b"] = zeros((L, 1, HID))
    p["ln1_g"] = ones((L, 1, HID)); p["ln1_b"] = zeros((L, 1, HID))
    p["f1_w"] = nrm((L, HID, FFN), dtype=jnp.bfloat16)
    p["f1_b"] = zeros((L, 1, FFN))
    p["f2_w"] = nrm((L, FFN, HID), dtype=jnp.bfloat16)
    p["f2_b"] = zeros((L, 1, HID))
    p["ln2_g"] = ones((L, 1, HID)); p["ln2_b"] = zeros((L, 1, HID))
    # classifier: Linear(HID+128,512) ReLU Drop Linear(512,256) ReLU Drop Linear(256,2)
    # W1 split into text / image halves (concat folded into the kernel);
    # logits padded to 128 lanes (sliced to NUM_CLASSES outside).
    p["c1t_w"] = nrm((HID, CLS_H1), dtype=jnp.bfloat16)
    p["c1i_w"] = nrm((IMG_FEAT, CLS_H1), dtype=jnp.bfloat16)
    p["c1_b"] = zeros((CLS_H1,))
    p["c2_w"] = nrm((CLS_H1, CLS_H2), dtype=jnp.bfloat16)
    p["c2_b"] = zeros((CLS_H2,))
    c3 = nrm((CLS_H2, NUM_CLASSES))
    p["c3_w"] = jnp.pad(c3, ((0, 0), (0, CLS_OUT_PAD - NUM_CLASSES))).astype(jnp.bfloat16)
    p["c3_b"] = zeros((CLS_OUT_PAD,))
    return p


# ----------------------------- main ---------------------------------------------
if __name__ == "__main__":
    root = jax.random.PRNGKey(0)
    k_img, k_ids, k_params = jax.random.split(root, 3)

    image = jax.random.normal(k_img, (B, IMG_C, IMG_HW, IMG_HW), dtype=jnp.float32)  # NCHW
    input_ids = jax.random.randint(k_ids, (B, SEQ), 0, VOCAB)
    attention_mask = jnp.ones((B, SEQ), dtype=jnp.int32)
    token_type_ids = jnp.zeros((B, SEQ), dtype=jnp.int32)

    params = init_params(k_params)

    logits = jax.jit(muril_image_classifier)(params, input_ids, attention_mask,
                                             token_type_ids, image)
    jax.block_until_ready(logits)
    assert logits.shape == (B, NUM_CLASSES)
    assert bool(jnp.all(jnp.isfinite(logits)))
    # TODO(synk): pretrained google/muril-base-cased weights cannot be loaded here;
    # the encoder is a structurally-faithful scaled-down stand-in (HID=128, 2 layers).
    print("KERNEL_OK")
</pallas_src>

<mosaic_0001>
module attributes {stable_mosaic.version = 11 : i64} {
  func.func @_conv_relu_kernel(%arg0: i32, %arg1: memref<1024x32xbf16, #tpu.memory_space<vmem>>, %arg2: memref<32x32xbf16, #tpu.memory_space<vmem>>, %arg3: memref<1x32xf32, #tpu.memory_space<vmem>>, %arg4: memref<1024x32xbf16, #tpu.memory_space<vmem>>) attributes {dimension_semantics = [#tpu.dimension_semantics<parallel>], iteration_bounds = array<i64: 2>, scalar_prefetch = 0 : i64, scratch_operands = 0 : i64, tpu.core_type = #tpu.core_type<tc>, window_params = [{transform_indices = @transform_0, window_bounds = array<i64: 1024, 32>}, {pipeline_mode = #tpu.pipeline_mode<synchronous>, transform_indices = @transform_1, window_bounds = array<i64: 32, 32>}, {pipeline_mode = #tpu.pipeline_mode<synchronous>, transform_indices = @transform_2, window_bounds = array<i64: 1, 32>}, {transform_indices = @transform_3, window_bounds = array<i64: 1024, 32>}]} {
    %c0 = arith.constant 0 : index
    %c0_0 = arith.constant 0 : index
    %0 = vector.load %arg1[%c0, %c0_0] : memref<1024x32xbf16, #tpu.memory_space<vmem>>, vector<1024x32xbf16>
    %c0_1 = arith.constant 0 : index
    %c0_2 = arith.constant 0 : index
    %1 = vector.load %arg2[%c0_1, %c0_2] : memref<32x32xbf16, #tpu.memory_space<vmem>>, vector<32x32xbf16>
    %cst = arith.constant dense<0.000000e+00> : vector<1024x32xf32>
    %2 = tpu.matmul %0, %1, %cst {dimension_numbers = #tpu.dot_dimension_numbers<[1], [0], [0], [1], [0, 0, 1, 1], [], []>} : vector<1024x32xbf16>, vector<32x32xbf16>, vector<1024x32xf32> -> vector<1024x32xf32>
    %c0_3 = arith.constant 0 : index
    %c0_4 = arith.constant 0 : index
    %3 = vector.load %arg3[%c0_3, %c0_4] : memref<1x32xf32, #tpu.memory_space<vmem>>, vector<1x32xf32>
    %4 = vector.broadcast %3 : vector<1x32xf32> to vector<1024x32xf32>
    %5 = arith.addf %2, %4 : vector<1024x32xf32>
    %cst_5 = arith.constant 0.000000e+00 : f32
    %6 = vector.broadcast %cst_5 : f32 to vector<1024x32xf32>
    %7 = arith.maximumf %5, %6 : vector<1024x32xf32>
    %8 = arith.truncf %7 : vector<1024x32xf32> to vector<1024x32xbf16>
    %c0_6 = arith.constant 0 : index
    %c0_7 = arith.constant 0 : index
    %9 = vector.load %arg4[%c0_6, %c0_7] : memref<1024x32xbf16, #tpu.memory_space<vmem>>, vector<1024x32xbf16>
    tpu.vector_store %arg4[%c0_6, %c0_7], %8 {strides = array<i32>} : memref<1024x32xbf16, #tpu.memory_space<vmem>>, vector<1024x32xbf16>,
    return
  }
  func.func @transform_0(%arg0: i32) -> (i32, i32) {
    %c0_i32 = arith.constant 0 : i32
    %c0_i32_0 = arith.constant 0 : i32
    return %arg0, %c0_i32 : i32, i32
  }
  func.func @transform_1(%arg0: i32) -> (i32, i32) {
    %c0_i32 = arith.constant 0 : i32
    %c0_i32_0 = arith.constant 0 : i32
    %c0_i32_1 = arith.constant 0 : i32
    return %c0_i32, %c0_i32_0 : i32, i32
  }
  func.func @transform_2(%arg0: i32) -> (i32, i32) {
    %c0_i32 = arith.constant 0 : i32
    %c0_i32_0 = arith.constant 0 : i32
    %c0_i32_1 = arith.constant 0 : i32
    return %c0_i32, %c0_i32_0 : i32, i32
  }
  func.func @transform_3(%arg0: i32) -> (i32, i32) {
    %c0_i32 = arith.constant 0 : i32
    %c0_i32_0 = arith.constant 0 : i32
    return %arg0, %c0_i32 : i32, i32
  }
}

module attributes {stable_mosaic.version = 11 : i64} {
  func.func @_conv_relu_kernel(%arg0: i32, %arg1: memref<128x288xbf16, #tpu.memory_space<vmem>>, %arg2: memref<288x64xbf16, #tpu.memory_space<vmem>>, %arg3: memref<1x64xf32, #tpu.memory_space<vmem>>, %arg4: memref<128x64xbf16, #tpu.memory_space<vmem>>) attributes {dimension_semantics = [#tpu.dimension_semantics<parallel>], iteration_bounds = array<i64: 1>, scalar_prefetch = 0 : i64, scratch_operands = 0 : i64, tpu.core_type = #tpu.core_type<tc>, window_params = [{transform_indices = @transform_0, window_bounds = array<i64: 128, 288>}, {pipeline_mode = #tpu.pipeline_mode<synchronous>, transform_indices = @transform_1, window_bounds = array<i64: 288, 64>}, {pipeline_mode = #tpu.pipeline_mode<synchronous>, transform_indices = @transform_2, window_bounds = array<i64: 1, 64>}, {transform_indices = @transform_3, window_bounds = array<i64: 128, 64>}]} {
    %c0 = arith.constant 0 : index
    %c0_0 = arith.constant 0 : index
    %0 = vector.load %arg1[%c0, %c0_0] : memref<128x288xbf16, #tpu.memory_space<vmem>>, vector<128x288xbf16>
    %c0_1 = arith.constant 0 : index
    %c0_2 = arith.constant 0 : index
    %1 = vector.load %arg2[%c0_1, %c0_2] : memref<288x64xbf16, #tpu.memory_space<vmem>>, vector<288x64xbf16>
    %cst = arith.constant dense<0.000000e+00> : vector<128x64xf32>
    %2 = tpu.matmul %0, %1, %cst {dimension_numbers = #tpu.dot_dimension_numbers<[1], [0], [0], [1], [0, 0, 1, 1], [], []>} : vector<128x288xbf16>, vector<288x64xbf16>, vector<128x64xf32> -> vector<128x64xf32>
    %c0_3 = arith.constant 0 : index
    %c0_4 = arith.constant 0 : index
    %3 = vector.load %arg3[%c0_3, %c0_4] : memref<1x64xf32, #tpu.memory_space<vmem>>, vector<1x64xf32>
    %4 = vector.broadcast %3 : vector<1x64xf32> to vector<128x64xf32>
    %5 = arith.addf %2, %4 : vector<128x64xf32>
    %cst_5 = arith.constant 0.000000e+00 : f32
    %6 = vector.broadcast %cst_5 : f32 to vector<128x64xf32>
    %7 = arith.maximumf %5, %6 : vector<128x64xf32>
    %8 = arith.truncf %7 : vector<128x64xf32> to vector<128x64xbf16>
    %c0_6 = arith.constant 0 : index
    %c0_7 = arith.constant 0 : index
    %9 = vector.load %arg4[%c0_6, %c0_7] : memref<128x64xbf16, #tpu.memory_space<vmem>>, vector<128x64xbf16>
    tpu.vector_store %arg4[%c0_6, %c0_7], %8 {strides = array<i32>} : memref<128x64xbf16, #tpu.memory_space<vmem>>, vector<128x64xbf16>,
    return
  }
  func.func @transform_0(%arg0: i32) -> (i32, i32) {
    %c0_i32 = arith.constant 0 : i32
    %c0_i32_0 = arith.constant 0 : i32
    return %arg0, %c0_i32 : i32, i32
  }
  func.func @transform_1(%arg0: i32) -> (i32, i32) {
    %c0_i32 = arith.constant 0 : i32
    %c0_i32_0 = arith.constant 0 : i32
    %c0_i32_1 = arith.constant 0 : i32
    return %c0_i32, %c0_i32_0 : i32, i32
  }
  func.func @transform_2(%arg0: i32) -> (i32, i32) {
    %c0_i32 = arith.constant 0 : i32
    %c0_i32_0 = arith.constant 0 : i32
    %c0_i32_1 = arith.constant 0 : i32
    return %c0_i32, %c0_i32_0 : i32, i32
  }
  func.func @transform_3(%arg0: i32) -> (i32, i32) {
    %c0_i32 = arith.constant 0 : i32
    %c0_i32_0 = arith.constant 0 : i32
    return %arg0, %c0_i32 : i32, i32
  }
}

module attributes {stable_mosaic.version = 11 : i64} {
  func.func @_conv_relu_gap_kernel(%arg0: i32, %arg1: memref<8x576xbf16, #tpu.memory_space<vmem>>, %arg2: memref<576x128xbf16, #tpu.memory_space<vmem>>, %arg3: memref<1x128xf32, #tpu.memory_space<vmem>>, %arg4: memref<2x128xf32, #tpu.memory_space<vmem>>) attributes {dimension_semantics = [#tpu.dimension_semantics<arbitrary>], iteration_bounds = array<i64: 1>, scalar_prefetch = 0 : i64, scratch_operands = 0 : i64, tpu.core_type = #tpu.core_type<tc>, window_params = [{pipeline_mode = #tpu.pipeline_mode<synchronous>, transform_indices = @transform_0, window_bounds = array<i64: 8, 576>}, {pipeline_mode = #tpu.pipeline_mode<synchronous>, transform_indices = @transform_1, window_bounds = array<i64: 576, 128>}, {pipeline_mode = #tpu.pipeline_mode<synchronous>, transform_indices = @transform_2, window_bounds = array<i64: 1, 128>}, {pipeline_mode = #tpu.pipeline_mode<synchronous>, transform_indices = @transform_3, window_bounds = array<i64: 2, 128>}]} {
    %c0 = arith.constant 0 : index
    %c0_0 = arith.constant 0 : index
    %0 = vector.load %arg1[%c0, %c0_0] : memref<8x576xbf16, #tpu.memory_space<vmem>>, vector<8x576xbf16>
    %c0_1 = arith.constant 0 : index
    %c0_2 = arith.constant 0 : index
    %1 = vector.load %arg2[%c0_1, %c0_2] : memref<576x128xbf16, #tpu.memory_space<vmem>>, vector<576x128xbf16>
    %cst = arith.constant dense<0.000000e+00> : vector<8x128xf32>
    %2 = tpu.matmul %0, %1, %cst {dimension_numbers = #tpu.dot_dimension_numbers<[1], [0], [0], [1], [0, 0, 1, 1], [], []>} : vector<8x576xbf16>, vector<576x128xbf16>, vector<8x128xf32> -> vector<8x128xf32>
    %c0_3 = arith.constant 0 : index
    %c0_4 = arith.constant 0 : index
    %3 = vector.load %arg3[%c0_3, %c0_4] : memref<1x128xf32, #tpu.memory_space<vmem>>, vector<1x128xf32>
    %4 = vector.broadcast %3 : vector<1x128xf32> to vector<8x128xf32>
    %5 = arith.addf %2, %4 : vector<8x128xf32>
    %cst_5 = arith.constant 0.000000e+00 : f32
    %6 = vector.broadcast %cst_5 : f32 to vector<8x128xf32>
    %7 = arith.maximumf %5, %6 : vector<8x128xf32>
    %8 = vector.extract_strided_slice %7 {offsets = [0, 0], sizes = [4, 128], strides = [1, 1]} : vector<8x128xf32> to vector<4x128xf32>
    %cst_6 = arith.constant dense<0.000000e+00> : vector<128xf32>
    %9 = vector.multi_reduction <add>, %8, %cst_6 [0] : vector<4x128xf32> to vector<128xf32>
    %10 = vector.shape_cast %9 : vector<128xf32> to vector<1x128xf32>
    %cst_7 = arith.constant 4.000000e+00 : f32
    %11 = vector.broadcast %cst_7 : f32 to vector<1x128xf32>
    %12 = arith.divf %10, %11 : vector<1x128xf32>
    %13 = vector.extract_strided_slice %7 {offsets = [4, 0], sizes = [4, 128], strides = [1, 1]} : vector<8x128xf32> to vector<4x128xf32>
    %cst_8 = arith.constant dense<0.000000e+00> : vector<128xf32>
    %14 = vector.multi_reduction <add>, %13, %cst_8 [0] : vector<4x128xf32> to vector<128xf32>
    %15 = vector.shape_cast %14 : vector<128xf32> to vector<1x128xf32>
    %cst_9 = arith.constant 4.000000e+00 : f32
    %16 = vector.broadcast %cst_9 : f32 to vector<1x128xf32>
    %17 = arith.divf %15, %16 : vector<1x128xf32>
    %18 = tpu.concatenate %12, %17 in 0 : vector<1x128xf32>, vector<1x128xf32> -> vector<2x128xf32>
    %c0_10 = arith.constant 0 : index
    %c0_11 = arith.constant 0 : index
    %19 = vector.load %arg4[%c0_10, %c0_11] : memref<2x128xf32, #tpu.memory_space<vmem>>, vector<2x128xf32>
    tpu.vector_store %arg4[%c0_10, %c0_11], %18 {strides = array<i32>} : memref<2x128xf32, #tpu.memory_space<vmem>>, vector<2x128xf32>,
    return
  }
  func.func @transform_0(%arg0: i32) -> (i32, i32) {
    %c0_i32 = arith.constant 0 : i32
    %c0_i32_0 = arith.constant 0 : i32
    %c0_i32_1 = arith.constant 0 : i32
    return %c0_i32, %c0_i32_0 : i32, i32
  }
  func.func @transform_1(%arg0: i32) -> (i32, i32) {
    %c0_i32 = arith.constant 0 : i32
    %c0_i32_0 = arith.constant 0 : i32
    %c0_i32_1 = arith.constant 0 : i32
    return %c0_i32, %c0_i32_0 : i32, i32
  }
  func.func @transform_2(%arg0: i32) -> (i32, i32) {
    %c0_i32 = arith.constant 0 : i32
    %c0_i32_0 = arith.constant 0 : i32
    %c0_i32_1 = arith.constant 0 : i32
    return %c0_i32, %c0_i32_0 : i32, i32
  }
  func.func @transform_3(%arg0: i32) -> (i32, i32) {
    %c0_i32 = arith.constant 0 : i32
    %c0_i32_0 = arith.constant 0 : i32
    %c0_i32_1 = arith.constant 0 : i32
    return %c0_i32, %c0_i32_0 : i32, i32
  }
}

module attributes {stable_mosaic.version = 11 : i64} {
  func.func @_encoder_kernel(%arg0: i32, %arg1: i32, %arg2: memref<1x8x128xf32, #tpu.memory_space<vmem>>, %arg3: memref<1x1x8xf32, #tpu.memory_space<vmem>>, %arg4: memref<1x128xf32, #tpu.memory_space<vmem>>, %arg5: memref<1x128xf32, #tpu.memory_space<vmem>>, %arg6: memref<1x128x384xbf16, #tpu.memory_space<vmem>>, %arg7: memref<1x1x384xf32, #tpu.memory_space<vmem>>, %arg8: memref<1x128x128xbf16, #tpu.memory_space<vmem>>, %arg9: memref<1x1x128xf32, #tpu.memory_space<vmem>>, %arg10: memref<1x1x128xf32, #tpu.memory_space<vmem>>, %arg11: memref<1x1x128xf32, #tpu.memory_space<vmem>>, %arg12: memref<1x128x256xbf16, #tpu.memory_space<vmem>>, %arg13: memref<1x1x256xf32, #tpu.memory_space<vmem>>, %arg14: memref<1x256x128xbf16, #tpu.memory_space<vmem>>, %arg15: memref<1x1x128xf32, #tpu.memory_space<vmem>>, %arg16: memref<1x1x128xf32, #tpu.memory_space<vmem>>, %arg17: memref<1x1x128xf32, #tpu.memory_space<vmem>>, %arg18: memref<1x1x128xf32, #tpu.memory_space<vmem>>, %arg19: memref<8x128xf32, #tpu.memory_space<vmem>>) attributes {dimension_semantics = [#tpu.dimension_semantics<parallel>, #tpu.dimension_semantics<arbitrary>], iteration_bounds = array<i64: 2, 2>, scalar_prefetch = 0 : i64, scratch_operands = 1 : i64, tpu.core_type = #tpu.core_type<tc>, window_params = [{transform_indices = @transform_0, window_bounds = array<i64: 1, 8, 128>}, {transform_indices = @transform_1, window_bounds = array<i64: 1, 1, 8>}, {pipeline_mode = #tpu.pipeline_mode<synchronous>, transform_indices = @transform_2, window_bounds = array<i64: 1, 128>}, {pipeline_mode = #tpu.pipeline_mode<synchronous>, transform_indices = @transform_3, window_bounds = array<i64: 1, 128>}, {transform_indices = @transform_4, window_bounds = array<i64: 1, 128, 384>}, {transform_indices = @transform_5, window_bounds = array<i64: 1, 1, 384>}, {transform_indices = @transform_6, window_bounds = array<i64: 1, 128, 128>}, {transform_indices = @transform_7, window_bounds = array<i64: 1, 1, 128>}, {transform_indices = @transform_8, window_bounds = array<i64: 1, 1, 128>}, {transform_indices = @transform_9, window_bounds = array<i64: 1, 1, 128>}, {transform_indices = @transform_10, window_bounds = array<i64: 1, 128, 256>}, {transform_indices = @transform_11, window_bounds = array<i64: 1, 1, 256>}, {transform_indices = @transform_12, window_bounds = array<i64: 1, 256, 128>}, {transform_indices = @transform_13, window_bounds = array<i64: 1, 1, 128>}, {transform_indices = @transform_14, window_bounds = array<i64: 1, 1, 128>}, {transform_indices = @transform_15, window_bounds = array<i64: 1, 1, 128>}, {transform_indices = @transform_16, window_bounds = array<i64: 1, 1, 128>}]} {
    %c0_i32 = arith.constant 0 : i32
    %0 = arith.cmpi eq, %arg1, %c0_i32 : i32
    %1 = arith.extui %0 : i1 to i32
    %c0_i32_0 = arith.constant 0 : i32
    %2 = arith.cmpi ne, %1, %c0_i32_0 : i32
    scf.if %2 {
      %c0_73 = arith.constant 0 : index
      %c0_74 = arith.constant 0 : index
      %c0_75 = arith.constant 0 : index
      %155 = vector.load %arg2[%c0_73, %c0_74, %c0_75] : memref<1x8x128xf32, #tpu.memory_space<vmem>>, vector<1x8x128xf32>
      %156 = vector.shape_cast %155 : vector<1x8x128xf32> to vector<8x128xf32>
      %c0_76 = arith.constant 0 : index
      %c0_77 = arith.constant 0 : index
      %157 = vector.load %arg4[%c0_76, %c0_77] : memref<1x128xf32, #tpu.memory_space<vmem>>, vector<1x128xf32>
      %c0_78 = arith.constant 0 : index
      %c0_79 = arith.constant 0 : index
      %158 = vector.load %arg5[%c0_78, %c0_79] : memref<1x128xf32, #tpu.memory_space<vmem>>, vector<1x128xf32>
      %cst_80 = arith.constant dense<0.000000e+00> : vector<8xf32>
      %159 = vector.multi_reduction <add>, %156, %cst_80 [1] : vector<8x128xf32> to vector<8xf32>
      %160 = vector.shape_cast %159 : vector<8xf32> to vector<8x1xf32>
      %cst_81 = arith.constant 1.280000e+02 : f32
      %161 = vector.broadcast %cst_81 : f32 to vector<8x1xf32>
      %162 = arith.divf %160, %161 : vector<8x1xf32>
      %163 = vector.broadcast %162 : vector<8x1xf32> to vector<8x128xf32>
      %164 = arith.subf %156, %163 : vector<8x128xf32>
      %165 = arith.mulf %164, %164 : vector<8x128xf32>
      %cst_82 = arith.constant dense<0.000000e+00> : vector<8xf32>
      %166 = vector.multi_reduction <add>, %165, %cst_82 [1] : vector<8x128xf32> to vector<8xf32>
      %167 = vector.shape_cast %166 : vector<8xf32> to vector<8x1xf32>
      %cst_83 = arith.constant 1.280000e+02 : f32
      %168 = vector.broadcast %cst_83 : f32 to vector<8x1xf32>
      %169 = arith.divf %167, %168 : vector<8x1xf32>
      %170 = vector.broadcast %162 : vector<8x1xf32> to vector<8x128xf32>
      %171 = arith.subf %156, %170 : vector<8x128xf32>
      %cst_84 = arith.constant 9.99999996E-13 : f32
      %172 = vector.broadcast %cst_84 : f32 to vector<8x1xf32>
      %173 = arith.addf %169, %172 : vector<8x1xf32>
      %174 = math.rsqrt %173 : vector<8x1xf32>
      %175 = vector.broadcast %174 : vector<8x1xf32> to vector<8x128xf32>
      %176 = arith.mulf %171, %175 : vector<8x128xf32>
      %177 = vector.broadcast %157 : vector<1x128xf32> to vector<8x128xf32>
      %178 = arith.mulf %176, %177 : vector<8x128xf32>
      %179 = vector.broadcast %158 : vector<1x128xf32> to vector<8x128xf32>
      %180 = arith.addf %178, %179 : vector<8x128xf32>
      %c0_85 = arith.constant 0 : index
      %c0_86 = arith.constant 0 : index
      %181 = vector.load %arg19[%c0_85, %c0_86] : memref<8x128xf32, #tpu.memory_space<vmem>>, vector<8x128xf32>
      tpu.vector_store %arg19[%c0_85, %c0_86], %180 {strides = array<i32>} : memref<8x128xf32, #tpu.memory_space<vmem>>, vector<8x128xf32>,
    } else {
    }
    %c0 = arith.constant 0 : index
    %c0_1 = arith.constant 0 : index
    %3 = vector.load %arg19[%c0, %c0_1] : memref<8x128xf32, #tpu.memory_space<vmem>>, vector<8x128xf32>
    %4 = arith.truncf %3 : vector<8x128xf32> to vector<8x128xbf16>
    %c0_2 = arith.constant 0 : index
    %c0_3 = arith.constant 0 : index
    %c0_4 = arith.constant 0 : index
    %5 = vector.load %arg6[%c0_2, %c0_3, %c0_4] : memref<1x128x384xbf16, #tpu.memory_space<vmem>>, vector<1x128x384xbf16>
    %6 = vector.shape_cast %5 : vector<1x128x384xbf16> to vector<128x384xbf16>
    %cst = arith.constant dense<0.000000e+00> : vector<8x384xf32>
    %7 = tpu.matmul %4, %6, %cst {dimension_numbers = #tpu.dot_dimension_numbers<[1], [0], [0], [1], [0, 0, 1, 1], [], []>} : vector<8x128xbf16>, vector<128x384xbf16>, vector<8x384xf32> -> vector<8x384xf32>
    %c0_5 = arith.constant 0 : index
    %c0_6 = arith.constant 0 : index
    %c0_7 = arith.constant 0 : index
    %8 = vector.load %arg7[%c0_5, %c0_6, %c0_7] : memref<1x1x384xf32, #tpu.memory_space<vmem>>, vector<1x1x384xf32>
    %9 = vector.shape_cast %8 : vector<1x1x384xf32> to vector<1x384xf32>
    %10 = vector.broadcast %9 : vector<1x384xf32> to vector<8x384xf32>
    %11 = arith.addf %7, %10 : vector<8x384xf32>
    %c0_8 = arith.constant 0 : index
    %c0_9 = arith.constant 0 : index
    %c0_10 = arith.constant 0 : index
    %12 = vector.load %arg3[%c0_8, %c0_9, %c0_10] : memref<1x1x8xf32, #tpu.memory_space<vmem>>, vector<1x1x8xf32>
    %13 = vector.shape_cast %12 : vector<1x1x8xf32> to vector<1x8xf32>
    %14 = vector.extract_strided_slice %11 {offsets = [0, 0], sizes = [8, 64], strides = [1, 1]} : vector<8x384xf32> to vector<8x64xf32>
    %15 = arith.truncf %14 : vector<8x64xf32> to vector<8x64xbf16>
    %16 = vector.extract_strided_slice %11 {offsets = [0, 128], sizes = [8, 64], strides = [1, 1]} : vector<8x384xf32> to vector<8x64xf32>
    %17 = arith.truncf %16 : vector<8x64xf32> to vector<8x64xbf16>
    %18 = vector.extract_strided_slice %11 {offsets = [0, 256], sizes = [8, 64], strides = [1, 1]} : vector<8x384xf32> to vector<8x64xf32>
    %19 = arith.truncf %18 : vector<8x64xf32> to vector<8x64xbf16>
    %cst_11 = arith.constant dense<0.000000e+00> : vector<8x8xf32>
    %20 = tpu.matmul %15, %17, %cst_11 {dimension_numbers = #tpu.dot_dimension_numbers<[1], [1], [0], [0], [0, 0, 1, 0], [], []>} : vector<8x64xbf16>, vector<8x64xbf16>, vector<8x8xf32> -> vector<8x8xf32>
    %cst_12 = arith.constant 1.250000e-01 : f32
    %21 = vector.broadcast %cst_12 : f32 to vector<8x8xf32>
    %22 = arith.mulf %20, %21 : vector<8x8xf32>
    %23 = vector.broadcast %13 : vector<1x8xf32> to vector<8x8xf32>
    %24 = arith.addf %22, %23 : vector<8x8xf32>
    %cst_13 = arith.constant dense<0xFF800000> : vector<8xf32>
    %25 = vector.multi_reduction <maximumf>, %24, %cst_13 [1] : vector<8x8xf32> to vector<8xf32>
    %26 = vector.shape_cast %25 : vector<8xf32> to vector<8x1xf32>
    %27 = vector.broadcast %26 : vector<8x1xf32> to vector<8x8xf32>
    %28 = arith.subf %24, %27 : vector<8x8xf32>
    %29 = math.exp %28 : vector<8x8xf32>
    %cst_14 = arith.constant dense<0.000000e+00> : vector<8xf32>
    %30 = vector.multi_reduction <add>, %29, %cst_14 [1] : vector<8x8xf32> to vector<8xf32>
    %31 = vector.shape_cast %30 : vector<8xf32> to vector<8x1xf32>
    %32 = vector.broadcast %31 : vector<8x1xf32> to vector<8x8xf32>
    %33 = arith.divf %29, %32 : vector<8x8xf32>
    %34 = arith.truncf %33 : vector<8x8xf32> to vector<8x8xbf16>
    %cst_15 = arith.constant dense<0.000000e+00> : vector<8x64xf32>
    %35 = tpu.matmul %34, %19, %cst_15 {dimension_numbers = #tpu.dot_dimension_numbers<[1], [0], [0], [1], [0, 0, 1, 1], [], []>} : vector<8x8xbf16>, vector<8x64xbf16>, vector<8x64xf32> -> vector<8x64xf32>
    %36 = vector.extract_strided_slice %11 {offsets = [0, 64], sizes = [8, 64], strides = [1, 1]} : vector<8x384xf32> to vector<8x64xf32>
    %37 = arith.truncf %36 : vector<8x64xf32> to vector<8x64xbf16>
    %38 = vector.extract_strided_slice %11 {offsets = [0, 192], sizes = [8, 64], strides = [1, 1]} : vector<8x384xf32> to vector<8x64xf32>
    %39 = arith.truncf %38 : vector<8x64xf32> to vector<8x64xbf16>
    %40 = vector.extract_strided_slice %11 {offsets = [0, 320], sizes = [8, 64], strides = [1, 1]} : vector<8x384xf32> to vector<8x64xf32>
    %41 = arith.truncf %40 : vector<8x64xf32> to vector<8x64xbf16>
    %cst_16 = arith.constant dense<0.000000e+00> : vector<8x8xf32>
    %42 = tpu.matmul %37, %39, %cst_16 {dimension_numbers = #tpu.dot_dimension_numbers<[1], [1], [0], [0], [0, 0, 1, 0], [], []>} : vector<8x64xbf16>, vector<8x64xbf16>, vector<8x8xf32> -> vector<8x8xf32>
    %cst_17 = arith.constant 1.250000e-01 : f32
    %43 = vector.broadcast %cst_17 : f32 to vector<8x8xf32>
    %44 = arith.mulf %42, %43 : vector<8x8xf32>
    %45 = vector.broadcast %13 : vector<1x8xf32> to vector<8x8xf32>
    %46 = arith.addf %44, %45 : vector<8x8xf32>
    %cst_18 = arith.constant dense<0xFF800000> : vector<8xf32>
    %47 = vector.multi_reduction <maximumf>, %46, %cst_18 [1] : vector<8x8xf32> to vector<8xf32>
    %48 = vector.shape_cast %47 : vector<8xf32> to vector<8x1xf32>
    %49 = vector.broadcast %48 : vector<8x1xf32> to vector<8x8xf32>
    %50 = arith.subf %46, %49 : vector<8x8xf32>
    %51 = math.exp %50 : vector<8x8xf32>
    %cst_19 = arith.constant dense<0.000000e+00> : vector<8xf32>
    %52 = vector.multi_reduction <add>, %51, %cst_19 [1] : vector<8x8xf32> to vector<8xf32>
    %53 = vector.shape_cast %52 : vector<8xf32> to vector<8x1xf32>
    %54 = vector.broadcast %53 : vector<8x1xf32> to vector<8x8xf32>
    %55 = arith.divf %51, %54 : vector<8x8xf32>
    %56 = arith.truncf %55 : vector<8x8xf32> to vector<8x8xbf16>
    %cst_20 = arith.constant dense<0.000000e+00> : vector<8x64xf32>
    %57 = tpu.matmul %56, %41, %cst_20 {dimension_numbers = #tpu.dot_dimension_numbers<[1], [0], [0], [1], [0, 0, 1, 1], [], []>} : vector<8x8xbf16>, vector<8x64xbf16>, vector<8x64xf32> -> vector<8x64xf32>
    %58 = tpu.concatenate %35, %57 in 1 : vector<8x64xf32>, vector<8x64xf32> -> vector<8x128xf32>
    %59 = arith.truncf %58 : vector<8x128xf32> to vector<8x128xbf16>
    %c0_21 = arith.constant 0 : index
    %c0_22 = arith.constant 0 : index
    %c0_23 = arith.constant 0 : index
    %60 = vector.load %arg8[%c0_21, %c0_22, %c0_23] : memref<1x128x128xbf16, #tpu.memory_space<vmem>>, vector<1x128x128xbf16>
    %61 = vector.shape_cast %60 : vector<1x128x128xbf16> to vector<128x128xbf16>
    %cst_24 = arith.constant dense<0.000000e+00> : vector<8x128xf32>
    %62 = tpu.matmul %59, %61, %cst_24 {dimension_numbers = #tpu.dot_dimension_numbers<[1], [0], [0], [1], [0, 0, 1, 1], [], []>} : vector<8x128xbf16>, vector<128x128xbf16>, vector<8x128xf32> -> vector<8x128xf32>
    %c0_25 = arith.constant 0 : index
    %c0_26 = arith.constant 0 : index
    %c0_27 = arith.constant 0 : index
    %63 = vector.load %arg9[%c0_25, %c0_26, %c0_27] : memref<1x1x128xf32, #tpu.memory_space<vmem>>, vector<1x1x128xf32>
    %64 = vector.shape_cast %63 : vector<1x1x128xf32> to vector<1x128xf32>
    %65 = vector.broadcast %64 : vector<1x128xf32> to vector<8x128xf32>
    %66 = arith.addf %62, %65 : vector<8x128xf32>
    %67 = arith.addf %66, %3 : vector<8x128xf32>
    %c0_28 = arith.constant 0 : index
    %c0_29 = arith.constant 0 : index
    %c0_30 = arith.constant 0 : index
    %68 = vector.load %arg10[%c0_28, %c0_29, %c0_30] : memref<1x1x128xf32, #tpu.memory_space<vmem>>, vector<1x1x128xf32>
    %69 = vector.shape_cast %68 : vector<1x1x128xf32> to vector<1x128xf32>
    %c0_31 = arith.constant 0 : index
    %c0_32 = arith.constant 0 : index
    %c0_33 = arith.constant 0 : index
    %70 = vector.load %arg11[%c0_31, %c0_32, %c0_33] : memref<1x1x128xf32, #tpu.memory_space<vmem>>, vector<1x1x128xf32>
    %71 = vector.shape_cast %70 : vector<1x1x128xf32> to vector<1x128xf32>
    %cst_34 = arith.constant dense<0.000000e+00> : vector<8xf32>
    %72 = vector.multi_reduction <add>, %67, %cst_34 [1] : vector<8x128xf32> to vector<8xf32>
    %73 = vector.shape_cast %72 : vector<8xf32> to vector<8x1xf32>
    %cst_35 = arith.constant 1.280000e+02 : f32
    %74 = vector.broadcast %cst_35 : f32 to vector<8x1xf32>
    %75 = arith.divf %73, %74 : vector<8x1xf32>
    %76 = vector.broadcast %75 : vector<8x1xf32> to vector<8x128xf32>
    %77 = arith.subf %67, %76 : vector<8x128xf32>
    %78 = arith.mulf %77, %77 : vector<8x128xf32>
    %cst_36 = arith.constant dense<0.000000e+00> : vector<8xf32>
    %79 = vector.multi_reduction <add>, %78, %cst_36 [1] : vector<8x128xf32> to vector<8xf32>
    %80 = vector.shape_cast %79 : vector<8xf32> to vector<8x1xf32>
    %cst_37 = arith.constant 1.280000e+02 : f32
    %81 = vector.broadcast %cst_37 : f32 to vector<8x1xf32>
    %82 = arith.divf %80, %81 : vector<8x1xf32>
    %83 = vector.broadcast %75 : vector<8x1xf32> to vector<8x128xf32>
    %84 = arith.subf %67, %83 : vector<8x128xf32>
    %cst_38 = arith.constant 9.99999996E-13 : f32
    %85 = vector.broadcast %cst_38 : f32 to vector<8x1xf32>
    %86 = arith.addf %82, %85 : vector<8x1xf32>
    %87 = math.rsqrt %86 : vector<8x1xf32>
    %88 = vector.broadcast %87 : vector<8x1xf32> to vector<8x128xf32>
    %89 = arith.mulf %84, %88 : vector<8x128xf32>
    %90 = vector.broadcast %69 : vector<1x128xf32> to vector<8x128xf32>
    %91 = arith.mulf %89, %90 : vector<8x128xf32>
    %92 = vector.broadcast %71 : vector<1x128xf32> to vector<8x128xf32>
    %93 = arith.addf %91, %92 : vector<8x128xf32>
    %94 = arith.truncf %93 : vector<8x128xf32> to vector<8x128xbf16>
    %c0_39 = arith.constant 0 : index
    %c0_40 = arith.constant 0 : index
    %c0_41 = arith.constant 0 : index
    %95 = vector.load %arg12[%c0_39, %c0_40, %c0_41] : memref<1x128x256xbf16, #tpu.memory_space<vmem>>, vector<1x128x256xbf16>
    %96 = vector.shape_cast %95 : vector<1x128x256xbf16> to vector<128x256xbf16>
    %cst_42 = arith.constant dense<0.000000e+00> : vector<8x256xf32>
    %97 = tpu.matmul %94, %96, %cst_42 {dimension_numbers = #tpu.dot_dimension_numbers<[1], [0], [0], [1], [0, 0, 1, 1], [], []>} : vector<8x128xbf16>, vector<128x256xbf16>, vector<8x256xf32> -> vector<8x256xf32>
    %c0_43 = arith.constant 0 : index
    %c0_44 = arith.constant 0 : index
    %c0_45 = arith.constant 0 : index
    %98 = vector.load %arg13[%c0_43, %c0_44, %c0_45] : memref<1x1x256xf32, #tpu.memory_space<vmem>>, vector<1x1x256xf32>
    %99 = vector.shape_cast %98 : vector<1x1x256xf32> to vector<1x256xf32>
    %100 = vector.broadcast %99 : vector<1x256xf32> to vector<8x256xf32>
    %101 = arith.addf %97, %100 : vector<8x256xf32>
    %cst_46 = arith.constant 5.000000e-01 : f32
    %102 = vector.broadcast %cst_46 : f32 to vector<8x256xf32>
    %103 = arith.mulf %102, %101 : vector<8x256xf32>
    %cst_47 = arith.constant 4.471500e-02 : f32
    %104 = vector.broadcast %cst_47 : f32 to vector<8x256xf32>
    %105 = arith.mulf %104, %101 : vector<8x256xf32>
    %106 = arith.mulf %105, %101 : vector<8x256xf32>
    %107 = arith.mulf %106, %101 : vector<8x256xf32>
    %108 = arith.addf %101, %107 : vector<8x256xf32>
    %cst_48 = arith.constant 0.797884583 : f32
    %109 = vector.broadcast %cst_48 : f32 to vector<8x256xf32>
    %110 = arith.mulf %109, %108 : vector<8x256xf32>
    %111 = math.tanh %110 : vector<8x256xf32>
    %cst_49 = arith.constant 1.000000e+00 : f32
    %112 = vector.broadcast %cst_49 : f32 to vector<8x256xf32>
    %113 = arith.addf %112, %111 : vector<8x256xf32>
    %114 = arith.mulf %103, %113 : vector<8x256xf32>
    %115 = arith.truncf %114 : vector<8x256xf32> to vector<8x256xbf16>
    %c0_50 = arith.constant 0 : index
    %c0_51 = arith.constant 0 : index
    %c0_52 = arith.constant 0 : index
    %116 = vector.load %arg14[%c0_50, %c0_51, %c0_52] : memref<1x256x128xbf16, #tpu.memory_space<vmem>>, vector<1x256x128xbf16>
    %117 = vector.shape_cast %116 : vector<1x256x128xbf16> to vector<256x128xbf16>
    %cst_53 = arith.constant dense<0.000000e+00> : vector<8x128xf32>
    %118 = tpu.matmul %115, %117, %cst_53 {dimension_numbers = #tpu.dot_dimension_numbers<[1], [0], [0], [1], [0, 0, 1, 1], [], []>} : vector<8x256xbf16>, vector<256x128xbf16>, vector<8x128xf32> -> vector<8x128xf32>
    %c0_54 = arith.constant 0 : index
    %c0_55 = arith.constant 0 : index
    %c0_56 = arith.constant 0 : index
    %119 = vector.load %arg15[%c0_54, %c0_55, %c0_56] : memref<1x1x128xf32, #tpu.memory_space<vmem>>, vector<1x1x128xf32>
    %120 = vector.shape_cast %119 : vector<1x1x128xf32> to vector<1x128xf32>
    %121 = vector.broadcast %120 : vector<1x128xf32> to vector<8x128xf32>
    %122 = arith.addf %118, %121 : vector<8x128xf32>
    %123 = arith.addf %122, %93 : vector<8x128xf32>
    %c0_57 = arith.constant 0 : index
    %c0_58 = arith.constant 0 : index
    %c0_59 = arith.constant 0 : index
    %124 = vector.load %arg16[%c0_57, %c0_58, %c0_59] : memref<1x1x128xf32, #tpu.memory_space<vmem>>, vector<1x1x128xf32>
    %125 = vector.shape_cast %124 : vector<1x1x128xf32> to vector<1x128xf32>
    %c0_60 = arith.constant 0 : index
    %c0_61 = arith.constant 0 : index
    %c0_62 = arith.constant 0 : index
    %126 = vector.load %arg17[%c0_60, %c0_61, %c0_62] : memref<1x1x128xf32, #tpu.memory_space<vmem>>, vector<1x1x128xf32>
    %127 = vector.shape_cast %126 : vector<1x1x128xf32> to vector<1x128xf32>
    %cst_63 = arith.constant dense<0.000000e+00> : vector<8xf32>
    %128 = vector.multi_reduction <add>, %123, %cst_63 [1] : vector<8x128xf32> to vector<8xf32>
    %129 = vector.shape_cast %128 : vector<8xf32> to vector<8x1xf32>
    %cst_64 = arith.constant 1.280000e+02 : f32
    %130 = vector.broadcast %cst_64 : f32 to vector<8x1xf32>
    %131 = arith.divf %129, %130 : vector<8x1xf32>
    %132 = vector.broadcast %131 : vector<8x1xf32> to vector<8x128xf32>
    %133 = arith.subf %123, %132 : vector<8x128xf32>
    %134 = arith.mulf %133, %133 : vector<8x128xf32>
    %cst_65 = arith.constant dense<0.000000e+00> : vector<8xf32>
    %135 = vector.multi_reduction <add>, %134, %cst_65 [1] : vector<8x128xf32> to vector<8xf32>
    %136 = vector.shape_cast %135 : vector<8xf32> to vector<8x1xf32>
    %cst_66 = arith.constant 1.280000e+02 : f32
    %137 = vector.broadcast %cst_66 : f32 to vector<8x1xf32>
    %138 = arith.divf %136, %137 : vector<8x1xf32>
    %139 = vector.broadcast %131 : vector<8x1xf32> to vector<8x128xf32>
    %140 = arith.subf %123, %139 : vector<8x128xf32>
    %cst_67 = arith.constant 9.99999996E-13 : f32
    %141 = vector.broadcast %cst_67 : f32 to vector<8x1xf32>
    %142 = arith.addf %138, %141 : vector<8x1xf32>
    %143 = math.rsqrt %142 : vector<8x1xf32>
    %144 = vector.broadcast %143 : vector<8x1xf32> to vector<8x128xf32>
    %145 = arith.mulf %140, %144 : vector<8x128xf32>
    %146 = vector.broadcast %125 : vector<1x128xf32> to vector<8x128xf32>
    %147 = arith.mulf %145, %146 : vector<8x128xf32>
    %148 = vector.broadcast %127 : vector<1x128xf32> to vector<8x128xf32>
    %149 = arith.addf %147, %148 : vector<8x128xf32>
    %c0_68 = arith.constant 0 : index
    %c0_69 = arith.constant 0 : index
    %150 = vector.load %arg19[%c0_68, %c0_69] : memref<8x128xf32, #tpu.memory_space<vmem>>, vector<8x128xf32>
    tpu.vector_store %arg19[%c0_68, %c0_69], %149 {strides = array<i32>} : memref<8x128xf32, #tpu.memory_space<vmem>>, vector<8x128xf32>,
    %151 = vector.extract_strided_slice %149 {offsets = [0, 0], sizes = [1, 128], strides = [1, 1]} : vector<8x128xf32> to vector<1x128xf32>
    %c0_70 = arith.constant 0 : index
    %c0_71 = arith.constant 0 : index
    %c0_72 = arith.constant 0 : index
    %152 = vector.load %arg18[%c0_70, %c0_71, %c0_72] : memref<1x1x128xf32, #tpu.memory_space<vmem>>, vector<1x1x128xf32>
    %153 = vector.shape_cast %152 : vector<1x1x128xf32> to vector<1x128xf32>
    %154 = vector.shape_cast %151 : vector<1x128xf32> to vector<1x1x128xf32>
    tpu.vector_store %arg18[%c0_70, %c0_71, %c0_72], %154 {strides = array<i32>} : memref<1x1x128xf32, #tpu.memory_space<vmem>>, vector<1x1x128xf32>,
    return
  }
  func.func @transform_0(%arg0: i32, %arg1: i32) -> (i32, i32, i32) {
    %c0_i32 = arith.constant 0 : i32
    %c0_i32_0 = arith.constant 0 : i32
    %c0_i32_1 = arith.constant 0 : i32
    return %arg0, %c0_i32, %c0_i32_0 : i32, i32, i32
  }
  func.func @transform_1(%arg0: i32, %arg1: i32) -> (i32, i32, i32) {
    %c0_i32 = arith.constant 0 : i32
    %c0_i32_0 = arith.constant 0 : i32
    %c0_i32_1 = arith.constant 0 : i32
    return %arg0, %c0_i32, %c0_i32_0 : i32, i32, i32
  }
  func.func @transform_2(%arg0: i32, %arg1: i32) -> (i32, i32) {
    %c0_i32 = arith.constant 0 : i32
    %c0_i32_0 = arith.constant 0 : i32
    %c0_i32_1 = arith.constant 0 : i32
    return %c0_i32, %c0_i32_0 : i32, i32
  }
  func.func @transform_3(%arg0: i32, %arg1: i32) -> (i32, i32) {
    %c0_i32 = arith.constant 0 : i32
    %c0_i32_0 = arith.constant 0 : i32
    %c0_i32_1 = arith.constant 0 : i32
    return %c0_i32, %c0_i32_0 : i32, i32
  }
  func.func @transform_4(%arg0: i32, %arg1: i32) -> (i32, i32, i32) {
    %c0_i32 = arith.constant 0 : i32
    %c0_i32_0 = arith.constant 0 : i32
    %c0_i32_1 = arith.constant 0 : i32
    return %arg1, %c0_i32, %c0_i32_0 : i32, i32, i32
  }
  func.func @transform_5(%arg0: i32, %arg1: i32) -> (i32, i32, i32) {
    %c0_i32 = arith.constant 0 : i32
    %c0_i32_0 = arith.constant 0 : i32
    %c0_i32_1 = arith.constant 0 : i32
    return %arg1, %c0_i32, %c0_i32_0 : i32, i32, i32
  }
  func.func @transform_6(%arg0: i32, %arg1: i32) -> (i32, i32, i32) {
    %c0_i32 = arith.constant 0 : i32
    %c0_i32_0 = arith.constant 0 : i32
    %c0_i32_1 = arith.constant 0 : i32
    return %arg1, %c0_i32, %c0_i32_0 : i32, i32, i32
  }
  func.func @transform_7(%arg0: i32, %arg1: i32) -> (i32, i32, i32) {
    %c0_i32 = arith.constant 0 : i32
    %c0_i32_0 = arith.constant 0 : i32
    %c0_i32_1 = arith.constant 0 : i32
    return %arg1, %c0_i32, %c0_i32_0 : i32, i32, i32
  }
  func.func @transform_8(%arg0: i32, %arg1: i32) -> (i32, i32, i32) {
    %c0_i32 = arith.constant 0 : i32
    %c0_i32_0 = arith.constant 0 : i32
    %c0_i32_1 = arith.constant 0 : i32
    return %arg1, %c0_i32, %c0_i32_0 : i32, i32, i32
  }
  func.func @transform_9(%arg0: i32, %arg1: i32) -> (i32, i32, i32) {
    %c0_i32 = arith.constant 0 : i32
    %c0_i32_0 = arith.constant 0 : i32
    %c0_i32_1 = arith.constant 0 : i32
    return %arg1, %c0_i32, %c0_i32_0 : i32, i32, i32
  }
  func.func @transform_10(%arg0: i32, %arg1: i32) -> (i32, i32, i32) {
    %c0_i32 = arith.constant 0 : i32
    %c0_i32_0 = arith.constant 0 : i32
    %c0_i32_1 = arith.constant 0 : i32
    return %arg1, %c0_i32, %c0_i32_0 : i32, i32, i32
  }
  func.func @transform_11(%arg0: i32, %arg1: i32) -> (i32, i32, i32) {
    %c0_i32 = arith.constant 0 : i32
    %c0_i32_0 = arith.constant 0 : i32
    %c0_i32_1 = arith.constant 0 : i32
    return %arg1, %c0_i32, %c0_i32_0 : i32, i32, i32
  }
  func.func @transform_12(%arg0: i32, %arg1: i32) -> (i32, i32, i32) {
    %c0_i32 = arith.constant 0 : i32
    %c0_i32_0 = arith.constant 0 : i32
    %c0_i32_1 = arith.constant 0 : i32
    return %arg1, %c0_i32, %c0_i32_0 : i32, i32, i32
  }
  func.func @transform_13(%arg0: i32, %arg1: i32) -> (i32, i32, i32) {
    %c0_i32 = arith.constant 0 : i32
    %c0_i32_0 = arith.constant 0 : i32
    %c0_i32_1 = arith.constant 0 : i32
    return %arg1, %c0_i32, %c0_i32_0 : i32, i32, i32
  }
  func.func @transform_14(%arg0: i32, %arg1: i32) -> (i32, i32, i32) {
    %c0_i32 = arith.constant 0 : i32
    %c0_i32_0 = arith.constant 0 : i32
    %c0_i32_1 = arith.constant 0 : i32
    return %arg1, %c0_i32, %c0_i32_0 : i32, i32, i32
  }
  func.func @transform_15(%arg0: i32, %arg1: i32) -> (i32, i32, i32) {
    %c0_i32 = arith.constant 0 : i32
    %c0_i32_0 = arith.constant 0 : i32
    %c0_i32_1 = arith.constant 0 : i32
    return %arg1, %c0_i32, %c0_i32_0 : i32, i32, i32
  }
  func.func @transform_16(%arg0: i32, %arg1: i32) -> (i32, i32, i32) {
    %c0_i32 = arith.constant 0 : i32
    %c0_i32_0 = arith.constant 0 : i32
    %c0_i32_1 = arith.constant 0 : i32
    return %arg0, %c0_i32, %c0_i32_0 : i32, i32, i32
  }
}

module attributes {stable_mosaic.version = 11 : i64} {
  func.func @_classifier_kernel(%arg0: i32, %arg1: memref<2x128xf32, #tpu.memory_space<vmem>>, %arg2: memref<2x128xf32, #tpu.memory_space<vmem>>, %arg3: memref<128x512xbf16, #tpu.memory_space<vmem>>, %arg4: memref<128x512xbf16, #tpu.memory_space<vmem>>, %arg5: memref<1x512xf32, #tpu.memory_space<vmem>>, %arg6: memref<512x256xbf16, #tpu.memory_space<vmem>>, %arg7: memref<1x256xf32, #tpu.memory_space<vmem>>, %arg8: memref<256x128xbf16, #tpu.memory_space<vmem>>, %arg9: memref<1x128xf32, #tpu.memory_space<vmem>>, %arg10: memref<2x128xf32, #tpu.memory_space<vmem>>) attributes {dimension_semantics = [#tpu.dimension_semantics<arbitrary>], iteration_bounds = array<i64: 1>, scalar_prefetch = 0 : i64, scratch_operands = 0 : i64, tpu.core_type = #tpu.core_type<tc>, window_params = [{pipeline_mode = #tpu.pipeline_mode<synchronous>, transform_indices = @transform_0, window_bounds = array<i64: 2, 128>}, {pipeline_mode = #tpu.pipeline_mode<synchronous>, transform_indices = @transform_1, window_bounds = array<i64: 2, 128>}, {pipeline_mode = #tpu.pipeline_mode<synchronous>, transform_indices = @transform_2, window_bounds = array<i64: 128, 512>}, {pipeline_mode = #tpu.pipeline_mode<synchronous>, transform_indices = @transform_3, window_bounds = array<i64: 128, 512>}, {pipeline_mode = #tpu.pipeline_mode<synchronous>, transform_indices = @transform_4, window_bounds = array<i64: 1, 512>}, {pipeline_mode = #tpu.pipeline_mode<synchronous>, transform_indices = @transform_5, window_bounds = array<i64: 512, 256>}, {pipeline_mode = #tpu.pipeline_mode<synchronous>, transform_indices = @transform_6, window_bounds = array<i64: 1, 256>}, {pipeline_mode = #tpu.pipeline_mode<synchronous>, transform_indices = @transform_7, window_bounds = array<i64: 256, 128>}, {pipeline_mode = #tpu.pipeline_mode<synchronous>, transform_indices = @transform_8, window_bounds = array<i64: 1, 128>}, {pipeline_mode = #tpu.pipeline_mode<synchronous>, transform_indices = @transform_9, window_bounds = array<i64: 2, 128>}]} {
    %c0 = arith.constant 0 : index
    %c0_0 = arith.constant 0 : index
    %0 = vector.load %arg1[%c0, %c0_0] : memref<2x128xf32, #tpu.memory_space<vmem>>, vector<2x128xf32>
    %1 = arith.truncf %0 : vector<2x128xf32> to vector<2x128xbf16>
    %c0_1 = arith.constant 0 : index
    %c0_2 = arith.constant 0 : index
    %2 = vector.load %arg3[%c0_1, %c0_2] : memref<128x512xbf16, #tpu.memory_space<vmem>>, vector<128x512xbf16>
    %cst = arith.constant dense<0.000000e+00> : vector<2x512xf32>
    %3 = tpu.matmul %1, %2, %cst {dimension_numbers = #tpu.dot_dimension_numbers<[1], [0], [0], [1], [0, 0, 1, 1], [], []>} : vector<2x128xbf16>, vector<128x512xbf16>, vector<2x512xf32> -> vector<2x512xf32>
    %c0_3 = arith.constant 0 : index
    %c0_4 = arith.constant 0 : index
    %4 = vector.load %arg2[%c0_3, %c0_4] : memref<2x128xf32, #tpu.memory_space<vmem>>, vector<2x128xf32>
    %5 = arith.truncf %4 : vector<2x128xf32> to vector<2x128xbf16>
    %c0_5 = arith.constant 0 : index
    %c0_6 = arith.constant 0 : index
    %6 = vector.load %arg4[%c0_5, %c0_6] : memref<128x512xbf16, #tpu.memory_space<vmem>>, vector<128x512xbf16>
    %cst_7 = arith.constant dense<0.000000e+00> : vector<2x512xf32>
    %7 = tpu.matmul %5, %6, %cst_7 {dimension_numbers = #tpu.dot_dimension_numbers<[1], [0], [0], [1], [0, 0, 1, 1], [], []>} : vector<2x128xbf16>, vector<128x512xbf16>, vector<2x512xf32> -> vector<2x512xf32>
    %8 = arith.addf %3, %7 : vector<2x512xf32>
    %c0_8 = arith.constant 0 : index
    %c0_9 = arith.constant 0 : index
    %9 = vector.load %arg5[%c0_8, %c0_9] : memref<1x512xf32, #tpu.memory_space<vmem>>, vector<1x512xf32>
    %10 = vector.broadcast %9 : vector<1x512xf32> to vector<2x512xf32>
    %11 = arith.addf %8, %10 : vector<2x512xf32>
    %cst_10 = arith.constant 0.000000e+00 : f32
    %12 = vector.broadcast %cst_10 : f32 to vector<2x512xf32>
    %13 = arith.maximumf %11, %12 : vector<2x512xf32>
    %14 = arith.truncf %13 : vector<2x512xf32> to vector<2x512xbf16>
    %c0_11 = arith.constant 0 : index
    %c0_12 = arith.constant 0 : index
    %15 = vector.load %arg6[%c0_11, %c0_12] : memref<512x256xbf16, #tpu.memory_space<vmem>>, vector<512x256xbf16>
    %cst_13 = arith.constant dense<0.000000e+00> : vector<2x256xf32>
    %16 = tpu.matmul %14, %15, %cst_13 {dimension_numbers = #tpu.dot_dimension_numbers<[1], [0], [0], [1], [0, 0, 1, 1], [], []>} : vector<2x512xbf16>, vector<512x256xbf16>, vector<2x256xf32> -> vector<2x256xf32>
    %c0_14 = arith.constant 0 : index
    %c0_15 = arith.constant 0 : index
    %17 = vector.load %arg7[%c0_14, %c0_15] : memref<1x256xf32, #tpu.memory_space<vmem>>, vector<1x256xf32>
    %18 = vector.broadcast %17 : vector<1x256xf32> to vector<2x256xf32>
    %19 = arith.addf %16, %18 : vector<2x256xf32>
    %cst_16 = arith.constant 0.000000e+00 : f32
    %20 = vector.broadcast %cst_16 : f32 to vector<2x256xf32>
    %21 = arith.maximumf %19, %20 : vector<2x256xf32>
    %22 = arith.truncf %21 : vector<2x256xf32> to vector<2x256xbf16>
    %c0_17 = arith.constant 0 : index
    %c0_18 = arith.constant 0 : index
    %23 = vector.load %arg8[%c0_17, %c0_18] : memref<256x128xbf16, #tpu.memory_space<vmem>>, vector<256x128xbf16>
    %cst_19 = arith.constant dense<0.000000e+00> : vector<2x128xf32>
    %24 = tpu.matmul %22, %23, %cst_19 {dimension_numbers = #tpu.dot_dimension_numbers<[1], [0], [0], [1], [0, 0, 1, 1], [], []>} : vector<2x256xbf16>, vector<256x128xbf16>, vector<2x128xf32> -> vector<2x128xf32>
    %c0_20 = arith.constant 0 : index
    %c0_21 = arith.constant 0 : index
    %25 = vector.load %arg9[%c0_20, %c0_21] : memref<1x128xf32, #tpu.memory_space<vmem>>, vector<1x128xf32>
    %26 = vector.broadcast %25 : vector<1x128xf32> to vector<2x128xf32>
    %27 = arith.addf %24, %26 : vector<2x128xf32>
    %c0_22 = arith.constant 0 : index
    %c0_23 = arith.constant 0 : index
    %28 = vector.load %arg10[%c0_22, %c0_23] : memref<2x128xf32, #tpu.memory_space<vmem>>, vector<2x128xf32>
    tpu.vector_store %arg10[%c0_22, %c0_23], %27 {strides = array<i32>} : memref<2x128xf32, #tpu.memory_space<vmem>>, vector<2x128xf32>,
    return
  }
  func.func @transform_0(%arg0: i32) -> (i32, i32) {
    %c0_i32 = arith.constant 0 : i32
    %c0_i32_0 = arith.constant 0 : i32
    %c0_i32_1 = arith.constant 0 : i32
    return %c0_i32, %c0_i32_0 : i32, i32
  }
  func.func @transform_1(%arg0: i32) -> (i32, i32) {
    %c0_i32 = arith.constant 0 : i32
    %c0_i32_0 = arith.constant 0 : i32
    %c0_i32_1 = arith.constant 0 : i32
    return %c0_i32, %c0_i32_0 : i32, i32
  }
  func.func @transform_2(%arg0: i32) -> (i32, i32) {
    %c0_i32 = arith.constant 0 : i32
    %c0_i32_0 = arith.constant 0 : i32
    %c0_i32_1 = arith.constant 0 : i32
    return %c0_i32, %c0_i32_0 : i32, i32
  }
  func.func @transform_3(%arg0: i32) -> (i32, i32) {
    %c0_i32 = arith.constant 0 : i32
    %c0_i32_0 = arith.constant 0 : i32
    %c0_i32_1 = arith.constant 0 : i32
    return %c0_i32, %c0_i32_0 : i32, i32
  }
  func.func @transform_4(%arg0: i32) -> (i32, i32) {
    %c0_i32 = arith.constant 0 : i32
    %c0_i32_0 = arith.constant 0 : i32
    %c0_i32_1 = arith.constant 0 : i32
    return %c0_i32, %c0_i32_0 : i32, i32
  }
  func.func @transform_5(%arg0: i32) -> (i32, i32) {
    %c0_i32 = arith.constant 0 : i32
    %c0_i32_0 = arith.constant 0 : i32
    %c0_i32_1 = arith.constant 0 : i32
    return %c0_i32, %c0_i32_0 : i32, i32
  }
  func.func @transform_6(%arg0: i32) -> (i32, i32) {
    %c0_i32 = arith.constant 0 : i32
    %c0_i32_0 = arith.constant 0 : i32
    %c0_i32_1 = arith.constant 0 : i32
    return %c0_i32, %c0_i32_0 : i32, i32
  }
  func.func @transform_7(%arg0: i32) -> (i32, i32) {
    %c0_i32 = arith.constant 0 : i32
    %c0_i32_0 = arith.constant 0 : i32
    %c0_i32_1 = arith.constant 0 : i32
    return %c0_i32, %c0_i32_0 : i32, i32
  }
  func.func @transform_8(%arg0: i32) -> (i32, i32) {
    %c0_i32 = arith.constant 0 : i32
    %c0_i32_0 = arith.constant 0 : i32
    %c0_i32_1 = arith.constant 0 : i32
    return %c0_i32, %c0_i32_0 : i32, i32
  }
  func.func @transform_9(%arg0: i32) -> (i32, i32) {
    %c0_i32 = arith.constant 0 : i32
    %c0_i32_0 = arith.constant 0 : i32
    %c0_i32_1 = arith.constant 0 : i32
    return %c0_i32, %c0_i32_0 : i32, i32
  }
}

</mosaic_0001>

<bundles_post_ra>
// kernel: muril_image_classifier.6
= control target key start
LH: loop header
LB: loop body
LE: loop exit
PB: predicated region body
PF: predicated region fallthrough
CT: control target
= control target key end

     0   :  { %s2912_s12 = smov 0   ;;  %s3468_s0 = inlined_call_operand.vmem [shape: bf16[2048,32], index: 0, kind: input, shape index: {}]   ;;  %s3469_s1 = inlined_call_operand.vmem [shape: bf16[32,32], index: 1, kind: input, shape index: {}]   ;;  %s3470_s2 = inlined_call_operand.vmem [shape: f32[1,32], index: 2, kind: input, shape index: {}]   ;;  %s3471_s3 = inlined_call_operand.vmem [shape: bf16[2048,32], index: 3, kind: output, shape index: {}]  }
   0x1 LB: > { %s2209_s13 = sadd.s32 4294967295, %s2890_s12   ;;  %p2213_p0 = scmp.ge.s32.totalorder %s2890_s12, 1  ;;  %s2890_s12 = sphi %s2912_s12, %s13_s12  }
   0x2   : > { %p138_p1 = scmp.lt.s32.totalorder %s2890_s12, 3 }
   0x4   : > { %p139_p2 = pnand %p2213_p0, %p138_p1 }
   0x5   : > { %s2214_s16 = sshll.u32 (!%p139_p2), %s2209_s13, 7 }
   0x6   : > { %142 = sbr.rel (%p139_p2) target bundleno = 346 (0x15a), region = 32  ;;  %p163_p3 = scmp.lt.s32.totalorder (!%p139_p2), %s2214_s16, 255 }
   0xb   : > { %v2817_v0 = vld [vmem:[%s3469_s1 + $0x8] sm:$0xff]   ;;  %v2818_v1 = vld [vmem:[%s3469_s1] sm:$0xff]   ;;  %s3473_s16 = smov (!%p163_p3, %s2214_s16), 255  ;;  %vm646_vm0 = vcmask 261120   ;;  %vm2024_vm1 = vcmask 257024  }
   0xc   : > { %2673 = vmatprep.subr.bf16.mxu0 %v2817_v0  ;;  %2805 = vmatprep.subr.bf16.mxu1 %v2817_v0  ;;  %s2215_s19 = sshll.u32 %s3473_s16, 2 }
   0xd   : > { %2674 = vmatpush3.bf16.msra.mxu0 %v2817_v0  ;;  %2807 = vmatpush3.bf16.msra.mxu1 %v2817_v0  ;;  %s2934_s22 = scalar_lea.vmem %s3468_s0, %s2215_s19  ;;  %s3077_s27 = scalar_lea.vmem %s3471_s3, %s2215_s19 }
   0xe   : > { %2675 = vmatprep.subr.bf16.mxu0 %v2818_v1  ;;  %2806 = vmatprep.subr.bf16.mxu1 %v2818_v1  ;;  %v2819_v2 = vld [vmem:[%s2934_s22] sm:$0xff]   ;;  %v2821_v4 = vld [vmem:[%s2934_s22 + $0x8] sm:$0xff]   ;;  %v2823_v6 = vld [vmem:[%s2934_s22 + $0x10] sm:$0xff]  }
   0xf   : > { %v2820_v3 = vld [vmem:[%s2934_s22 + $0x100] sm:$0xff]   ;;  %2677 = vmatprep.mubr.msk.bf16.mxu0 %vm646_vm0, %v2819_v2  ;;  %v2822_v5 = vld [vmem:[%s2934_s22 + $0x108] sm:$0xff]   ;;  %v2824_v7 = vld [vmem:[%s2934_s22 + $0x110] sm:$0xff]  }
  0x10   : > { %2741 = vmatprep.mubr.msk.bf16.mxu1 %vm646_vm0, %v2820_v3  ;;  %v2825_v8 = vld [vmem:[%s2934_s22 + $0x18] sm:$0xff]   ;;  %v2827_v10 = vld [vmem:[%s2934_s22 + $0x20] sm:$0xff]   ;;  %v2829_v12 = vld [vmem:[%s2934_s22 + $0x28] sm:$0xff]  }
  0x11   : > { %2676 = vmatpush3.bf16.msra.mxu0 %v2818_v1  ;;  %2808 = vmatpush3.bf16.msra.mxu1 %v2818_v1  ;;  %v2826_v9 = vld [vmem:[%s2934_s22 + $0x118] sm:$0xff]   ;;  %v2828_v11 = vld [vmem:[%s2934_s22 + $0x120] sm:$0xff]   ;;  %v2830_v13 = vld [vmem:[%s2934_s22 + $0x128] sm:$0xff]  }
  0x12   : > { %v2831_v14 = vld [vmem:[%s2934_s22 + $0x30] sm:$0xff]   ;;  %v2833_v16 = vld [vmem:[%s2934_s22 + $0x38] sm:$0xff]   ;;  %v2835_v18 = vld [vmem:[%s2934_s22 + $0x40] sm:$0xff]  }
  0x13   : > { %v2832_v15 = vld [vmem:[%s2934_s22 + $0x130] sm:$0xff]   ;;  %v2834_v17 = vld [vmem:[%s2934_s22 + $0x138] sm:$0xff]   ;;  %v2836_v19 = vld [vmem:[%s2934_s22 + $0x140] sm:$0xff]  }
  0x14   : > { %2678 = vmatmul.mubr.msk.bf16.vlgmr.msra.gmra.mxu0 %vm646_vm0, %v2821_v4  ;;  %2742 = vmatmul.mubr.msk.bf16.vlgmr.msra.gmra.mxu1 %vm646_vm0, %v2822_v5  ;;  %v2837_v20 = vld [vmem:[%s2934_s22 + $0x48] sm:$0xff]   ;;  %v2839_v22 = vld [vmem:[%s2934_s22 + $0x50] sm:$0xff]   ;;  %v2841_v24 = vld [vmem:[%s2934_s22 + $0x58] sm:$0xff]  }
  0x15   : > { %2681 = vmatprep.mubr.msk.bf16.mxu0 %vm646_vm0, %v2823_v6  ;;  %2745 = vmatprep.mubr.msk.bf16.mxu1 %vm646_vm0, %v2824_v7  ;;  %v2838_v21 = vld [vmem:[%s2934_s22 + $0x148] sm:$0xff]   ;;  %v2840_v23 = vld [vmem:[%s2934_s22 + $0x150] sm:$0xff]   ;;  %v2842_v25 = vld [vmem:[%s2934_s22 + $0x158] sm:$0xff]  }
  0x16   : > { %v2843_v26 = vld [vmem:[%s2934_s22 + $0x60] sm:$0xff]   ;;  %v2845_v28 = vld [vmem:[%s2934_s22 + $0x68] sm:$0xff]   ;;  %v2847_v30 = vld [vmem:[%s2934_s22 + $0x70] sm:$0xff]  }
  0x17   : > { %v2844_v27 = vld [vmem:[%s2934_s22 + $0x160] sm:$0xff]   ;;  %v2846_v29 = vld [vmem:[%s2934_s22 + $0x168] sm:$0xff]   ;;  %v2848_v31 = vld [vmem:[%s2934_s22 + $0x170] sm:$0xff]  }
  0x18   : > { %v2849_v32 = vld [vmem:[%s2934_s22 + $0x78] sm:$0xff]   ;;  %v2851_v34 = vld [vmem:[%s2934_s22 + $0x80] sm:$0xff]   ;;  %v2853_v36 = vld [vmem:[%s2934_s22 + $0x88] sm:$0xff]  }
  0x19   : > { %v2850_v33 = vld [vmem:[%s2934_s22 + $0x178] sm:$0xff]   ;;  %v2852_v35 = vld [vmem:[%s2934_s22 + $0x180] sm:$0xff]   ;;  %v2854_v37 = vld [vmem:[%s2934_s22 + $0x188] sm:$0xff]  }
  0x1a   : > { %v2855_v38 = vld [vmem:[%s2934_s22 + $0x90] sm:$0xff]   ;;  %v2857_v40 = vld [vmem:[%s2934_s22 + $0x98] sm:$0xff]   ;;  %v2859_v42 = vld [vmem:[%s2934_s22 + $0xa0] sm:$0xff]  }
  0x1b   : > { %v2856_v39 = vld [vmem:[%s2934_s22 + $0x190] sm:$0xff]   ;;  %v2858_v41 = vld [vmem:[%s2934_s22 + $0x198] sm:$0xff]   ;;  %v2860_v43 = vld [vmem:[%s2934_s22 + $0x1a0] sm:$0xff]  }
  0x1c   : > { %2682 = vmatmul.mubr.msk.bf16.gmra.mxu0 %vm646_vm0, %v2825_v8  ;;  %2746 = vmatmul.mubr.msk.bf16.gmra.mxu1 %vm646_vm0, %v2826_v9  ;;  %v2861_v44 = vld [vmem:[%s2934_s22 + $0xa8] sm:$0xff]   ;;  %v2863_v46 = vld [vmem:[%s2934_s22 + $0xb0] sm:$0xff]   ;;  %v2865_v48 = vld [vmem:[%s2934_s22 + $0xb8] sm:$0xff]  }
  0x1d   : > { %2685 = vmatprep.mubr.msk.bf16.mxu0 %vm646_vm0, %v2827_v10  ;;  %2749 = vmatprep.mubr.msk.bf16.mxu1 %vm646_vm0, %v2828_v11  ;;  %v2862_v45 = vld [vmem:[%s2934_s22 + $0x1a8] sm:$0xff]   ;;  %v2864_v47 = vld [vmem:[%s2934_s22 + $0x1b0] sm:$0xff]   ;;  %v2866_v49 = vld [vmem:[%s2934_s22 + $0x1b8] sm:$0xff]  }
  0x1e   : > { %v2867_v50 = vld [vmem:[%s2934_s22 + $0xc0] sm:$0xff]   ;;  %v2869_v52 = vld [vmem:[%s2934_s22 + $0xc8] sm:$0xff]   ;;  %v2871_v54 = vld [vmem:[%s2934_s22 + $0xd0] sm:$0xff]  }
  0x1f   : > { %v2868_v51 = vld [vmem:[%s2934_s22 + $0x1c0] sm:$0xff]   ;;  %v2870_v53 = vld [vmem:[%s2934_s22 + $0x1c8] sm:$0xff]   ;;  %v2872_v55 = vld [vmem:[%s2934_s22 + $0x1d0] sm:$0xff]  }
  0x20   : > { %v2873_v56 = vld [vmem:[%s2934_s22 + $0xd8] sm:$0xff]   ;;  %v2875_v58 = vld [vmem:[%s2934_s22 + $0xe0] sm:$0xff]   ;;  %v2877_v60 = vld [vmem:[%s2934_s22 + $0xe8] sm:$0xff]  }
  0x21   : > { %v2874_v57 = vld [vmem:[%s2934_s22 + $0x1d8] sm:$0xff]   ;;  %v2876_v59 = vld [vmem:[%s2934_s22 + $0x1e0] sm:$0xff]   ;;  %v2878_v61 = vld [vmem:[%s2934_s22 + $0x1e8] sm:$0xff]  }
  0x22   : > { %v2879_v62 = vld [vmem:[%s2934_s22 + $0xf0] sm:$0xff]   ;;  %v2881_v0 = vld [vmem:[%s2934_s22 + $0xf8] sm:$0xff]   ;;  %v3067_v2 = vld [vmem:[%s3470_s2] ss:$0 sm:$0xff] }
  0x23   : > { %v2880_v63 = vld [vmem:[%s2934_s22 + $0x1f0] sm:$0xff]   ;;  %v2882_v1 = vld [vmem:[%s2934_s22 + $0x1f8] sm:$0xff]  }
  0x24   : > { %2686 = vmatmul.mubr.msk.bf16.gmra.mxu0 %vm646_vm0, %v2829_v12  ;;  %2750 = vmatmul.mubr.msk.bf16.gmra.mxu1 %vm646_vm0, %v2830_v13 }
  0x25   : > { %2689 = vmatprep.mubr.msk.bf16.mxu0 %vm646_vm0, %v2831_v14  ;;  %2753 = vmatprep.mubr.msk.bf16.mxu1 %vm646_vm0, %v2832_v15 }
  0x2c   : > { %2690 = vmatmul.mubr.msk.bf16.gmra.mxu0 %vm646_vm0, %v2833_v16  ;;  %2754 = vmatmul.mubr.msk.bf16.gmra.mxu1 %vm646_vm0, %v2834_v17 }
  0x2d   : > { %2693 = vmatprep.mubr.msk.bf16.mxu0 %vm646_vm0, %v2835_v18  ;;  %2757 = vmatprep.mubr.msk.bf16.mxu1 %vm646_vm0, %v2836_v19 }
  0x34   : > { %2694 = vmatmul.mubr.msk.bf16.gmra.mxu0 %vm646_vm0, %v2837_v20  ;;  %2758 = vmatmul.mubr.msk.bf16.gmra.mxu1 %vm646_vm0, %v2838_v21 }
  0x35   : > { %2697 = vmatprep.mubr.msk.bf16.mxu0 %vm646_vm0, %v2839_v22  ;;  %2761 = vmatprep.mubr.msk.bf16.mxu1 %vm646_vm0, %v2840_v23 }
  0x3c   : > { %2698 = vmatmul.mubr.msk.bf16.gmra.mxu0 %vm646_vm0, %v2841_v24  ;;  %2762 = vmatmul.mubr.msk.bf16.gmra.mxu1 %vm646_vm0, %v2842_v25 }
  0x3d   : > { %2701 = vmatprep.mubr.msk.bf16.mxu0 %vm646_vm0, %v2843_v26  ;;  %2765 = vmatprep.mubr.msk.bf16.mxu1 %vm646_vm0, %v2844_v27 }
  0x44   : > { %2702 = vmatmul.mubr.msk.bf16.gmra.mxu0 %vm646_vm0, %v2845_v28  ;;  %2766 = vmatmul.mubr.msk.bf16.gmra.mxu1 %vm646_vm0, %v2846_v29 }
  0x45   : > { %2705 = vmatprep.mubr.msk.bf16.mxu0 %vm646_vm0, %v2847_v30  ;;  %2769 = vmatprep.mubr.msk.bf16.mxu1 %vm646_vm0, %v2848_v31 }
  0x4c   : > { %2706 = vmatmul.mubr.msk.bf16.gmra.mxu0 %vm646_vm0, %v2849_v32  ;;  %2770 = vmatmul.mubr.msk.bf16.gmra.mxu1 %vm646_vm0, %v2850_v33 }
  0x4d   : > { %2709 = vmatprep.mubr.msk.bf16.mxu0 %vm646_vm0, %v2851_v34  ;;  %2773 = vmatprep.mubr.msk.bf16.mxu1 %vm646_vm0, %v2852_v35 }
  0x54   : > { %2710 = vmatmul.mubr.msk.bf16.gmra.mxu0 %vm646_vm0, %v2853_v36  ;;  %2774 = vmatmul.mubr.msk.bf16.gmra.mxu1 %vm646_vm0, %v2854_v37 }
  0x55   : > { %2713 = vmatprep.mubr.msk.bf16.mxu0 %vm646_vm0, %v2855_v38  ;;  %2777 = vmatprep.mubr.msk.bf16.mxu1 %vm646_vm0, %v2856_v39 }
  0x5c   : > { %2714 = vmatmul.mubr.msk.bf16.gmra.mxu0 %vm646_vm0, %v2857_v40  ;;  %2778 = vmatmul.mubr.msk.bf16.gmra.mxu1 %vm646_vm0, %v2858_v41 }
  0x5d   : > { %2717 = vmatprep.mubr.msk.bf16.mxu0 %vm646_vm0, %v2859_v42  ;;  %2781 = vmatprep.mubr.msk.bf16.mxu1 %vm646_vm0, %v2860_v43 }
  0x64   : > { %2718 = vmatmul.mubr.msk.bf16.gmra.mxu0 %vm646_vm0, %v2861_v44  ;;  %2782 = vmatmul.mubr.msk.bf16.gmra.mxu1 %vm646_vm0, %v2862_v45 }
  0x65   : > { %2721 = vmatprep.mubr.msk.bf16.mxu0 %vm646_vm0, %v2863_v46  ;;  %2785 = vmatprep.mubr.msk.bf16.mxu1 %vm646_vm0, %v2864_v47 }
  0x6c   : > { %2722 = vmatmul.mubr.msk.bf16.gmra.mxu0 %vm646_vm0, %v2865_v48  ;;  %2786 = vmatmul.mubr.msk.bf16.gmra.mxu1 %vm646_vm0, %v2866_v49 }
  0x6d   : > { %2725 = vmatprep.mubr.msk.bf16.mxu0 %vm646_vm0, %v2867_v50  ;;  %2789 = vmatprep.mubr.msk.bf16.mxu1 %vm646_vm0, %v2868_v51 }
  0x74   : > { %2726 = vmatmul.mubr.msk.bf16.gmra.mxu0 %vm646_vm0, %v2869_v52  ;;  %2790 = vmatmul.mubr.msk.bf16.gmra.mxu1 %vm646_vm0, %v2870_v53 }
  0x75   : > { %2729 = vmatprep.mubr.msk.bf16.mxu0 %vm646_vm0, %v2871_v54  ;;  %2793 = vmatprep.mubr.msk.bf16.mxu1 %vm646_vm0, %v2872_v55 }
  0x7c   : > { %2730 = vmatmul.mubr.msk.bf16.gmra.mxu0 %vm646_vm0, %v2873_v56  ;;  %2794 = vmatmul.mubr.msk.bf16.gmra.mxu1 %vm646_vm0, %v2874_v57 }
  0x7d   : > { %2733 = vmatprep.mubr.msk.bf16.mxu0 %vm646_vm0, %v2875_v58  ;;  %2797 = vmatprep.mubr.msk.bf16.mxu1 %vm646_vm0, %v2876_v59 }
  0x84   : > { %2734 = vmatmul.mubr.msk.bf16.gmra.mxu0 %vm646_vm0, %v2877_v60  ;;  %2798 = vmatmul.mubr.msk.bf16.gmra.mxu1 %vm646_vm0, %v2878_v61 }
  0x85   : > { %2737 = vmatprep.mubr.msk.bf16.mxu0 %vm646_vm0, %v2879_v62  ;;  %2801 = vmatprep.mubr.msk.bf16.mxu1 %vm646_vm0, %v2880_v63 }
  0x8c   : > { %2738 = vmatmul.mubr.msk.bf16.gmra.mxu0 %vm646_vm0, %v2881_v0  ;;  %2802 = vmatmul.mubr.msk.bf16.gmra.mxu1 %vm646_vm0, %v2882_v1 }
  0xd4   : > { %v2679_v3 = vpop.f32.mrf.mxu0  ;;  %v2743_v5 = vpop.f32.mrf.mxu1 }
  0xd5   : > { %v882_v4 = vadd.f32 %v2679_v3, %v3067_v2  ;;  %v1138_v6 = vadd.f32 %v2743_v5, %v3067_v2 }
  0xd6   : > { %v873_v7 = vpop.f32.mrf.mxu0  ;;  %v1129_v10 = vpop.f32.mrf.mxu1 }
  0xd7   : > { %v1386_v8 = vmax.f32 %v882_v4, 0.0  ;;  %v874_v9 = vadd.f32 %v3067_v2, %v873_v7  ;;  %v1450_v11 = vmax.f32 %v1138_v6, 0.0  ;;  %v1130_v12 = vadd.f32 %v3067_v2, %v1129_v10 }
  0xd8   : > { %v2680_v13 = vpop.f32.mrf.mxu0  ;;  %v2744_v17 = vpop.f32.mrf.mxu1 }
  0xd9   : > { %v2481_v14 = vpack.c.bf16 %v1386_v8, %v1386_v8  ;;  %v1384_v15 = vmax.f32 %v874_v9, 0.0  ;;  %v885_v16 = vadd.f32 %v2680_v13, %v3067_v2  ;;  %v2545_v18 = vpack.c.bf16 %v1450_v11, %v1450_v11 }
  0xda   : > { %v1448_v19 = vmax.f32 %v1130_v12, 0.0  ;;  %v1141_v20 = vadd.f32 %v2744_v17, %v3067_v2  ;;  %v876_v21 = vpop.f32.mrf.mxu0  ;;  %v1132_v25 = vpop.f32.mrf.mxu1 }
  0xdb   : > { %2027 = vst.msk [vmem:[%s3077_s27 + $0x8] sm:$0xf] %vm2024_vm1, %v2481_v14  ;;  %v2479_v22 = vpack.c.bf16 %v1384_v15, %v1384_v15  ;;  %v1387_v23 = vmax.f32 %v885_v16, 0.0  ;;  %v877_v24 = vadd.f32 %v3067_v2, %v876_v21  ;;  %2091 = vst.msk [vmem:[%s3077_s27 + $0x108] sm:$0xf] %vm2024_vm1, %v2545_v18  ;;  %v1133_v28 = vadd.f32 %v3067_v2, %v1132_v25 }
  0xdc   : > { %v2543_v26 = vpack.c.bf16 %v1448_v19, %v1448_v19  ;;  %v1451_v27 = vmax.f32 %v1141_v20, 0.0  ;;  %v2683_v29 = vpop.f32.mrf.mxu0  ;;  %v2747_v33 = vpop.f32.mrf.mxu1 }
  0xdd   : > { %2025 = vst.msk [vmem:[%s3077_s27] sm:$0xf] %vm2024_vm1, %v2479_v22  ;;  %v2482_v30 = vpack.c.bf16 %v1387_v23, %v1387_v23  ;;  %v1385_v31 = vmax.f32 %v877_v24, 0.0  ;;  %v898_v32 = vadd.f32 %v2683_v29, %v3067_v2  ;;  %v1449_v35 = vmax.f32 %v1133_v28, 0.0 }
  0xde   : > { %2089 = vst.msk [vmem:[%s3077_s27 + $0x100] sm:$0xf] %vm2024_vm1, %v2543_v26  ;;  %v2546_v34 = vpack.c.bf16 %v1451_v27, %v1451_v27  ;;  %v1154_v36 = vadd.f32 %v2747_v33, %v3067_v2  ;;  %v889_v37 = vpop.f32.mrf.mxu0  ;;  %v1145_v41 = vpop.f32.mrf.mxu1 }
  0xdf   : > { %2028 = vst.msk [vmem:[%s3077_s27 + $0xc] sm:$0xf] %vm2024_vm1, %v2482_v30  ;;  %v2480_v38 = vpack.c.bf16 %v1385_v31, %v1385_v31  ;;  %v1390_v39 = vmax.f32 %v898_v32, 0.0  ;;  %v890_v40 = vadd.f32 %v3067_v2, %v889_v37  ;;  %v2544_v42 = vpack.c.bf16 %v1449_v35, %v1449_v35 }
  0xe0   : > { %2092 = vst.msk [vmem:[%s3077_s27 + $0x10c] sm:$0xf] %vm2024_vm1, %v2546_v34  ;;  %v1454_v43 = vmax.f32 %v1154_v36, 0.0  ;;  %v1146_v44 = vadd.f32 %v3067_v2, %v1145_v41  ;;  %v2684_v45 = vpop.f32.mrf.mxu0  ;;  %v2748_v49 = vpop.f32.mrf.mxu1 }
  0xe1   : > { %2026 = vst.msk [vmem:[%s3077_s27 + $0x4] sm:$0xf] %vm2024_vm1, %v2480_v38  ;;  %v2485_v46 = vpack.c.bf16 %v1390_v39, %v1390_v39  ;;  %v1388_v47 = vmax.f32 %v890_v40, 0.0  ;;  %v901_v48 = vadd.f32 %v2684_v45, %v3067_v2  ;;  %2090 = vst.msk [vmem:[%s3077_s27 + $0x104] sm:$0xf] %vm2024_vm1, %v2544_v42  ;;  %v1157_v52 = vadd.f32 %v2748_v49, %v3067_v2 }
  0xe2   : > { %v2549_v50 = vpack.c.bf16 %v1454_v43, %v1454_v43  ;;  %v1452_v51 = vmax.f32 %v1146_v44, 0.0  ;;  %v892_v53 = vpop.f32.mrf.mxu0  ;;  %v1148_v57 = vpop.f32.mrf.mxu1 }
  0xe3   : > { %2031 = vst.msk [vmem:[%s3077_s27 + $0x18] sm:$0xf] %vm2024_vm1, %v2485_v46  ;;  %v2483_v54 = vpack.c.bf16 %v1388_v47, %v1388_v47  ;;  %v1391_v55 = vmax.f32 %v901_v48, 0.0  ;;  %v893_v56 = vadd.f32 %v3067_v2, %v892_v53  ;;  %v1455_v59 = vmax.f32 %v1157_v52, 0.0 }
  0xe4   : > { %2095 = vst.msk [vmem:[%s3077_s27 + $0x118] sm:$0xf] %vm2024_vm1, %v2549_v50  ;;  %v2547_v58 = vpack.c.bf16 %v1452_v51, %v1452_v51  ;;  %v1149_v60 = vadd.f32 %v3067_v2, %v1148_v57  ;;  %v2687_v61 = vpop.f32.mrf.mxu0  ;;  %v2751_v1 = vpop.f32.mrf.mxu1 }
  0xe5   : > { %2029 = vst.msk [vmem:[%s3077_s27 + $0x10] sm:$0xf] %vm2024_vm1, %v2483_v54  ;;  %v2486_v62 = vpack.c.bf16 %v1391_v55, %v1391_v55  ;;  %v1389_v63 = vmax.f32 %v893_v56, 0.0  ;;  %v914_v0 = vadd.f32 %v2687_v61, %v3067_v2  ;;  %v2550_v3 = vpack.c.bf16 %v1455_v59, %v1455_v59 }
  0xe6   : > { %2093 = vst.msk [vmem:[%s3077_s27 + $0x110] sm:$0xf] %vm2024_vm1, %v2547_v58  ;;  %v1453_v4 = vmax.f32 %v1149_v60, 0.0  ;;  %v1170_v5 = vadd.f32 %v2751_v1, %v3067_v2  ;;  %v905_v6 = vpop.f32.mrf.mxu0  ;;  %v1161_v10 = vpop.f32.mrf.mxu1 }
  0xe7   : > { %2032 = vst.msk [vmem:[%s3077_s27 + $0x1c] sm:$0xf] %vm2024_vm1, %v2486_v62  ;;  %v2484_v7 = vpack.c.bf16 %v1389_v63, %v1389_v63  ;;  %v1394_v8 = vmax.f32 %v914_v0, 0.0  ;;  %v906_v9 = vadd.f32 %v3067_v2, %v905_v6  ;;  %2096 = vst.msk [vmem:[%s3077_s27 + $0x11c] sm:$0xf] %vm2024_vm1, %v2550_v3  ;;  %v1162_v13 = vadd.f32 %v3067_v2, %v1161_v10 }
  0xe8   : > { %v2548_v11 = vpack.c.bf16 %v1453_v4, %v1453_v4  ;;  %v1458_v12 = vmax.f32 %v1170_v5, 0.0  ;;  %v2688_v14 = vpop.f32.mrf.mxu0  ;;  %v2752_v18 = vpop.f32.mrf.mxu1 }
  0xe9   : > { %2030 = vst.msk [vmem:[%s3077_s27 + $0x14] sm:$0xf] %vm2024_vm1, %v2484_v7  ;;  %v2489_v15 = vpack.c.bf16 %v1394_v8, %v1394_v8  ;;  %v1392_v16 = vmax.f32 %v906_v9, 0.0  ;;  %v917_v17 = vadd.f32 %v2688_v14, %v3067_v2  ;;  %v1456_v20 = vmax.f32 %v1162_v13, 0.0 }
  0xea   : > { %2094 = vst.msk [vmem:[%s3077_s27 + $0x114] sm:$0xf] %vm2024_vm1, %v2548_v11  ;;  %v2553_v19 = vpack.c.bf16 %v1458_v12, %v1458_v12  ;;  %v1173_v21 = vadd.f32 %v2752_v18, %v3067_v2  ;;  %v908_v22 = vpop.f32.mrf.mxu0  ;;  %v1164_v26 = vpop.f32.mrf.mxu1 }
  0xeb   : > { %2035 = vst.msk [vmem:[%s3077_s27 + $0x28] sm:$0xf] %vm2024_vm1, %v2489_v15  ;;  %v2487_v23 = vpack.c.bf16 %v1392_v16, %v1392_v16  ;;  %v1395_v24 = vmax.f32 %v917_v17, 0.0  ;;  %v909_v25 = vadd.f32 %v3067_v2, %v908_v22  ;;  %v2551_v27 = vpack.c.bf16 %v1456_v20, %v1456_v20 }
  0xec   : > { %2099 = vst.msk [vmem:[%s3077_s27 + $0x128] sm:$0xf] %vm2024_vm1, %v2553_v19  ;;  %v1459_v28 = vmax.f32 %v1173_v21, 0.0  ;;  %v1165_v29 = vadd.f32 %v3067_v2, %v1164_v26  ;;  %v2691_v30 = vpop.f32.mrf.mxu0  ;;  %v2755_v34 = vpop.f32.mrf.mxu1 }
  0xed   : > { %2033 = vst.msk [vmem:[%s3077_s27 + $0x20] sm:$0xf] %vm2024_vm1, %v2487_v23  ;;  %v2490_v31 = vpack.c.bf16 %v1395_v24, %v1395_v24  ;;  %v1393_v32 = vmax.f32 %v909_v25, 0.0  ;;  %v930_v33 = vadd.f32 %v2691_v30, %v3067_v2  ;;  %2097 = vst.msk [vmem:[%s3077_s27 + $0x120] sm:$0xf] %vm2024_vm1, %v2551_v27  ;;  %v1186_v37 = vadd.f32 %v2755_v34, %v3067_v2 }
  0xee   : > { %v2554_v35 = vpack.c.bf16 %v1459_v28, %v1459_v28  ;;  %v1457_v36 = vmax.f32 %v1165_v29, 0.0  ;;  %v921_v38 = vpop.f32.mrf.mxu0  ;;  %v1177_v42 = vpop.f32.mrf.mxu1 }
  0xef   : > { %2036 = vst.msk [vmem:[%s3077_s27 + $0x2c] sm:$0xf] %vm2024_vm1, %v2490_v31  ;;  %v2488_v39 = vpack.c.bf16 %v1393_v32, %v1393_v32  ;;  %v1398_v40 = vmax.f32 %v930_v33, 0.0  ;;  %v922_v41 = vadd.f32 %v3067_v2, %v921_v38  ;;  %v1462_v44 = vmax.f32 %v1186_v37, 0.0 }
  0xf0   : > { %2100 = vst.msk [vmem:[%s3077_s27 + $0x12c] sm:$0xf] %vm2024_vm1, %v2554_v35  ;;  %v2552_v43 = vpack.c.bf16 %v1457_v36, %v1457_v36  ;;  %v1178_v45 = vadd.f32 %v3067_v2, %v1177_v42  ;;  %v2692_v46 = vpop.f32.mrf.mxu0  ;;  %v2756_v50 = vpop.f32.mrf.mxu1 }
  0xf1   : > { %2034 = vst.msk [vmem:[%s3077_s27 + $0x24] sm:$0xf] %vm2024_vm1, %v2488_v39  ;;  %v2493_v47 = vpack.c.bf16 %v1398_v40, %v1398_v40  ;;  %v1396_v48 = vmax.f32 %v922_v41, 0.0  ;;  %v933_v49 = vadd.f32 %v2692_v46, %v3067_v2  ;;  %v2557_v51 = vpack.c.bf16 %v1462_v44, %v1462_v44 }
  0xf2   : > { %2098 = vst.msk [vmem:[%s3077_s27 + $0x124] sm:$0xf] %vm2024_vm1, %v2552_v43  ;;  %v1460_v52 = vmax.f32 %v1178_v45, 0.0  ;;  %v1189_v53 = vadd.f32 %v2756_v50, %v3067_v2  ;;  %v924_v54 = vpop.f32.mrf.mxu0  ;;  %v1180_v58 = vpop.f32.mrf.mxu1 }
  0xf3   : > { %2039 = vst.msk [vmem:[%s3077_s27 + $0x38] sm:$0xf] %vm2024_vm1, %v2493_v47  ;;  %v2491_v55 = vpack.c.bf16 %v1396_v48, %v1396_v48  ;;  %v1399_v56 = vmax.f32 %v933_v49, 0.0  ;;  %v925_v57 = vadd.f32 %v3067_v2, %v924_v54  ;;  %2103 = vst.msk [vmem:[%s3077_s27 + $0x138] sm:$0xf] %vm2024_vm1, %v2557_v51  ;;  %v1181_v61 = vadd.f32 %v3067_v2, %v1180_v58 }
  0xf4   : > { %v2555_v59 = vpack.c.bf16 %v1460_v52, %v1460_v52  ;;  %v1463_v60 = vmax.f32 %v1189_v53, 0.0  ;;  %v2695_v62 = vpop.f32.mrf.mxu0  ;;  %v2759_v3 = vpop.f32.mrf.mxu1 }
  0xf5   : > { %2037 = vst.msk [vmem:[%s3077_s27 + $0x30] sm:$0xf] %vm2024_vm1, %v2491_v55  ;;  %v2494_v63 = vpack.c.bf16 %v1399_v56, %v1399_v56  ;;  %v1397_v0 = vmax.f32 %v925_v57, 0.0  ;;  %v946_v1 = vadd.f32 %v2695_v62, %v3067_v2  ;;  %v1461_v5 = vmax.f32 %v1181_v61, 0.0 }
  0xf6   : > { %2101 = vst.msk [vmem:[%s3077_s27 + $0x130] sm:$0xf] %vm2024_vm1, %v2555_v59  ;;  %v2558_v4 = vpack.c.bf16 %v1463_v60, %v1463_v60  ;;  %v1202_v6 = vadd.f32 %v2759_v3, %v3067_v2  ;;  %v937_v7 = vpop.f32.mrf.mxu0  ;;  %v1193_v11 = vpop.f32.mrf.mxu1 }
  0xf7   : > { %2040 = vst.msk [vmem:[%s3077_s27 + $0x3c] sm:$0xf] %vm2024_vm1, %v2494_v63  ;;  %v2492_v8 = vpack.c.bf16 %v1397_v0, %v1397_v0  ;;  %v1402_v9 = vmax.f32 %v946_v1, 0.0  ;;  %v938_v10 = vadd.f32 %v3067_v2, %v937_v7  ;;  %v2556_v12 = vpack.c.bf16 %v1461_v5, %v1461_v5 }
  0xf8   : > { %2104 = vst.msk [vmem:[%s3077_s27 + $0x13c] sm:$0xf] %vm2024_vm1, %v2558_v4  ;;  %v1466_v13 = vmax.f32 %v1202_v6, 0.0  ;;  %v1194_v14 = vadd.f32 %v3067_v2, %v1193_v11  ;;  %v2696_v15 = vpop.f32.mrf.mxu0  ;;  %v2760_v19 = vpop.f32.mrf.mxu1 }
  0xf9   : > { %2038 = vst.msk [vmem:[%s3077_s27 + $0x34] sm:$0xf] %vm2024_vm1, %v2492_v8  ;;  %v2497_v16 = vpack.c.bf16 %v1402_v9, %v1402_v9  ;;  %v1400_v17 = vmax.f32 %v938_v10, 0.0  ;;  %v949_v18 = vadd.f32 %v2696_v15, %v3067_v2  ;;  %2102 = vst.msk [vmem:[%s3077_s27 + $0x134] sm:$0xf] %vm2024_vm1, %v2556_v12  ;;  %v1205_v22 = vadd.f32 %v2760_v19, %v3067_v2 }
  0xfa   : > { %v2561_v20 = vpack.c.bf16 %v1466_v13, %v1466_v13  ;;  %v1464_v21 = vmax.f32 %v1194_v14, 0.0  ;;  %v940_v23 = vpop.f32.mrf.mxu0  ;;  %v1196_v27 = vpop.f32.mrf.mxu1 }
  0xfb   : > { %2043 = vst.msk [vmem:[%s3077_s27 + $0x48] sm:$0xf] %vm2024_vm1, %v2497_v16  ;;  %v2495_v24 = vpack.c.bf16 %v1400_v17, %v1400_v17  ;;  %v1403_v25 = vmax.f32 %v949_v18, 0.0  ;;  %v941_v26 = vadd.f32 %v3067_v2, %v940_v23  ;;  %v1467_v29 = vmax.f32 %v1205_v22, 0.0 }
  0xfc   : > { %2107 = vst.msk [vmem:[%s3077_s27 + $0x148] sm:$0xf] %vm2024_vm1, %v2561_v20  ;;  %v2559_v28 = vpack.c.bf16 %v1464_v21, %v1464_v21  ;;  %v1197_v30 = vadd.f32 %v3067_v2, %v1196_v27  ;;  %v2699_v31 = vpop.f32.mrf.mxu0  ;;  %v2763_v35 = vpop.f32.mrf.mxu1 }
  0xfd   : > { %2041 = vst.msk [vmem:[%s3077_s27 + $0x40] sm:$0xf] %vm2024_vm1, %v2495_v24  ;;  %v2498_v32 = vpack.c.bf16 %v1403_v25, %v1403_v25  ;;  %v1401_v33 = vmax.f32 %v941_v26, 0.0  ;;  %v962_v34 = vadd.f32 %v2699_v31, %v3067_v2  ;;  %v2562_v36 = vpack.c.bf16 %v1467_v29, %v1467_v29 }
  0xfe   : > { %2105 = vst.msk [vmem:[%s3077_s27 + $0x140] sm:$0xf] %vm2024_vm1, %v2559_v28  ;;  %v1465_v37 = vmax.f32 %v1197_v30, 0.0  ;;  %v1218_v38 = vadd.f32 %v2763_v35, %v3067_v2  ;;  %v953_v39 = vpop.f32.mrf.mxu0  ;;  %v1209_v43 = vpop.f32.mrf.mxu1 }
  0xff   : > { %2044 = vst.msk [vmem:[%s3077_s27 + $0x4c] sm:$0xf] %vm2024_vm1, %v2498_v32  ;;  %v2496_v40 = vpack.c.bf16 %v1401_v33, %v1401_v33  ;;  %v1406_v41 = vmax.f32 %v962_v34, 0.0  ;;  %v954_v42 = vadd.f32 %v3067_v2, %v953_v39  ;;  %2108 = vst.msk [vmem:[%s3077_s27 + $0x14c] sm:$0xf] %vm2024_vm1, %v2562_v36  ;;  %v1210_v46 = vadd.f32 %v3067_v2, %v1209_v43 }
 0x100   : > { %v2560_v44 = vpack.c.bf16 %v1465_v37, %v1465_v37  ;;  %v1470_v45 = vmax.f32 %v1218_v38, 0.0  ;;  %v2700_v47 = vpop.f32.mrf.mxu0  ;;  %v2764_v51 = vpop.f32.mrf.mxu1 }
 0x101   : > { %2042 = vst.msk [vmem:[%s3077_s27 + $0x44] sm:$0xf] %vm2024_vm1, %v2496_v40  ;;  %v2501_v48 = vpack.c.bf16 %v1406_v41, %v1406_v41  ;;  %v1404_v49 = vmax.f32 %v954_v42, 0.0  ;;  %v965_v50 = vadd.f32 %v2700_v47, %v3067_v2  ;;  %v1468_v53 = vmax.f32 %v1210_v46, 0.0 }
 0x102   : > { %2106 = vst.msk [vmem:[%s3077_s27 + $0x144] sm:$0xf] %vm2024_vm1, %v2560_v44  ;;  %v2565_v52 = vpack.c.bf16 %v1470_v45, %v1470_v45  ;;  %v1221_v54 = vadd.f32 %v2764_v51, %v3067_v2  ;;  %v956_v55 = vpop.f32.mrf.mxu0  ;;  %v1212_v59 = vpop.f32.mrf.mxu1 }
 0x103   : > { %2047 = vst.msk [vmem:[%s3077_s27 + $0x58] sm:$0xf] %vm2024_vm1, %v2501_v48  ;;  %v2499_v56 = vpack.c.bf16 %v1404_v49, %v1404_v49  ;;  %v1407_v57 = vmax.f32 %v965_v50, 0.0  ;;  %v957_v58 = vadd.f32 %v3067_v2, %v956_v55  ;;  %v2563_v60 = vpack.c.bf16 %v1468_v53, %v1468_v53 }
 0x104   : > { %2111 = vst.msk [vmem:[%s3077_s27 + $0x158] sm:$0xf] %vm2024_vm1, %v2565_v52  ;;  %v1471_v61 = vmax.f32 %v1221_v54, 0.0  ;;  %v1213_v62 = vadd.f32 %v3067_v2, %v1212_v59  ;;  %v2703_v63 = vpop.f32.mrf.mxu0  ;;  %v2767_v4 = vpop.f32.mrf.mxu1 }
 0x105   : > { %2045 = vst.msk [vmem:[%s3077_s27 + $0x50] sm:$0xf] %vm2024_vm1, %v2499_v56  ;;  %v2502_v0 = vpack.c.bf16 %v1407_v57, %v1407_v57  ;;  %v1405_v1 = vmax.f32 %v957_v58, 0.0  ;;  %v978_v3 = vadd.f32 %v2703_v63, %v3067_v2  ;;  %2109 = vst.msk [vmem:[%s3077_s27 + $0x150] sm:$0xf] %vm2024_vm1, %v2563_v60  ;;  %v1234_v7 = vadd.f32 %v2767_v4, %v3067_v2 }
 0x106   : > { %v2566_v5 = vpack.c.bf16 %v1471_v61, %v1471_v61  ;;  %v1469_v6 = vmax.f32 %v1213_v62, 0.0  ;;  %v969_v8 = vpop.f32.mrf.mxu0  ;;  %v1225_v12 = vpop.f32.mrf.mxu1 }
 0x107   : > { %2048 = vst.msk [vmem:[%s3077_s27 + $0x5c] sm:$0xf] %vm2024_vm1, %v2502_v0  ;;  %v2500_v9 = vpack.c.bf16 %v1405_v1, %v1405_v1  ;;  %v1410_v10 = vmax.f32 %v978_v3, 0.0  ;;  %v970_v11 = vadd.f32 %v3067_v2, %v969_v8  ;;  %v1474_v14 = vmax.f32 %v1234_v7, 0.0 }
 0x108   : > { %2112 = vst.msk [vmem:[%s3077_s27 + $0x15c] sm:$0xf] %vm2024_vm1, %v2566_v5  ;;  %v2564_v13 = vpack.c.bf16 %v1469_v6, %v1469_v6  ;;  %v1226_v15 = vadd.f32 %v3067_v2, %v1225_v12  ;;  %v2704_v16 = vpop.f32.mrf.mxu0  ;;  %v2768_v20 = vpop.f32.mrf.mxu1 }
 0x109   : > { %2046 = vst.msk [vmem:[%s3077_s27 + $0x54] sm:$0xf] %vm2024_vm1, %v2500_v9  ;;  %v2505_v17 = vpack.c.bf16 %v1410_v10, %v1410_v10  ;;  %v1408_v18 = vmax.f32 %v970_v11, 0.0  ;;  %v981_v19 = vadd.f32 %v2704_v16, %v3067_v2  ;;  %v2569_v21 = vpack.c.bf16 %v1474_v14, %v1474_v14 }
 0x10a   : > { %2110 = vst.msk [vmem:[%s3077_s27 + $0x154] sm:$0xf] %vm2024_vm1, %v2564_v13  ;;  %v1472_v22 = vmax.f32 %v1226_v15, 0.0  ;;  %v1237_v23 = vadd.f32 %v2768_v20, %v3067_v2  ;;  %v972_v24 = vpop.f32.mrf.mxu0  ;;  %v1228_v28 = vpop.f32.mrf.mxu1 }
 0x10b   : > { %2051 = vst.msk [vmem:[%s3077_s27 + $0x68] sm:$0xf] %vm2024_vm1, %v2505_v17  ;;  %v2503_v25 = vpack.c.bf16 %v1408_v18, %v1408_v18  ;;  %v1411_v26 = vmax.f32 %v981_v19, 0.0  ;;  %v973_v27 = vadd.f32 %v3067_v2, %v972_v24  ;;  %2115 = vst.msk [vmem:[%s3077_s27 + $0x168] sm:$0xf] %vm2024_vm1, %v2569_v21  ;;  %v1229_v31 = vadd.f32 %v3067_v2, %v1228_v28 }
 0x10c   : > { %v2567_v29 = vpack.c.bf16 %v1472_v22, %v1472_v22  ;;  %v1475_v30 = vmax.f32 %v1237_v23, 0.0  ;;  %v2707_v32 = vpop.f32.mrf.mxu0  ;;  %v2771_v36 = vpop.f32.mrf.mxu1 }
 0x10d   : > { %2049 = vst.msk [vmem:[%s3077_s27 + $0x60] sm:$0xf] %vm2024_vm1, %v2503_v25  ;;  %v2506_v33 = vpack.c.bf16 %v1411_v26, %v1411_v26  ;;  %v1409_v34 = vmax.f32 %v973_v27, 0.0  ;;  %v994_v35 = vadd.f32 %v2707_v32, %v3067_v2  ;;  %v1473_v38 = vmax.f32 %v1229_v31, 0.0 }
 0x10e   : > { %2113 = vst.msk [vmem:[%s3077_s27 + $0x160] sm:$0xf] %vm2024_vm1, %v2567_v29  ;;  %v2570_v37 = vpack.c.bf16 %v1475_v30, %v1475_v30  ;;  %v1250_v39 = vadd.f32 %v2771_v36, %v3067_v2  ;;  %v985_v40 = vpop.f32.mrf.mxu0  ;;  %v1241_v44 = vpop.f32.mrf.mxu1 }
 0x10f   : > { %2052 = vst.msk [vmem:[%s3077_s27 + $0x6c] sm:$0xf] %vm2024_vm1, %v2506_v33  ;;  %v2504_v41 = vpack.c.bf16 %v1409_v34, %v1409_v34  ;;  %v1414_v42 = vmax.f32 %v994_v35, 0.0  ;;  %v986_v43 = vadd.f32 %v3067_v2, %v985_v40  ;;  %v2568_v45 = vpack.c.bf16 %v1473_v38, %v1473_v38 }
 0x110   : > { %2116 = vst.msk [vmem:[%s3077_s27 + $0x16c] sm:$0xf] %vm2024_vm1, %v2570_v37  ;;  %v1478_v46 = vmax.f32 %v1250_v39, 0.0  ;;  %v1242_v47 = vadd.f32 %v3067_v2, %v1241_v44  ;;  %v2708_v48 = vpop.f32.mrf.mxu0  ;;  %v2772_v52 = vpop.f32.mrf.mxu1 }
 0x111   : > { %2050 = vst.msk [vmem:[%s3077_s27 + $0x64] sm:$0xf] %vm2024_vm1, %v2504_v41  ;;  %v2509_v49 = vpack.c.bf16 %v1414_v42, %v1414_v42  ;;  %v1412_v50 = vmax.f32 %v986_v43, 0.0  ;;  %v997_v51 = vadd.f32 %v2708_v48, %v3067_v2  ;;  %2114 = vst.msk [vmem:[%s3077_s27 + $0x164] sm:$0xf] %vm2024_vm1, %v2568_v45  ;;  %v1253_v55 = vadd.f32 %v2772_v52, %v3067_v2 }
 0x112   : > { %v2573_v53 = vpack.c.bf16 %v1478_v46, %v1478_v46  ;;  %v1476_v54 = vmax.f32 %v1242_v47, 0.0  ;;  %v988_v56 = vpop.f32.mrf.mxu0  ;;  %v1244_v60 = vpop.f32.mrf.mxu1 }
 0x113   : > { %2055 = vst.msk [vmem:[%s3077_s27 + $0x78] sm:$0xf] %vm2024_vm1, %v2509_v49  ;;  %v2507_v57 = vpack.c.bf16 %v1412_v50, %v1412_v50  ;;  %v1415_v58 = vmax.f32 %v997_v51, 0.0  ;;  %v989_v59 = vadd.f32 %v3067_v2, %v988_v56  ;;  %v1479_v62 = vmax.f32 %v1253_v55, 0.0 }
 0x114   : > { %2119 = vst.msk [vmem:[%s3077_s27 + $0x178] sm:$0xf] %vm2024_vm1, %v2573_v53  ;;  %v2571_v61 = vpack.c.bf16 %v1476_v54, %v1476_v54  ;;  %v1245_v63 = vadd.f32 %v3067_v2, %v1244_v60  ;;  %v2711_v0 = vpop.f32.mrf.mxu0  ;;  %v2775_v5 = vpop.f32.mrf.mxu1 }
 0x115   : > { %2053 = vst.msk [vmem:[%s3077_s27 + $0x70] sm:$0xf] %vm2024_vm1, %v2507_v57  ;;  %v2510_v1 = vpack.c.bf16 %v1415_v58, %v1415_v58  ;;  %v1413_v3 = vmax.f32 %v989_v59, 0.0  ;;  %v1010_v4 = vadd.f32 %v2711_v0, %v3067_v2  ;;  %v2574_v6 = vpack.c.bf16 %v1479_v62, %v1479_v62 }
 0x116   : > { %2117 = vst.msk [vmem:[%s3077_s27 + $0x170] sm:$0xf] %vm2024_vm1, %v2571_v61  ;;  %v1477_v7 = vmax.f32 %v1245_v63, 0.0  ;;  %v1266_v8 = vadd.f32 %v2775_v5, %v3067_v2  ;;  %v1001_v9 = vpop.f32.mrf.mxu0  ;;  %v1257_v13 = vpop.f32.mrf.mxu1 }
 0x117   : > { %2056 = vst.msk [vmem:[%s3077_s27 + $0x7c] sm:$0xf] %vm2024_vm1, %v2510_v1  ;;  %v2508_v10 = vpack.c.bf16 %v1413_v3, %v1413_v3  ;;  %v1418_v11 = vmax.f32 %v1010_v4, 0.0  ;;  %v1002_v12 = vadd.f32 %v3067_v2, %v1001_v9  ;;  %2120 = vst.msk [vmem:[%s3077_s27 + $0x17c] sm:$0xf] %vm2024_vm1, %v2574_v6  ;;  %v1258_v16 = vadd.f32 %v3067_v2, %v1257_v13 }
 0x118   : > { %v2572_v14 = vpack.c.bf16 %v1477_v7, %v1477_v7  ;;  %v1482_v15 = vmax.f32 %v1266_v8, 0.0  ;;  %v2712_v17 = vpop.f32.mrf.mxu0  ;;  %v2776_v21 = vpop.f32.mrf.mxu1 }
 0x119   : > { %2054 = vst.msk [vmem:[%s3077_s27 + $0x74] sm:$0xf] %vm2024_vm1, %v2508_v10  ;;  %v2513_v18 = vpack.c.bf16 %v1418_v11, %v1418_v11  ;;  %v1416_v19 = vmax.f32 %v1002_v12, 0.0  ;;  %v1013_v20 = vadd.f32 %v2712_v17, %v3067_v2  ;;  %v1480_v23 = vmax.f32 %v1258_v16, 0.0 }
 0x11a   : > { %2118 = vst.msk [vmem:[%s3077_s27 + $0x174] sm:$0xf] %vm2024_vm1, %v2572_v14  ;;  %v2577_v22 = vpack.c.bf16 %v1482_v15, %v1482_v15  ;;  %v1269_v24 = vadd.f32 %v2776_v21, %v3067_v2  ;;  %v1004_v25 = vpop.f32.mrf.mxu0  ;;  %v1260_v29 = vpop.f32.mrf.mxu1 }
 0x11b   : > { %2059 = vst.msk [vmem:[%s3077_s27 + $0x88] sm:$0xf] %vm2024_vm1, %v2513_v18  ;;  %v2511_v26 = vpack.c.bf16 %v1416_v19, %v1416_v19  ;;  %v1419_v27 = vmax.f32 %v1013_v20, 0.0  ;;  %v1005_v28 = vadd.f32 %v3067_v2, %v1004_v25  ;;  %v2575_v30 = vpack.c.bf16 %v1480_v23, %v1480_v23 }
 0x11c   : > { %2123 = vst.msk [vmem:[%s3077_s27 + $0x188] sm:$0xf] %vm2024_vm1, %v2577_v22  ;;  %v1483_v31 = vmax.f32 %v1269_v24, 0.0  ;;  %v1261_v32 = vadd.f32 %v3067_v2, %v1260_v29  ;;  %v2715_v33 = vpop.f32.mrf.mxu0  ;;  %v2779_v37 = vpop.f32.mrf.mxu1 }
 0x11d   : > { %2057 = vst.msk [vmem:[%s3077_s27 + $0x80] sm:$0xf] %vm2024_vm1, %v2511_v26  ;;  %v2514_v34 = vpack.c.bf16 %v1419_v27, %v1419_v27  ;;  %v1417_v35 = vmax.f32 %v1005_v28, 0.0  ;;  %v1026_v36 = vadd.f32 %v2715_v33, %v3067_v2  ;;  %2121 = vst.msk [vmem:[%s3077_s27 + $0x180] sm:$0xf] %vm2024_vm1, %v2575_v30  ;;  %v1282_v40 = vadd.f32 %v2779_v37, %v3067_v2 }
 0x11e   : > { %v2578_v38 = vpack.c.bf16 %v1483_v31, %v1483_v31  ;;  %v1481_v39 = vmax.f32 %v1261_v32, 0.0  ;;  %v1017_v41 = vpop.f32.mrf.mxu0  ;;  %v1273_v45 = vpop.f32.mrf.mxu1 }
 0x11f   : > { %2060 = vst.msk [vmem:[%s3077_s27 + $0x8c] sm:$0xf] %vm2024_vm1, %v2514_v34  ;;  %v2512_v42 = vpack.c.bf16 %v1417_v35, %v1417_v35  ;;  %v1422_v43 = vmax.f32 %v1026_v36, 0.0  ;;  %v1018_v44 = vadd.f32 %v3067_v2, %v1017_v41  ;;  %v1486_v47 = vmax.f32 %v1282_v40, 0.0 }
 0x120   : > { %2124 = vst.msk [vmem:[%s3077_s27 + $0x18c] sm:$0xf] %vm2024_vm1, %v2578_v38  ;;  %v2576_v46 = vpack.c.bf16 %v1481_v39, %v1481_v39  ;;  %v1274_v48 = vadd.f32 %v3067_v2, %v1273_v45  ;;  %v2716_v49 = vpop.f32.mrf.mxu0  ;;  %v2780_v53 = vpop.f32.mrf.mxu1 }
 0x121   : > { %2058 = vst.msk [vmem:[%s3077_s27 + $0x84] sm:$0xf] %vm2024_vm1, %v2512_v42  ;;  %v2517_v50 = vpack.c.bf16 %v1422_v43, %v1422_v43  ;;  %v1420_v51 = vmax.f32 %v1018_v44, 0.0  ;;  %v1029_v52 = vadd.f32 %v2716_v49, %v3067_v2  ;;  %v2581_v54 = vpack.c.bf16 %v1486_v47, %v1486_v47 }
 0x122   : > { %2122 = vst.msk [vmem:[%s3077_s27 + $0x184] sm:$0xf] %vm2024_vm1, %v2576_v46  ;;  %v1484_v55 = vmax.f32 %v1274_v48, 0.0  ;;  %v1285_v56 = vadd.f32 %v2780_v53, %v3067_v2  ;;  %v1020_v57 = vpop.f32.mrf.mxu0  ;;  %v1276_v61 = vpop.f32.mrf.mxu1 }
 0x123   : > { %2063 = vst.msk [vmem:[%s3077_s27 + $0x98] sm:$0xf] %vm2024_vm1, %v2517_v50  ;;  %v2515_v58 = vpack.c.bf16 %v1420_v51, %v1420_v51  ;;  %v1423_v59 = vmax.f32 %v1029_v52, 0.0  ;;  %v1021_v60 = vadd.f32 %v3067_v2, %v1020_v57  ;;  %2127 = vst.msk [vmem:[%s3077_s27 + $0x198] sm:$0xf] %vm2024_vm1, %v2581_v54  ;;  %v1277_v0 = vadd.f32 %v3067_v2, %v1276_v61 }
 0x124   : > { %v2579_v62 = vpack.c.bf16 %v1484_v55, %v1484_v55  ;;  %v1487_v63 = vmax.f32 %v1285_v56, 0.0  ;;  %v2719_v1 = vpop.f32.mrf.mxu0  ;;  %v2783_v6 = vpop.f32.mrf.mxu1 }
 0x125   : > { %2061 = vst.msk [vmem:[%s3077_s27 + $0x90] sm:$0xf] %vm2024_vm1, %v2515_v58  ;;  %v2518_v3 = vpack.c.bf16 %v1423_v59, %v1423_v59  ;;  %v1421_v4 = vmax.f32 %v1021_v60, 0.0  ;;  %v1042_v5 = vadd.f32 %v2719_v1, %v3067_v2  ;;  %v1485_v8 = vmax.f32 %v1277_v0, 0.0 }
 0x126   : > { %2125 = vst.msk [vmem:[%s3077_s27 + $0x190] sm:$0xf] %vm2024_vm1, %v2579_v62  ;;  %v2582_v7 = vpack.c.bf16 %v1487_v63, %v1487_v63  ;;  %v1298_v9 = vadd.f32 %v2783_v6, %v3067_v2  ;;  %v1033_v10 = vpop.f32.mrf.mxu0  ;;  %v1289_v14 = vpop.f32.mrf.mxu1 }
 0x127   : > { %2064 = vst.msk [vmem:[%s3077_s27 + $0x9c] sm:$0xf] %vm2024_vm1, %v2518_v3  ;;  %v2516_v11 = vpack.c.bf16 %v1421_v4, %v1421_v4  ;;  %v1426_v12 = vmax.f32 %v1042_v5, 0.0  ;;  %v1034_v13 = vadd.f32 %v3067_v2, %v1033_v10  ;;  %v2580_v15 = vpack.c.bf16 %v1485_v8, %v1485_v8 }
 0x128   : > { %2128 = vst.msk [vmem:[%s3077_s27 + $0x19c] sm:$0xf] %vm2024_vm1, %v2582_v7  ;;  %v1490_v16 = vmax.f32 %v1298_v9, 0.0  ;;  %v1290_v17 = vadd.f32 %v3067_v2, %v1289_v14  ;;  %v2720_v18 = vpop.f32.mrf.mxu0  ;;  %v2784_v22 = vpop.f32.mrf.mxu1 }
 0x129   : > { %2062 = vst.msk [vmem:[%s3077_s27 + $0x94] sm:$0xf] %vm2024_vm1, %v2516_v11  ;;  %v2521_v19 = vpack.c.bf16 %v1426_v12, %v1426_v12  ;;  %v1424_v20 = vmax.f32 %v1034_v13, 0.0  ;;  %v1045_v21 = vadd.f32 %v2720_v18, %v3067_v2  ;;  %2126 = vst.msk [vmem:[%s3077_s27 + $0x194] sm:$0xf] %vm2024_vm1, %v2580_v15  ;;  %v1301_v25 = vadd.f32 %v2784_v22, %v3067_v2 }
 0x12a   : > { %v2585_v23 = vpack.c.bf16 %v1490_v16, %v1490_v16  ;;  %v1488_v24 = vmax.f32 %v1290_v17, 0.0  ;;  %v1036_v26 = vpop.f32.mrf.mxu0  ;;  %v1292_v30 = vpop.f32.mrf.mxu1 }
 0x12b   : > { %2067 = vst.msk [vmem:[%s3077_s27 + $0xa8] sm:$0xf] %vm2024_vm1, %v2521_v19  ;;  %v2519_v27 = vpack.c.bf16 %v1424_v20, %v1424_v20  ;;  %v1427_v28 = vmax.f32 %v1045_v21, 0.0  ;;  %v1037_v29 = vadd.f32 %v3067_v2, %v1036_v26  ;;  %v1491_v32 = vmax.f32 %v1301_v25, 0.0 }
 0x12c   : > { %2131 = vst.msk [vmem:[%s3077_s27 + $0x1a8] sm:$0xf] %vm2024_vm1, %v2585_v23  ;;  %v2583_v31 = vpack.c.bf16 %v1488_v24, %v1488_v24  ;;  %v1293_v33 = vadd.f32 %v3067_v2, %v1292_v30  ;;  %v2723_v34 = vpop.f32.mrf.mxu0  ;;  %v2787_v38 = vpop.f32.mrf.mxu1 }
 0x12d   : > { %2065 = vst.msk [vmem:[%s3077_s27 + $0xa0] sm:$0xf] %vm2024_vm1, %v2519_v27  ;;  %v2522_v35 = vpack.c.bf16 %v1427_v28, %v1427_v28  ;;  %v1425_v36 = vmax.f32 %v1037_v29, 0.0  ;;  %v1058_v37 = vadd.f32 %v2723_v34, %v3067_v2  ;;  %v2586_v39 = vpack.c.bf16 %v1491_v32, %v1491_v32 }
 0x12e   : > { %2129 = vst.msk [vmem:[%s3077_s27 + $0x1a0] sm:$0xf] %vm2024_vm1, %v2583_v31  ;;  %v1489_v40 = vmax.f32 %v1293_v33, 0.0  ;;  %v1314_v41 = vadd.f32 %v2787_v38, %v3067_v2  ;;  %v1049_v42 = vpop.f32.mrf.mxu0  ;;  %v1305_v46 = vpop.f32.mrf.mxu1  ;;  %v3381_v38 = vld [vmem:[%s3470_s2] ss:$0 sm:$0xff] }
 0x12f   : > { %2068 = vst.msk [vmem:[%s3077_s27 + $0xac] sm:$0xf] %vm2024_vm1, %v2522_v35  ;;  %v2520_v43 = vpack.c.bf16 %v1425_v36, %v1425_v36  ;;  %v1430_v44 = vmax.f32 %v1058_v37, 0.0  ;;  %v1050_v45 = vadd.f32 %v3067_v2, %v1049_v42  ;;  %2132 = vst.msk [vmem:[%s3077_s27 + $0x1ac] sm:$0xf] %vm2024_vm1, %v2586_v39  ;;  %v1306_v49 = vadd.f32 %v3067_v2, %v1305_v46 }
 0x130   : > { %v2584_v47 = vpack.c.bf16 %v1489_v40, %v1489_v40  ;;  %v1494_v48 = vmax.f32 %v1314_v41, 0.0  ;;  %v2724_v50 = vpop.f32.mrf.mxu0  ;;  %v2788_v54 = vpop.f32.mrf.mxu1 }
 0x131   : > { %2066 = vst.msk [vmem:[%s3077_s27 + $0xa4] sm:$0xf] %vm2024_vm1, %v2520_v43  ;;  %v2525_v51 = vpack.c.bf16 %v1430_v44, %v1430_v44  ;;  %v1428_v52 = vmax.f32 %v1050_v45, 0.0  ;;  %v1061_v53 = vadd.f32 %v2724_v50, %v3067_v2  ;;  %v1492_v56 = vmax.f32 %v1306_v49, 0.0 }
 0x132   : > { %2130 = vst.msk [vmem:[%s3077_s27 + $0x1a4] sm:$0xf] %vm2024_vm1, %v2584_v47  ;;  %v2589_v55 = vpack.c.bf16 %v1494_v48, %v1494_v48  ;;  %v1317_v57 = vadd.f32 %v2788_v54, %v3067_v2  ;;  %v1052_v58 = vpop.f32.mrf.mxu0  ;;  %v1308_v62 = vpop.f32.mrf.mxu1 }
 0x133   : > { %2071 = vst.msk [vmem:[%s3077_s27 + $0xb8] sm:$0xf] %vm2024_vm1, %v2525_v51  ;;  %v2523_v59 = vpack.c.bf16 %v1428_v52, %v1428_v52  ;;  %v1431_v60 = vmax.f32 %v1061_v53, 0.0  ;;  %v1053_v61 = vadd.f32 %v3067_v2, %v1052_v58  ;;  %v2587_v63 = vpack.c.bf16 %v1492_v56, %v1492_v56 }
 0x134   : > { %2135 = vst.msk [vmem:[%s3077_s27 + $0x1b8] sm:$0xf] %vm2024_vm1, %v2589_v55  ;;  %v1495_v0 = vmax.f32 %v1317_v57, 0.0  ;;  %v1309_v1 = vadd.f32 %v3067_v2, %v1308_v62  ;;  %v2727_v3 = vpop.f32.mrf.mxu0  ;;  %v2791_v7 = vpop.f32.mrf.mxu1 }
 0x135   : > { %2069 = vst.msk [vmem:[%s3077_s27 + $0xb0] sm:$0xf] %vm2024_vm1, %v2523_v59  ;;  %v2526_v4 = vpack.c.bf16 %v1431_v60, %v1431_v60  ;;  %v1429_v5 = vmax.f32 %v1053_v61, 0.0  ;;  %v1074_v6 = vadd.f32 %v2727_v3, %v3067_v2  ;;  %2133 = vst.msk [vmem:[%s3077_s27 + $0x1b0] sm:$0xf] %vm2024_vm1, %v2587_v63  ;;  %v1330_v10 = vadd.f32 %v2791_v7, %v3067_v2 }
 0x136   : > { %v2590_v8 = vpack.c.bf16 %v1495_v0, %v1495_v0  ;;  %v1493_v9 = vmax.f32 %v1309_v1, 0.0  ;;  %v1065_v11 = vpop.f32.mrf.mxu0  ;;  %v1321_v15 = vpop.f32.mrf.mxu1 }
 0x137   : > { %2072 = vst.msk [vmem:[%s3077_s27 + $0xbc] sm:$0xf] %vm2024_vm1, %v2526_v4  ;;  %v2524_v12 = vpack.c.bf16 %v1429_v5, %v1429_v5  ;;  %v1434_v13 = vmax.f32 %v1074_v6, 0.0  ;;  %v1066_v14 = vadd.f32 %v3067_v2, %v1065_v11  ;;  %v1498_v17 = vmax.f32 %v1330_v10, 0.0 }
 0x138   : > { %2136 = vst.msk [vmem:[%s3077_s27 + $0x1bc] sm:$0xf] %vm2024_vm1, %v2590_v8  ;;  %v2588_v16 = vpack.c.bf16 %v1493_v9, %v1493_v9  ;;  %v1322_v18 = vadd.f32 %v3067_v2, %v1321_v15  ;;  %v2728_v19 = vpop.f32.mrf.mxu0  ;;  %v2792_v23 = vpop.f32.mrf.mxu1 }
 0x139   : > { %2070 = vst.msk [vmem:[%s3077_s27 + $0xb4] sm:$0xf] %vm2024_vm1, %v2524_v12  ;;  %v2529_v20 = vpack.c.bf16 %v1434_v13, %v1434_v13  ;;  %v1432_v21 = vmax.f32 %v1066_v14, 0.0  ;;  %v1077_v22 = vadd.f32 %v2728_v19, %v3067_v2  ;;  %v2593_v24 = vpack.c.bf16 %v1498_v17, %v1498_v17 }
 0x13a   : > { %2134 = vst.msk [vmem:[%s3077_s27 + $0x1b4] sm:$0xf] %vm2024_vm1, %v2588_v16  ;;  %v1496_v25 = vmax.f32 %v1322_v18, 0.0  ;;  %v1333_v26 = vadd.f32 %v2792_v23, %v3067_v2  ;;  %v1068_v27 = vpop.f32.mrf.mxu0  ;;  %v1324_v31 = vpop.f32.mrf.mxu1 }
 0x13b   : > { %2075 = vst.msk [vmem:[%s3077_s27 + $0xc8] sm:$0xf] %vm2024_vm1, %v2529_v20  ;;  %v2527_v28 = vpack.c.bf16 %v1432_v21, %v1432_v21  ;;  %v1435_v29 = vmax.f32 %v1077_v22, 0.0  ;;  %v1069_v30 = vadd.f32 %v3067_v2, %v1068_v27  ;;  %2139 = vst.msk [vmem:[%s3077_s27 + $0x1c8] sm:$0xf] %vm2024_vm1, %v2593_v24  ;;  %v1325_v34 = vadd.f32 %v3067_v2, %v1324_v31 }
 0x13c   : > { %v2591_v32 = vpack.c.bf16 %v1496_v25, %v1496_v25  ;;  %v1499_v33 = vmax.f32 %v1333_v26, 0.0  ;;  %v2731_v35 = vpop.f32.mrf.mxu0  ;;  %v2795_v40 = vpop.f32.mrf.mxu1 }
 0x13d   : > { %2073 = vst.msk [vmem:[%s3077_s27 + $0xc0] sm:$0xf] %vm2024_vm1, %v2527_v28  ;;  %v2530_v36 = vpack.c.bf16 %v1435_v29, %v1435_v29  ;;  %v1433_v37 = vmax.f32 %v1069_v30, 0.0  ;;  %v1090_v39 = vadd.f32 %v3381_v38, %v2731_v35  ;;  %v1497_v42 = vmax.f32 %v1325_v34, 0.0 }
 0x13e   : > { %2137 = vst.msk [vmem:[%s3077_s27 + $0x1c0] sm:$0xf] %vm2024_vm1, %v2591_v32  ;;  %v2594_v41 = vpack.c.bf16 %v1499_v33, %v1499_v33  ;;  %v1346_v2 = vadd.f32 %v3381_v38, %v2795_v40  ;;  %v1081_v43 = vpop.f32.mrf.mxu0  ;;  %v1337_v47 = vpop.f32.mrf.mxu1 }
 0x13f   : > { %2076 = vst.msk [vmem:[%s3077_s27 + $0xcc] sm:$0xf] %vm2024_vm1, %v2530_v36  ;;  %v2528_v44 = vpack.c.bf16 %v1433_v37, %v1433_v37  ;;  %v1438_v45 = vmax.f32 %v1090_v39, 0.0  ;;  %v1082_v46 = vadd.f32 %v3381_v38, %v1081_v43  ;;  %v2592_v48 = vpack.c.bf16 %v1497_v42, %v1497_v42 }
 0x140   : > { %2140 = vst.msk [vmem:[%s3077_s27 + $0x1cc] sm:$0xf] %vm2024_vm1, %v2594_v41  ;;  %v1502_v49 = vmax.f32 %v1346_v2, 0.0  ;;  %v1338_v50 = vadd.f32 %v3381_v38, %v1337_v47  ;;  %v2732_v51 = vpop.f32.mrf.mxu0  ;;  %v2796_v55 = vpop.f32.mrf.mxu1 }
 0x141   : > { %2074 = vst.msk [vmem:[%s3077_s27 + $0xc4] sm:$0xf] %vm2024_vm1, %v2528_v44  ;;  %v2533_v52 = vpack.c.bf16 %v1438_v45, %v1438_v45  ;;  %v1436_v53 = vmax.f32 %v1082_v46, 0.0  ;;  %v1093_v54 = vadd.f32 %v3381_v38, %v2732_v51  ;;  %2138 = vst.msk [vmem:[%s3077_s27 + $0x1c4] sm:$0xf] %vm2024_vm1, %v2592_v48  ;;  %v1349_v58 = vadd.f32 %v3381_v38, %v2796_v55 }
 0x142   : > { %v2597_v56 = vpack.c.bf16 %v1502_v49, %v1502_v49  ;;  %v1500_v57 = vmax.f32 %v1338_v50, 0.0  ;;  %v1084_v59 = vpop.f32.mrf.mxu0  ;;  %v1340_v63 = vpop.f32.mrf.mxu1 }
 0x143   : > { %2079 = vst.msk [vmem:[%s3077_s27 + $0xd8] sm:$0xf] %vm2024_vm1, %v2533_v52  ;;  %v2531_v60 = vpack.c.bf16 %v1436_v53, %v1436_v53  ;;  %v1439_v61 = vmax.f32 %v1093_v54, 0.0  ;;  %v1085_v62 = vadd.f32 %v3381_v38, %v1084_v59  ;;  %v1503_v1 = vmax.f32 %v1349_v58, 0.0 }
 0x144   : > { %2143 = vst.msk [vmem:[%s3077_s27 + $0x1d8] sm:$0xf] %vm2024_vm1, %v2597_v56  ;;  %v2595_v0 = vpack.c.bf16 %v1500_v57, %v1500_v57  ;;  %v1341_v3 = vadd.f32 %v3381_v38, %v1340_v63  ;;  %v2735_v4 = vpop.f32.mrf.mxu0  ;;  %v2799_v8 = vpop.f32.mrf.mxu1 }
 0x145   : > { %2077 = vst.msk [vmem:[%s3077_s27 + $0xd0] sm:$0xf] %vm2024_vm1, %v2531_v60  ;;  %v2534_v5 = vpack.c.bf16 %v1439_v61, %v1439_v61  ;;  %v1437_v6 = vmax.f32 %v1085_v62, 0.0  ;;  %v1106_v7 = vadd.f32 %v3381_v38, %v2735_v4  ;;  %v2598_v9 = vpack.c.bf16 %v1503_v1, %v1503_v1 }
 0x146   : > { %2141 = vst.msk [vmem:[%s3077_s27 + $0x1d0] sm:$0xf] %vm2024_vm1, %v2595_v0  ;;  %v1501_v10 = vmax.f32 %v1341_v3, 0.0  ;;  %v1362_v11 = vadd.f32 %v3381_v38, %v2799_v8  ;;  %v1097_v12 = vpop.f32.mrf.mxu0  ;;  %v1353_v16 = vpop.f32.mrf.mxu1 }
 0x147   : > { %2080 = vst.msk [vmem:[%s3077_s27 + $0xdc] sm:$0xf] %vm2024_vm1, %v2534_v5  ;;  %v2532_v13 = vpack.c.bf16 %v1437_v6, %v1437_v6  ;;  %v1442_v14 = vmax.f32 %v1106_v7, 0.0  ;;  %v1098_v15 = vadd.f32 %v3381_v38, %v1097_v12  ;;  %2144 = vst.msk [vmem:[%s3077_s27 + $0x1dc] sm:$0xf] %vm2024_vm1, %v2598_v9  ;;  %v1354_v19 = vadd.f32 %v3381_v38, %v1353_v16 }
 0x148   : > { %v2596_v17 = vpack.c.bf16 %v1501_v10, %v1501_v10  ;;  %v1506_v18 = vmax.f32 %v1362_v11, 0.0  ;;  %v2736_v20 = vpop.f32.mrf.mxu0  ;;  %v2800_v24 = vpop.f32.mrf.mxu1 }
 0x149   : > { %2078 = vst.msk [vmem:[%s3077_s27 + $0xd4] sm:$0xf] %vm2024_vm1, %v2532_v13  ;;  %v2537_v21 = vpack.c.bf16 %v1442_v14, %v1442_v14  ;;  %v1440_v22 = vmax.f32 %v1098_v15, 0.0  ;;  %v1109_v23 = vadd.f32 %v3381_v38, %v2736_v20  ;;  %v1504_v26 = vmax.f32 %v1354_v19, 0.0 }
 0x14a   : > { %2142 = vst.msk [vmem:[%s3077_s27 + $0x1d4] sm:$0xf] %vm2024_vm1, %v2596_v17  ;;  %v2601_v25 = vpack.c.bf16 %v1506_v18, %v1506_v18  ;;  %v1365_v27 = vadd.f32 %v3381_v38, %v2800_v24  ;;  %v1100_v28 = vpop.f32.mrf.mxu0  ;;  %v1356_v32 = vpop.f32.mrf.mxu1 }
 0x14b   : > { %2083 = vst.msk [vmem:[%s3077_s27 + $0xe8] sm:$0xf] %vm2024_vm1, %v2537_v21  ;;  %v2535_v29 = vpack.c.bf16 %v1440_v22, %v1440_v22  ;;  %v1443_v30 = vmax.f32 %v1109_v23, 0.0  ;;  %v1101_v31 = vadd.f32 %v3381_v38, %v1100_v28  ;;  %v2599_v33 = vpack.c.bf16 %v1504_v26, %v1504_v26 }
 0x14c   : > { %2147 = vst.msk [vmem:[%s3077_s27 + $0x1e8] sm:$0xf] %vm2024_vm1, %v2601_v25  ;;  %v1507_v34 = vmax.f32 %v1365_v27, 0.0  ;;  %v1357_v35 = vadd.f32 %v3381_v38, %v1356_v32  ;;  %v2739_v36 = vpop.f32.mrf.mxu0  ;;  %v2803_v41 = vpop.f32.mrf.mxu1 }
 0x14d   : > { %2081 = vst.msk [vmem:[%s3077_s27 + $0xe0] sm:$0xf] %vm2024_vm1, %v2535_v29  ;;  %v2538_v37 = vpack.c.bf16 %v1443_v30, %v1443_v30  ;;  %v1441_v39 = vmax.f32 %v1101_v31, 0.0  ;;  %v1122_v40 = vadd.f32 %v3381_v38, %v2739_v36  ;;  %2145 = vst.msk [vmem:[%s3077_s27 + $0x1e0] sm:$0xf] %vm2024_vm1, %v2599_v33  ;;  %v1378_v43 = vadd.f32 %v3381_v38, %v2803_v41 }
 0x14e   : > { %v2602_v42 = vpack.c.bf16 %v1507_v34, %v1507_v34  ;;  %v1505_v2 = vmax.f32 %v1357_v35, 0.0  ;;  %v1113_v44 = vpop.f32.mrf.mxu0  ;;  %v1369_v48 = vpop.f32.mrf.mxu1 }
 0x14f   : > { %2084 = vst.msk [vmem:[%s3077_s27 + $0xec] sm:$0xf] %vm2024_vm1, %v2538_v37  ;;  %v2536_v45 = vpack.c.bf16 %v1441_v39, %v1441_v39  ;;  %v1446_v46 = vmax.f32 %v1122_v40, 0.0  ;;  %v1114_v47 = vadd.f32 %v3381_v38, %v1113_v44  ;;  %v1510_v50 = vmax.f32 %v1378_v43, 0.0 }
 0x150   : > { %2148 = vst.msk [vmem:[%s3077_s27 + $0x1ec] sm:$0xf] %vm2024_vm1, %v2602_v42  ;;  %v2600_v49 = vpack.c.bf16 %v1505_v2, %v1505_v2  ;;  %v1370_v51 = vadd.f32 %v3381_v38, %v1369_v48  ;;  %v2740_v52 = vpop.f32.mrf.mxu0  ;;  %v2804_v56 = vpop.f32.mrf.mxu1 }
 0x151   : > { %2082 = vst.msk [vmem:[%s3077_s27 + $0xe4] sm:$0xf] %vm2024_vm1, %v2536_v45  ;;  %v2541_v53 = vpack.c.bf16 %v1446_v46, %v1446_v46  ;;  %v1444_v54 = vmax.f32 %v1114_v47, 0.0  ;;  %v1125_v55 = vadd.f32 %v3381_v38, %v2740_v52  ;;  %v2605_v57 = vpack.c.bf16 %v1510_v50, %v1510_v50 }
 0x152   : > { %2146 = vst.msk [vmem:[%s3077_s27 + $0x1e4] sm:$0xf] %vm2024_vm1, %v2600_v49  ;;  %v1508_v58 = vmax.f32 %v1370_v51, 0.0  ;;  %v1381_v59 = vadd.f32 %v3381_v38, %v2804_v56  ;;  %v1116_v60 = vpop.f32.mrf.mxu0  ;;  %v1372_v0 = vpop.f32.mrf.mxu1 }
 0x153   : > { %2087 = vst.msk [vmem:[%s3077_s27 + $0xf8] sm:$0xf] %vm2024_vm1, %v2541_v53  ;;  %v2539_v61 = vpack.c.bf16 %v1444_v54, %v1444_v54  ;;  %v1447_v62 = vmax.f32 %v1125_v55, 0.0  ;;  %v1117_v63 = vadd.f32 %v3381_v38, %v1116_v60  ;;  %2151 = vst.msk [vmem:[%s3077_s27 + $0x1f8] sm:$0xf] %vm2024_vm1, %v2605_v57  ;;  %v1373_v4 = vadd.f32 %v3381_v38, %v1372_v0 }
 0x154   : > { %v2603_v1 = vpack.c.bf16 %v1508_v58, %v1508_v58  ;;  %v1511_v3 = vmax.f32 %v1381_v59, 0.0 }
 0x155   : > { %2085 = vst.msk [vmem:[%s3077_s27 + $0xf0] sm:$0xf] %vm2024_vm1, %v2539_v61  ;;  %v2542_v5 = vpack.c.bf16 %v1447_v62, %v1447_v62  ;;  %v1445_v6 = vmax.f32 %v1117_v63, 0.0  ;;  %v1509_v8 = vmax.f32 %v1373_v4, 0.0 }
 0x156   : > { %2149 = vst.msk [vmem:[%s3077_s27 + $0x1f0] sm:$0xf] %vm2024_vm1, %v2603_v1  ;;  %v2606_v7 = vpack.c.bf16 %v1511_v3, %v1511_v3 }
 0x157   : > { %2088 = vst.msk [vmem:[%s3077_s27 + $0xfc] sm:$0xf] %vm2024_vm1, %v2542_v5  ;;  %v2540_v9 = vpack.c.bf16 %v1445_v6, %v1445_v6  ;;  %v2604_v10 = vpack.c.bf16 %v1509_v8, %v1509_v8 }
 0x158   : > { %2152 = vst.msk [vmem:[%s3077_s27 + $0x1fc] sm:$0xf] %vm2024_vm1, %v2606_v7 }
 0x159   : > { %2086 = vst.msk [vmem:[%s3077_s27 + $0xf4] sm:$0xf] %vm2024_vm1, %v2540_v9  ;;  %2150 = vst.msk [vmem:[%s3077_s27 + $0x1f4] sm:$0xf] %vm2024_vm1, %v2604_v10 }
 0x15a PF: > { %s13_s12 = sadd.s32 1, %s2890_s12  }
 0x15b   : > { %p10_p4 = scmp.ge.s32.totalorder %s13_s12, 4  }
 0x15d   :  { %12 = sbr.rel (!%p10_p4) target bundleno = 1 (0x1), region = 62 }

// kernel: muril_image_classifier.7
= control target key start
LH: loop header
LB: loop body
LE: loop exit
PB: predicated region body
PF: predicated region fallthrough
CT: control target
= control target key end

     0   :  { %vm318_vm0 = vcmask 261120   ;;  %vm617_vm1 = vcmask 519168   ;;  %s1144_s1 = inlined_call_operand.vmem [shape: bf16[288,64], index: 1, kind: input, shape index: {}]   ;;  %s1145_s0 = inlined_call_operand.vmem [shape: bf16[128,288], index: 0, kind: input, shape index: {}]   ;;  %s1146_s2 = inlined_call_operand.vmem [shape: f32[1,64], index: 2, kind: input, shape index: {}]   ;;  %s1147_s3 = inlined_call_operand.vmem [shape: bf16[128,64], index: 3, kind: output, shape index: {}]  }
   0x1   :  { %v831_v0 = vld [vmem:[%s1144_s1 + $0x78] sm:$0xff]   ;;  %v833_v2 = vld [vmem:[%s1144_s1 + $0x70] sm:$0xff]   ;;  %v835_v4 = vld [vmem:[%s1144_s1 + $0x68] sm:$0xff]  }
   0x2   :  { %v832_v1 = vld [vmem:[%s1144_s1 + $0x38] sm:$0xff]   ;;  %721 = vmatprep.subr.bf16.mxu0 %v831_v0  ;;  %815 = vmatprep.subr.bf16.mxu1 %v831_v0  ;;  %v834_v3 = vld [vmem:[%s1144_s1 + $0x30] sm:$0xff]   ;;  %v836_v5 = vld [vmem:[%s1144_s1 + $0x28] sm:$0xff]  }
   0x3   :  { %722 = vmatpush3.bf16.msra.mxu0 %v832_v1  ;;  %823 = vmatpush3.bf16.msra.mxu1 %v832_v1  ;;  %v837_v6 = vld [vmem:[%s1144_s1 + $0x60] sm:$0xff]   ;;  %v839_v8 = vld [vmem:[%s1144_s1 + $0x58] sm:$0xff]   ;;  %v841_v10 = vld [vmem:[%s1144_s1 + $0x50] sm:$0xff]  }
   0x4   :  { %723 = vmatprep.subr.bf16.mxu0 %v833_v2  ;;  %816 = vmatprep.subr.bf16.mxu1 %v833_v2  ;;  %v838_v7 = vld [vmem:[%s1144_s1 + $0x20] sm:$0xff]   ;;  %v840_v9 = vld [vmem:[%s1144_s1 + $0x18] sm:$0xff]   ;;  %v842_v13 = vld [vmem:[%s1144_s1 + $0x10] sm:$0xff]  }
   0x5   :  { %v849_v11 = vld [vmem:[%s1145_s0 + $0x4] ss:$12 sps:$4 sm:$0xff]   ;;  %v852_v12 = vld [vmem:[%s1145_s0 + $0x94] ss:$12 sps:$4 sm:$0xff]   ;;  %v843_v14 = vld [vmem:[%s1144_s1 + $0x48] sm:$0xff]  }
   0x6   :  { %375 = vmatprep.mubr.bf16.mxu0 %v849_v11  ;;  %423 = vmatprep.mubr.bf16.mxu1 %v852_v12  ;;  %v844_v15 = vld [vmem:[%s1144_s1 + $0x8] sm:$0xff]   ;;  %v845_v16 = vld [vmem:[%s1144_s1 + $0x40] sm:$0xff]   ;;  %v850_v20 = vld [vmem:[%s1145_s0 + $0x90] ss:$12 sps:$4 sm:$0xff]  }
   0x7   :  { %724 = vmatpush3.bf16.msra.mxu0 %v834_v3  ;;  %824 = vmatpush3.bf16.msra.mxu1 %v834_v3  ;;  %v846_v17 = vld [vmem:[%s1144_s1] sm:$0xff]   ;;  %v853_v19 = vld [vmem:[%s1144_s1 + $0x88] sm:$0xff]   ;;  %v864_v28 = vld [vmem:[%s1145_s0 + $0x30] ss:$12 sps:$4 sm:$0xff]  }
   0x8   :  { %725 = vmatprep.subr.bf16.mxu0 %v835_v4  ;;  %817 = vmatprep.subr.bf16.mxu1 %v835_v4  ;;  %v847_v18 = vld [vmem:[%s1145_s0] ss:$12 sps:$4 sm:$0xff]   ;;  %v854_v21 = vld [vmem:[%s1145_s0 + $0x1c] ss:$12 sps:$4 sm:$0xff]   ;;  %v858_v24 = vld [vmem:[%s1145_s0 + $0x18] ss:$12 sps:$4 sm:$0xff]  }
   0x9   :  { %v856_v22 = vld [vmem:[%s1145_s0 + $0xac] ss:$12 sps:$4 sm:$0xff]   ;;  %v860_v23 = vld [vmem:[%s1144_s1 + $0x80] sm:$0xff]   ;;  %v859_v25 = vld [vmem:[%s1145_s0 + $0xa8] ss:$12 sps:$4 sm:$0xff]  }
   0xa   :  { %v861_v26 = vld [vmem:[%s1145_s0 + $0x34] ss:$12 sps:$4 sm:$0xff]   ;;  %v866_v30 = vld [vmem:[%s1145_s0 + $0x4c] ss:$12 sps:$4 sm:$0xff]   ;;  %v870_v33 = vld [vmem:[%s1145_s0 + $0x50] ss:$12 sps:$4 sm:$0xff]  }
   0xb   :  { %726 = vmatpush3.bf16.msra.mxu0 %v836_v5  ;;  %825 = vmatpush3.bf16.msra.mxu1 %v836_v5  ;;  %v863_v27 = vld [vmem:[%s1145_s0 + $0x8] ss:$12 sps:$4 sm:$0xff]   ;;  %v865_v29 = vld [vmem:[%s1145_s0 + $0x20] ss:$12 sps:$4 sm:$0xff]   ;;  %v868_v31 = vld [vmem:[%s1145_s0 + $0x38] ss:$12 sps:$4 sm:$0xff]  }
   0xc   :  { %727 = vmatprep.subr.bf16.mxu0 %v837_v6  ;;  %818 = vmatprep.subr.bf16.mxu1 %v837_v6  ;;  %v869_v32 = vld [vmem:[%s1145_s0 + $0x48] ss:$12 sps:$4 sm:$0xff]   ;;  %v871_v34 = vld [vmem:[%s1145_s0 + $0x64] ss:$12 sps:$4 sm:$0xff]   ;;  %v874_v36 = vld [vmem:[%s1145_s0 + $0x60] ss:$12 sps:$4 sm:$0xff]  }
   0xd   :  { %v873_v35 = vld [vmem:[%s1145_s0 + $0x68] ss:$12 sps:$4 sm:$0xff]   ;;  %v875_v37 = vld [vmem:[%s1145_s0 + $0x80] ss:$12 sps:$4 sm:$0xff]   ;;  %v878_v39 = vld [vmem:[%s1145_s0 + $0x98] ss:$12 sps:$4 sm:$0xff]  }
   0xe   :  { %v876_v38 = vld [vmem:[%s1145_s0 + $0x7c] ss:$12 sps:$4 sm:$0xff]   ;;  %v879_v40 = vld [vmem:[%s1145_s0 + $0x78] ss:$12 sps:$4 sm:$0xff]   ;;  %v1054_v60 = vld [vmem:[%s1146_s2] ss:$0 sm:$0xff] }
   0xf   :  { %728 = vmatpush3.bf16.msra.mxu0 %v838_v7  ;;  %826 = vmatpush3.bf16.msra.mxu1 %v838_v7  ;;  %v880_v41 = vld [vmem:[%s1145_s0 + $0xb0] ss:$12 sps:$4 sm:$0xff]  }
  0x10   :  { %729 = vmatprep.subr.bf16.mxu0 %v839_v8  ;;  %819 = vmatprep.subr.bf16.mxu1 %v839_v8 }
  0x13   :  { %730 = vmatpush3.bf16.msra.mxu0 %v840_v9  ;;  %827 = vmatpush3.bf16.msra.mxu1 %v840_v9 }
  0x14   :  { %731 = vmatprep.subr.bf16.mxu0 %v841_v10  ;;  %820 = vmatprep.subr.bf16.mxu1 %v841_v10 }
  0x17   :  { %732 = vmatpush3.bf16.msra.mxu0 %v842_v13  ;;  %828 = vmatpush3.bf16.msra.mxu1 %v842_v13 }
  0x18   :  { %733 = vmatprep.subr.bf16.mxu0 %v843_v14  ;;  %821 = vmatprep.subr.bf16.mxu1 %v843_v14 }
  0x1b   :  { %734 = vmatpush3.bf16.msra.mxu0 %v844_v15  ;;  %829 = vmatpush3.bf16.msra.mxu1 %v844_v15 }
  0x1c   :  { %735 = vmatprep.subr.bf16.mxu0 %v845_v16  ;;  %822 = vmatprep.subr.bf16.mxu1 %v845_v16 }
  0x1f   :  { %736 = vmatpush3.bf16.msra.mxu0 %v846_v17  ;;  %830 = vmatpush3.bf16.msra.mxu1 %v846_v17 }
  0x20   :  { %795 = vmatprep.subr.bf16.mxu1 %v853_v19 }
  0x22   :  { %376 = vmatmul.mubr.bf16.vlgmr.msra.gmra.mxu0 %v847_v18  ;;  %424 = vmatmul.mubr.bf16.vlgmr.msra.gmra.mxu1 %v850_v20 }
  0x23   :  { %796 = vmatpush3.bf16.msra.mxu1 %v853_v19  ;;  %383 = vmatprep.mubr.bf16.mxu0 %v854_v21 }
  0x24   :  { %431 = vmatprep.mubr.bf16.mxu1 %v856_v22  ;;  %797 = vmatprep.subr.bf16.mxu1 %v860_v23 }
  0x27   :  { %798 = vmatpush3.bf16.msra.mxu1 %v860_v23 }
  0x2a   :  { %384 = vmatmul.mubr.bf16.gmra.mxu0 %v858_v24  ;;  %432 = vmatmul.mubr.bf16.gmra.mxu1 %v859_v25 }
  0x2b   :  { %391 = vmatprep.mubr.bf16.mxu0 %v861_v26  ;;  %799 = vmatprep.mubr.msk.bf16.mxu1 %vm318_vm0, %v863_v27 }
  0x32   :  { %392 = vmatmul.mubr.bf16.gmra.mxu0 %v864_v28  ;;  %800 = vmatmul.mubr.msk.bf16.vlgmr.msra.gmra.mxu1 %vm318_vm0, %v865_v29 }
  0x33   :  { %399 = vmatprep.mubr.bf16.mxu0 %v866_v30  ;;  %803 = vmatprep.mubr.msk.bf16.mxu1 %vm318_vm0, %v868_v31 }
  0x3a   :  { %400 = vmatmul.mubr.bf16.gmra.mxu0 %v869_v32  ;;  %804 = vmatmul.mubr.msk.bf16.gmra.mxu1 %vm318_vm0, %v870_v33 }
  0x3b   :  { %407 = vmatprep.mubr.bf16.mxu0 %v871_v34  ;;  %807 = vmatprep.mubr.msk.bf16.mxu1 %vm318_vm0, %v873_v35 }
  0x42   :  { %408 = vmatmul.mubr.bf16.gmra.mxu0 %v874_v36  ;;  %808 = vmatmul.mubr.msk.bf16.gmra.mxu1 %vm318_vm0, %v875_v37 }
  0x43   :  { %415 = vmatprep.mubr.bf16.mxu0 %v876_v38  ;;  %811 = vmatprep.mubr.msk.bf16.mxu1 %vm318_vm0, %v878_v39 }
  0x4a   :  { %416 = vmatmul.mubr.bf16.gmra.mxu0 %v879_v40  ;;  %812 = vmatmul.mubr.msk.bf16.gmra.mxu1 %vm318_vm0, %v880_v41 }
  0xe2   :  { %v737_v42 = vpop.f32.mrf.mxu0  ;;  %v1035_v43 = vpop.f32.mrf.mxu1 }
  0xe4   :  { %v738_v44 = vpop.f32.mrf.mxu0  ;;  %v1037_v45 = vpop.f32.mrf.mxu1 }
  0xe5   :  { %v739_v57 = vadd.f32 %v738_v44, %v737_v42 }
  0xe6   :  { %v740_v46 = vpop.f32.mrf.mxu0  ;;  %v1039_v47 = vpop.f32.mrf.mxu1 }
  0xe7   :  { %v378_v3 = vadd.f32 %v739_v57, %v1054_v60 }
  0xe8   :  { %v741_v48 = vpop.f32.mrf.mxu0  ;;  %v1041_v49 = vpop.f32.mrf.mxu1 }
  0xe9   :  { %v742_v63 = vadd.f32 %v741_v48, %v740_v46 }
  0xea   :  { %v743_v50 = vpop.f32.mrf.mxu0  ;;  %v1043_v51 = vpop.f32.mrf.mxu1 }
  0xeb   :  { %v381_v11 = vadd.f32 %v742_v63, %v1054_v60 }
  0xec   :  { %v744_v52 = vpop.f32.mrf.mxu0  ;;  %v1045_v53 = vpop.f32.mrf.mxu1 }
  0xed   :  { %v745_v54 = vadd.f32 %v744_v52, %v743_v50 }
  0xee   :  { %v746_v55 = vpop.f32.mrf.mxu0  ;;  %v1047_v56 = vpop.f32.mrf.mxu1 }
  0xef   :  { %v386_v62 = vadd.f32 %v745_v54, %v1054_v60  ;;  %v781_v54 = vadd.f32 %v1045_v53, %v1043_v51  ;;  %v775_v53 = vadd.f32 %v1037_v45, %v1035_v43 }
  0xf0   :  { %v747_v58 = vpop.f32.mrf.mxu0  ;;  %v1049_v59 = vpop.f32.mrf.mxu1 }
  0xf1   :  { %v748_v61 = vadd.f32 %v747_v58, %v746_v55 }
  0xf2   :  { %v749_v0 = vpop.f32.mrf.mxu0  ;;  %v801_v1 = vpop.f32.mrf.mxu1 }
  0xf3   :  { %v483_v2 = vadd.f32 %v801_v1, %v386_v62  ;;  %v389_v8 = vadd.f32 %v748_v61, %v1054_v60 }
  0xf4   :  { %v750_v4 = vpop.f32.mrf.mxu0  ;;  %v474_v5 = vpop.f32.mrf.mxu1 }
  0xf5   :  { %v539_v6 = vmax.f32 %v483_v2, 0.0  ;;  %v475_v7 = vadd.f32 %v474_v5, %v378_v3  ;;  %v751_v13 = vadd.f32 %v750_v4, %v749_v0  ;;  %v784_v3 = vadd.f32 %v1049_v59, %v1047_v56 }
  0xf6   :  { %v752_v9 = vpop.f32.mrf.mxu0  ;;  %v802_v10 = vpop.f32.mrf.mxu1  ;;  %v778_v56 = vadd.f32 %v1041_v49, %v1039_v47 }
  0xf7   :  { %v707_v12 = vpack.c.bf16 %v539_v6, %v539_v6  ;;  %v537_v14 = vmax.f32 %v475_v7, 0.0  ;;  %v486_v15 = vadd.f32 %v802_v10, %v389_v8  ;;  %v394_v26 = vadd.f32 %v751_v13, %v1054_v60 }
  0xf8   :  { %v753_v16 = vpop.f32.mrf.mxu0  ;;  %v477_v17 = vpop.f32.mrf.mxu1  ;;  %v426_v13 = vadd.f32 %v775_v53, %v1054_v60 }
  0xf9   :  { %620 = vst.msk [vmem:[%s1147_s3 + $0x8] sm:$0xf] %vm617_vm1, %v707_v12  ;;  %v705_v18 = vpack.c.bf16 %v537_v14, %v537_v14  ;;  %v540_v19 = vmax.f32 %v486_v15, 0.0  ;;  %v478_v20 = vadd.f32 %v477_v17, %v381_v11  ;;  %v754_v24 = vadd.f32 %v753_v16, %v752_v9 }
  0xfa   :  { %v755_v21 = vpop.f32.mrf.mxu0  ;;  %v805_v22 = vpop.f32.mrf.mxu1  ;;  %v434_v9 = vadd.f32 %v781_v54, %v1054_v60  ;;  %v437_v15 = vadd.f32 %v784_v3, %v1054_v60 }
  0xfb   :  { %618 = vst.msk [vmem:[%s1147_s3] sm:$0xf] %vm617_vm1, %v705_v18  ;;  %v708_v23 = vpack.c.bf16 %v540_v19, %v540_v19  ;;  %v538_v25 = vmax.f32 %v478_v20, 0.0  ;;  %v397_v36 = vadd.f32 %v754_v24, %v1054_v60 }
  0xfc   :  { %v756_v27 = vpop.f32.mrf.mxu0  ;;  %v490_v28 = vpop.f32.mrf.mxu1 }
  0xfd   :  { %621 = vst.msk [vmem:[%s1147_s3 + $0xc] sm:$0xf] %vm617_vm1, %v708_v23  ;;  %v706_v29 = vpack.c.bf16 %v538_v25, %v538_v25  ;;  %v757_v30 = vadd.f32 %v756_v27, %v755_v21  ;;  %v491_v31 = vadd.f32 %v490_v28, %v394_v26  ;;  %v429_v27 = vadd.f32 %v778_v56, %v1054_v60 }
  0xfe   :  { %v758_v32 = vpop.f32.mrf.mxu0  ;;  %v806_v33 = vpop.f32.mrf.mxu1 }
  0xff   :  { %619 = vst.msk [vmem:[%s1147_s3 + $0x4] sm:$0xf] %vm617_vm1, %v706_v29  ;;  %v402_v34 = vadd.f32 %v757_v30, %v1054_v60  ;;  %v541_v35 = vmax.f32 %v491_v31, 0.0 }
 0x100   :  { %v759_v37 = vpop.f32.mrf.mxu0  ;;  %v493_v38 = vpop.f32.mrf.mxu1 }
 0x101   :  { %v499_v39 = vadd.f32 %v805_v22, %v402_v34  ;;  %v709_v40 = vpack.c.bf16 %v541_v35, %v541_v35  ;;  %v760_v41 = vadd.f32 %v759_v37, %v758_v32  ;;  %v494_v42 = vadd.f32 %v493_v38, %v397_v36 }
 0x102   :  { %v761_v44 = vpop.f32.mrf.mxu0  ;;  %v809_v46 = vpop.f32.mrf.mxu1 }
 0x103   :  { %v543_v48 = vmax.f32 %v499_v39, 0.0  ;;  %622 = vst.msk [vmem:[%s1147_s3 + $0x10] sm:$0xf] %vm617_vm1, %v709_v40  ;;  %v405_v50 = vadd.f32 %v760_v41, %v1054_v60  ;;  %v542_v52 = vmax.f32 %v494_v42, 0.0 }
 0x104   :  { %v762_v55 = vpop.f32.mrf.mxu0  ;;  %v506_v57 = vpop.f32.mrf.mxu1 }
 0x105   :  { %v711_v58 = vpack.c.bf16 %v543_v48, %v543_v48  ;;  %v502_v61 = vadd.f32 %v806_v33, %v405_v50  ;;  %v710_v62 = vpack.c.bf16 %v542_v52, %v542_v52  ;;  %v763_v63 = vadd.f32 %v762_v55, %v761_v44 }
 0x106   :  { %v764_v0 = vpop.f32.mrf.mxu0  ;;  %v810_v1 = vpop.f32.mrf.mxu1 }
 0x107   :  { %624 = vst.msk [vmem:[%s1147_s3 + $0x18] sm:$0xf] %vm617_vm1, %v711_v58  ;;  %v544_v2 = vmax.f32 %v502_v61, 0.0  ;;  %623 = vst.msk [vmem:[%s1147_s3 + $0x14] sm:$0xf] %vm617_vm1, %v710_v62  ;;  %v410_v51 = vadd.f32 %v763_v63, %v1054_v60 }
 0x108   :  { %v765_v4 = vpop.f32.mrf.mxu0  ;;  %v509_v5 = vpop.f32.mrf.mxu1 }
 0x109   :  { %v712_v6 = vpack.c.bf16 %v544_v2, %v544_v2  ;;  %v507_v7 = vadd.f32 %v506_v57, %v410_v51  ;;  %v766_v8 = vadd.f32 %v765_v4, %v764_v0 }
 0x10a   :  { %v767_v10 = vpop.f32.mrf.mxu0  ;;  %v813_v11 = vpop.f32.mrf.mxu1 }
 0x10b   :  { %625 = vst.msk [vmem:[%s1147_s3 + $0x1c] sm:$0xf] %vm617_vm1, %v712_v6  ;;  %v545_v12 = vmax.f32 %v507_v7, 0.0  ;;  %v413_v43 = vadd.f32 %v766_v8, %v1054_v60  ;;  %v531_v45 = vadd.f32 %v813_v11, %v434_v9 }
 0x10c   :  { %v768_v59 = vpop.f32.mrf.mxu0  ;;  %v522_v14 = vpop.f32.mrf.mxu1 }
 0x10d   :  { %v713_v16 = vpack.c.bf16 %v545_v12, %v545_v12  ;;  %v510_v17 = vadd.f32 %v509_v5, %v413_v43  ;;  %v551_v18 = vmax.f32 %v531_v45, 0.0  ;;  %v769_v19 = vadd.f32 %v768_v59, %v767_v10 }
 0x10e   :  { %v523_v20 = vadd.f32 %v522_v14, %v426_v13  ;;  %v770_v21 = vpop.f32.mrf.mxu0  ;;  %v814_v22 = vpop.f32.mrf.mxu1 }
 0x10f   :  { %626 = vst.msk [vmem:[%s1147_s3 + $0x20] sm:$0xf] %vm617_vm1, %v713_v16  ;;  %v546_v23 = vmax.f32 %v510_v17, 0.0  ;;  %v719_v47 = vpack.c.bf16 %v551_v18, %v551_v18  ;;  %v418_v49 = vadd.f32 %v769_v19, %v1054_v60  ;;  %v534_v24 = vadd.f32 %v814_v22, %v437_v15 }
 0x110   :  { %v549_v25 = vmax.f32 %v523_v20, 0.0  ;;  %v771_v26 = vpop.f32.mrf.mxu0  ;;  %v525_v28 = vpop.f32.mrf.mxu1 }
 0x111   :  { %v714_v29 = vpack.c.bf16 %v546_v23, %v546_v23  ;;  %632 = vst.msk [vmem:[%s1147_s3 + $0x38] sm:$0xf] %vm617_vm1, %v719_v47  ;;  %v515_v30 = vadd.f32 %v809_v46, %v418_v49  ;;  %v552_v31 = vmax.f32 %v534_v24, 0.0  ;;  %v772_v32 = vadd.f32 %v771_v26, %v770_v21 }
 0x112   :  { %v717_v33 = vpack.c.bf16 %v549_v25, %v549_v25  ;;  %v526_v34 = vadd.f32 %v525_v28, %v429_v27 }
 0x113   :  { %627 = vst.msk [vmem:[%s1147_s3 + $0x24] sm:$0xf] %vm617_vm1, %v714_v29  ;;  %v547_v35 = vmax.f32 %v515_v30, 0.0  ;;  %v720_v36 = vpack.c.bf16 %v552_v31, %v552_v31  ;;  %v421_v37 = vadd.f32 %v772_v32, %v1054_v60 }
 0x114   :  { %630 = vst.msk [vmem:[%s1147_s3 + $0x30] sm:$0xf] %vm617_vm1, %v717_v33  ;;  %v550_v38 = vmax.f32 %v526_v34, 0.0 }
 0x115   :  { %v715_v39 = vpack.c.bf16 %v547_v35, %v547_v35  ;;  %633 = vst.msk [vmem:[%s1147_s3 + $0x3c] sm:$0xf] %vm617_vm1, %v720_v36  ;;  %v518_v40 = vadd.f32 %v810_v1, %v421_v37 }
 0x116   :  { %v718_v41 = vpack.c.bf16 %v550_v38, %v550_v38 }
 0x117   :  { %628 = vst.msk [vmem:[%s1147_s3 + $0x28] sm:$0xf] %vm617_vm1, %v715_v39  ;;  %v548_v60 = vmax.f32 %v518_v40, 0.0 }
 0x118   :  { %631 = vst.msk [vmem:[%s1147_s3 + $0x34] sm:$0xf] %vm617_vm1, %v718_v41 }
 0x119   :  { %v716_v42 = vpack.c.bf16 %v548_v60, %v548_v60 }
 0x11b   :  { %629 = vst.msk [vmem:[%s1147_s3 + $0x2c] sm:$0xf] %vm617_vm1, %v716_v42 }

// kernel: muril_image_classifier.8
= control target key start
LH: loop header
LB: loop body
LE: loop exit
PB: predicated region body
PF: predicated region fallthrough
CT: control target
= control target key end

     0   :  { %v630_v35 = vmov 0.0   ;;  %vm631_vm0 = vmmov 0   ;;  %vm330_vm1 = vcmask 523264   ;;  %vm455_vm2 = vcmask 1043456   ;;  %s775_s1 = inlined_call_operand.vmem [shape: bf16[576,128], index: 1, kind: input, shape index: {}]   ;;  %s776_s0 = inlined_call_operand.vmem [shape: bf16[8,576], index: 0, kind: input, shape index: {}]   ;;  %s777_s2 = inlined_call_operand.vmem [shape: f32[1,128], index: 2, kind: input, shape index: {}]   ;;  %s778_s3 = inlined_call_operand.vmem [shape: f32[2,128], index: 3, kind: output, shape index: {}]  }
   0x1   :  { %v589_v0 = vld [vmem:[%s775_s1 + $0x78] sm:$0xff]   ;;  %v593_v4 = vld [vmem:[%s775_s1 + $0x70] sm:$0xff]   ;;  %v597_v8 = vld [vmem:[%s775_s1 + $0x68] sm:$0xff]   ;;  %vm476_vm3 = vcmask 1040384  }
   0x2   :  { %v590_v1 = vld [vmem:[%s775_s1 + $0x38] sm:$0xff]   ;;  %526 = vmatprep.subr.bf16.mxu0 %v589_v0  ;;  %v594_v5 = vld [vmem:[%s775_s1 + $0x30] sm:$0xff]   ;;  %v598_v9 = vld [vmem:[%s775_s1 + $0x28] sm:$0xff]  }
   0x3   :  { %v591_v2 = vld [vmem:[%s775_s1 + $0xf8] sm:$0xff]   ;;  %527 = vmatpush3.bf16.msra.mxu0 %v590_v1  ;;  %v595_v6 = vld [vmem:[%s775_s1 + $0xf0] sm:$0xff]   ;;  %v599_v10 = vld [vmem:[%s775_s1 + $0xe8] sm:$0xff]  }
   0x4   :  { %v592_v3 = vld [vmem:[%s775_s1 + $0xb8] sm:$0xff]   ;;  %548 = vmatprep.subr.bf16.mxu1 %v591_v2  ;;  %528 = vmatprep.subr.bf16.mxu0 %v593_v4  ;;  %v596_v7 = vld [vmem:[%s775_s1 + $0xb0] sm:$0xff]   ;;  %v600_v11 = vld [vmem:[%s775_s1 + $0xa8] sm:$0xff]  }
   0x5   :  { %549 = vmatpush3.bf16.msra.mxu1 %v592_v3  ;;  %v601_v12 = vld [vmem:[%s775_s1 + $0x60] sm:$0xff]   ;;  %v605_v16 = vld [vmem:[%s775_s1 + $0x58] sm:$0xff]   ;;  %v609_v20 = vld [vmem:[%s775_s1 + $0x50] sm:$0xff]  }
   0x6   :  { %550 = vmatprep.subr.bf16.mxu1 %v595_v6  ;;  %v602_v13 = vld [vmem:[%s775_s1 + $0x20] sm:$0xff]   ;;  %v606_v17 = vld [vmem:[%s775_s1 + $0x18] sm:$0xff]   ;;  %v610_v21 = vld [vmem:[%s775_s1 + $0x10] sm:$0xff]  }
   0x7   :  { %529 = vmatpush3.bf16.msra.mxu0 %v594_v5  ;;  %v603_v14 = vld [vmem:[%s775_s1 + $0xe0] sm:$0xff]   ;;  %v607_v18 = vld [vmem:[%s775_s1 + $0xd8] sm:$0xff]   ;;  %v611_v22 = vld [vmem:[%s775_s1 + $0xd0] sm:$0xff]  }
   0x8   :  { %530 = vmatprep.subr.bf16.mxu0 %v597_v8  ;;  %v604_v15 = vld [vmem:[%s775_s1 + $0xa0] sm:$0xff]   ;;  %v608_v19 = vld [vmem:[%s775_s1 + $0x98] sm:$0xff]   ;;  %v612_v23 = vld [vmem:[%s775_s1 + $0x90] sm:$0xff]  }
   0x9   :  { %551 = vmatpush3.bf16.msra.mxu1 %v596_v7  ;;  %v613_v24 = vld [vmem:[%s775_s1 + $0x48] sm:$0xff]   ;;  %v617_v28 = vld [vmem:[%s775_s1 + $0x40] sm:$0xff]   ;;  %v626_v39 = vld [vmem:[%s775_s1 + $0x118] sm:$0xff]  }
   0xa   :  { %552 = vmatprep.subr.bf16.mxu1 %v599_v10  ;;  %v614_v25 = vld [vmem:[%s775_s1 + $0x8] sm:$0xff]   ;;  %v618_v29 = vld [vmem:[%s775_s1] sm:$0xff]   ;;  %v627_v40 = vld [vmem:[%s775_s1 + $0x110] sm:$0xff]  }
   0xb   :  { %531 = vmatpush3.bf16.msra.mxu0 %v598_v9  ;;  %v615_v26 = vld [vmem:[%s775_s1 + $0xc8] sm:$0xff]   ;;  %v619_v30 = vld [vmem:[%s775_s1 + $0xc0] sm:$0xff]   ;;  %v622_v43 = vld [vmem:[%s776_s0 + $0x10] ss:$0 sps:$4 sm:$0xff]  }
   0xc   :  { %532 = vmatprep.subr.bf16.mxu0 %v601_v12  ;;  %v616_v27 = vld [vmem:[%s775_s1 + $0x88] sm:$0xff]   ;;  %v15_v31 = vld [vmem:[%s776_s0] sm:$0xff] }
   0xd   :  { %553 = vmatpush3.bf16.msra.mxu1 %v600_v11  ;;  %v484_v32 = vcombine.low %v15_v31, %v15_v31  ;;  %v485_v33 = vcombine.high %v15_v31, %v15_v31  ;;  %v623_v34 = vld [vmem:[%s775_s1 + $0x80] sm:$0xff]   ;;  %v16_v36 = vld [vmem:[%s776_s0 + $0x8] sm:$0xff] }
   0xe   :  { %554 = vmatprep.subr.bf16.mxu1 %v603_v14  ;;  %v486_v37 = vcombine.low %v16_v36, %v16_v36  ;;  %v487_v38 = vcombine.high %v16_v36, %v16_v36  ;;  %v628_v41 = vld [vmem:[%s775_s1 + $0x108] sm:$0xff]   ;;  %v629_v42 = vld [vmem:[%s775_s1 + $0x100] sm:$0xff]  }
   0xf   :  { %533 = vmatpush3.bf16.msra.mxu0 %v602_v13  ;;  %366 = vmatprep.mubr.bf16.mxu0 %v485_v33  ;;  %v483_v52 = vld [vmem:[%s777_s2] ss:$0 sm:$0xff] }
  0x10   :  { %534 = vmatprep.subr.bf16.mxu0 %v605_v16  ;;  %406 = vmatprep.mubr.bf16.mxu1 %v487_v38 }
  0x11   :  { %555 = vmatpush3.bf16.msra.mxu1 %v604_v15 }
  0x12   :  { %556 = vmatprep.subr.bf16.mxu1 %v607_v18 }
  0x13   :  { %535 = vmatpush3.bf16.msra.mxu0 %v606_v17 }
  0x14   :  { %536 = vmatprep.subr.bf16.mxu0 %v609_v20 }
  0x15   :  { %557 = vmatpush3.bf16.msra.mxu1 %v608_v19 }
  0x16   :  { %558 = vmatprep.subr.bf16.mxu1 %v611_v22 }
  0x17   :  { %537 = vmatpush3.bf16.msra.mxu0 %v610_v21 }
  0x18   :  { %538 = vmatprep.subr.bf16.mxu0 %v613_v24 }
  0x19   :  { %559 = vmatpush3.bf16.msra.mxu1 %v612_v23 }
  0x1a   :  { %560 = vmatprep.subr.bf16.mxu1 %v615_v26 }
  0x1b   :  { %539 = vmatpush3.bf16.msra.mxu0 %v614_v25 }
  0x1c   :  { %540 = vmatprep.subr.bf16.mxu0 %v617_v28 }
  0x1d   :  { %561 = vmatpush3.bf16.msra.mxu1 %v616_v27 }
  0x1e   :  { %562 = vmatprep.subr.bf16.mxu1 %v619_v30 }
  0x1f   :  { %541 = vmatpush3.bf16.msra.mxu0 %v618_v29 }
  0x20   :  { %575 = vmatprep.subr.bf16.mxu0 %v630_v35 }
  0x21   :  { %563 = vmatpush3.bf16.msra.mxu1 %v623_v34 }
  0x22   :  { %367 = vmatmul.mubr.bf16.vlgmr.msra.gmra.mxu0 %v484_v32 }
  0x23   :  { %576 = vmatpush3.bf16.msra.mxu0 %v626_v39  ;;  %583 = vmatprep.mubr.msk.bf16.mxu0 %vm631_vm0, %v630_v35 }
  0x24   :  { %407 = vmatmul.mubr.bf16.vlgmr.msra.gmra.mxu1 %v486_v37  ;;  %577 = vmatprep.subr.bf16.mxu0 %v630_v35 }
  0x27   :  { %578 = vmatpush3.bf16.msra.mxu0 %v627_v40 }
  0x28   :  { %579 = vmatprep.subr.bf16.mxu0 %v630_v35 }
  0x2b   :  { %580 = vmatpush3.bf16.msra.mxu0 %v628_v41 }
  0x2c   :  { %581 = vmatprep.subr.bf16.mxu0 %v630_v35 }
  0x2f   :  { %582 = vmatpush3.bf16.msra.mxu0 %v629_v42 }
  0x32   :  { %584 = vmatmul.mubr.msk.bf16.vlgmr.msra.gmra.mxu0 %vm330_vm1, %v622_v43 }
  0xe2   :  { %v542_v44 = vpop.f32.mrf.mxu0 }
  0xe4   :  { %v543_v45 = vpop.f32.mrf.mxu0  ;;  %v564_v46 = vpop.f32.mrf.mxu1 }
  0xe5   :  { %v544_v51 = vadd.f32 %v543_v45, %v542_v44 }
  0xe6   :  { %v545_v47 = vpop.f32.mrf.mxu0  ;;  %v565_v48 = vpop.f32.mrf.mxu1 }
  0xe7   :  { %v369_v54 = vadd.f32 %v544_v51, %v483_v52  ;;  %v566_v55 = vadd.f32 %v565_v48, %v564_v46 }
  0xe8   :  { %v546_v49 = vpop.f32.mrf.mxu0  ;;  %v567_v50 = vpop.f32.mrf.mxu1 }
  0xe9   :  { %v409_v56 = vadd.f32 %v566_v55, %v369_v54 }
  0xea   :  { %v568_v53 = vpop.f32.mrf.mxu1 }
  0xf2   :  { %v448_v57 = vpop.f32.mrf.mxu0 }
  0xf3   :  { %v449_v58 = vadd.f32 %v448_v57, %v409_v56 }
  0xf4   :  { %v585_v59 = vpop.f32.mrf.mxu0 }
  0xf5   :  { %v454_v60 = vmax.f32 %v449_v58, 0.0 }
  0xf6   :  { %v451_v61 = vpop.f32.mrf.mxu0 }
  0xf7   :  { %v456_v62 = vsel %vm455_vm2, %v454_v60, 0.0  ;;  %v466_v63 = vrot.slane %v454_v60, 4 }
  0xf8   :  { %v457_v0 = vrot.slane %v456_v62, 4  ;;  %v586_v1 = vpop.f32.mrf.mxu0 }
  0xf9   :  { %v468_v2 = vsel %vm455_vm2, %v466_v63, 0.0 }
  0xfa   :  { %v458_v3 = vadd.f32 %v457_v0, %v456_v62  ;;  %v469_v4 = vrot.slane %v468_v2, 4 }
  0xfc   :  { %v459_v5 = vrot.slane %v458_v3, 2  ;;  %v470_v6 = vadd.f32 %v469_v4, %v468_v2 }
  0xfe   :  { %v460_v7 = vadd.f32 %v459_v5, %v458_v3  ;;  %v471_v8 = vrot.slane %v470_v6, 2 }
 0x100   :  { %v461_v9 = vrot.slane %v460_v7, 1  ;;  %v472_v10 = vadd.f32 %v471_v8, %v470_v6 }
 0x102   :  { %v462_v11 = vadd.f32 %v461_v9, %v460_v7  ;;  %v473_v12 = vrot.slane %v472_v10, 1 }
 0x104   :  { %v474_v13 = vadd.f32 %v473_v12, %v472_v10  ;;  %v464_v14 = vmul.f32 0.25, %v462_v11 }
 0x106   :  { %v475_v15 = vmul.f32 0.25, %v474_v13 }
 0x108   :  { %v477_v16 = vsel %vm476_vm3, %v464_v14, %v475_v15 }
 0x109   :  { %478 = vst [vmem:[%s778_s3] sm:$0x3] %v477_v16 }

// kernel: muril_image_classifier.5
= control target key start
LH: loop header
LB: loop body
LE: loop exit
PB: predicated region body
PF: predicated region fallthrough
CT: control target
= control target key end

     0   :  { %s2464_s21 = smov 0   ;;  %s2466_s22 = smov 0   ;;  %s2775_s0 = inlined_call_operand.vmem [shape: f32[2,8,128], index: 0, kind: input, shape index: {}]   ;;  %s2776_s1 = inlined_call_operand.vmem [shape: f32[2,1,8], index: 1, kind: input, shape index: {}]   ;;  %s2777_s2 = inlined_call_operand.vmem [shape: f32[1,128], index: 2, kind: input, shape index: {}]   ;;  %s2778_s3 = inlined_call_operand.vmem [shape: f32[1,128], index: 3, kind: input, shape index: {}]   ;;  %s2779_s4 = inlined_call_operand.vmem [shape: bf16[2,128,384], index: 4, kind: input, shape index: {}]   ;;  %s2780_s5 = inlined_call_operand.vmem [shape: f32[2,1,384], index: 5, kind: input, shape index: {}]   ;;  %s2781_s6 = inlined_call_operand.vmem [shape: bf16[2,128,128], index: 6, kind: input, shape index: {}]   ;;  %s2782_s7 = inlined_call_operand.vmem [shape: f32[2,1,128], index: 7, kind: input, shape index: {}]   ;;  %s2783_s8 = inlined_call_operand.vmem [shape: f32[2,1,128], index: 8, kind: input, shape index: {}]   ;;  %s2784_s9 = inlined_call_operand.vmem [shape: f32[2,1,128], index: 9, kind: input, shape index: {}]   ;;  %s2785_s10 = inlined_call_operand.vmem [shape: bf16[2,128,256], index: 10, kind: input, shape index: {}]   ;;  %s2786_s11 = inlined_call_operand.vmem [shape: f32[2,1,256], index: 11, kind: input, shape index: {}]   ;;  %s2787_s12 = inlined_call_operand.vmem [shape: bf16[2,256,128], index: 12, kind: input, shape index: {}]   ;;  %s2788_s13 = inlined_call_operand.vmem [shape: f32[2,1,128], index: 13, kind: input, shape index: {}]   ;;  %s2789_s14 = inlined_call_operand.vmem [shape: f32[2,1,128], index: 14, kind: input, shape index: {}]   ;;  %s2790_s15 = inlined_call_operand.vmem [shape: f32[2,1,128], index: 15, kind: input, shape index: {}]   ;;  %s2791_s16 = inlined_call_operand.vmem [shape: f32[2,1,128], index: 16, kind: output, shape index: {}]  }
   0x1   :  { %2796 = sst [smem:[#allocation10_spill]] %s2775_s0  ;;  %s2468_s23 = smov 0  }
   0x2   :  { %2797 = sst [smem:[#allocation11_spill]] %s2776_s1  ;;  %s2470_s24 = smov 0  }
   0x3   :  { %2798 = sst [smem:[#allocation12_spill]] %s2777_s2  ;;  %s2472_s25 = smov 0  }
   0x4   :  { %2799 = sst [smem:[#allocation13_spill]] %s2778_s3 }
   0x5   :  { %2800 = sst [smem:[#allocation14_spill]] %s2779_s4 }
   0x6   :  { %2801 = sst [smem:[#allocation15_spill]] %s2780_s5 }
   0x7   :  { %2802 = sst [smem:[#allocation16_spill]] %s2781_s6 }
   0x8   :  { %2803 = sst [smem:[#allocation17_spill]] %s2784_s9 }
   0x9   :  { %2804 = sst [smem:[#allocation18_spill]] %s2785_s10 }
   0xa   :  { %2805 = sst [smem:[#allocation19_spill]] %s2786_s11 }
   0xb   :  { %2806 = sst [smem:[#allocation20_spill]] %s2790_s15 }
   0xc   :  { %2807 = sst [smem:[#allocation21_spill]] %s2791_s16 }
   0xd LB: > { %2808 = sst [smem:[#allocation3_spill]] %s2357_s21  ;;  %s35_s26 = sadd.s32 1, %s2365_s23  ;;  %s2373_s25 = sphi %s2472_s25, %s26_s25   ;;  %s2369_s24 = sphi %s2470_s24, %s2841_s24   ;;  %s2365_s23 = sphi %s2468_s23, %s2840_s23   ;;  %s2361_s22 = sphi %s2466_s22, %s2839_s22   ;;  %s2357_s21 = sphi %s2464_s21, %s2838_s21  }
   0xe   : > { %2809 = sst [smem:[#allocation4_spill]] %s2365_s23  ;;  %s38_s27 = sadd.s32 1, %s2369_s24 }
   0xf   : > { %2810 = sst [smem:[#allocation5_spill]] %s2369_s24  ;;  %p36_p0 = scmp.ge.s32.totalorder %s35_s26, 2 }
  0x10   : > { %2811 = sst [smem:[#allocation6_spill]] %s2373_s25  ;;  %p1986_p1 = scmp.ge.s32.totalorder %s2373_s25, 1 }
  0x11   : > { %p587_p2 = scmp.lt.s32.totalorder %s2373_s25, 5  ;;  %s2843_s26 = smov (%p36_p0, %s35_s26), 0 }
  0x12   : > { %2812 = sst [smem:[#allocation7_spill]] %s2843_s26  ;;  %s2845_s27 = smov (!%p36_p0, %s38_s27), %s2369_s24 }
  0x13   : > { %p588_p3 = pnand %p1986_p1, %p587_p2  ;;  %p40_p4 = scmp.ge.s32.totalorder %s2845_s27, 2 }
  0x15   : > { %s2847_s27 = smov (%p40_p4, %s2845_s27), 0  ;;  %591 = sbr.rel (%p588_p3) target bundleno = 3188 (0xc74), region = 84 }
  0x16   : > { %2813 = sst [smem:[#allocation8_spill]] %s2847_s27 }
  0x1a   : > { %p683_p5 = scmp.lt.s32.totalorder %s2361_s22, 1  ;;  %p690_p6 = scmp.lt.s32.totalorder %s2357_s21, 1 }
  0x1b   : > { %s2815_s20 = sld [smem:[#allocation10_spill]] }
  0x1c   : > { %s2849_s22 = smov (!%p683_p5, %s2361_s22), 1  ;;  %s2816_s4 = sld [smem:[#allocation14_spill]] }
  0x1d   : > { %s2500_s28 = scalar_select %p690_p6, %s2357_s21, 1 }
  0x1e   : > { %s1987_s29 = sshll.u32 %s2849_s22, 3  ;;  %s2817_s6 = sld [smem:[#allocation16_spill]] }
  0x1f   : > { %s2191_s26 = smul.u32 192, %s2500_s28  ;;  %s2076_s23 = sshll.u32 %s2500_s28, 6 }
  0x20   : > { %s2192_s24 = smul.u32 3, %s2500_s28  ;;  %s2818_s5 = sld [smem:[#allocation15_spill]] }
  0x21   : > { %s686_s27 = scalar_lea.vmem %s2815_s20, %s1987_s29  ;;  %s2077_s16 = sshll.u32 %s2500_s28, 7 }
  0x22   : > { %s2516_s2 = scalar_lea.vmem %s2816_s4, %s2191_s26  ;;  %s1993_s21 = sshll.u32 %s2500_s28, 1 }
  0x23   : > { %s2820_s10 = sld [smem:[#allocation18_spill]]  ;;  %s2555_s1 = scalar_lea.vmem %s2787_s12, %s2077_s16 }
  0x24   : > { %s2521_s30 = scalar_lea.vmem %s2817_s6, %s2076_s23  ;;  %s2821_s11 = sld [smem:[#allocation19_spill]] }
  0x25   : > { %s729_s26 = scalar_lea.vmem %s2788_s13, %s2500_s28  ;;  %s732_s6 = scalar_lea.vmem %s2789_s14, %s2500_s28 }
  0x26   : > { %s2526_s29 = scalar_lea.vmem %s2818_s5, %s2192_s24  ;;  %s2824_s18 = sld [smem:[#allocation21_spill]] }
  0x29   : > { %s2545_s0 = scalar_lea.vmem %s2820_s10, %s2077_s16  ;;  %s2823_s10 = sld [smem:[#allocation20_spill]] }
  0x2a   : > { %s2550_s19 = scalar_lea.vmem %s2821_s11, %s1993_s21 }
  0x2b   : > { %2822 = sst [smem:[#allocation9_spill]] %s2550_s19 }
  0x2c   : > { %s738_s11 = scalar_lea.vmem %s2824_s18, %s2849_s22  ;;  %s2825_s19 = sld [smem:[#allocation3_spill]] }
  0x2f   : > { %s735_s9 = scalar_lea.vmem %s2823_s10, %s2500_s28 }
  0x32   : > { %p1996_p7 = scmp.ne.s32.totalorder %s2825_s19, 0 }
  0x33   : > { %s2826_s10 = sld [smem:[#allocation12_spill]] (!%p1996_p7) }
  0x34   : > { %743 = sbr.rel (%p1996_p7) target bundleno = 365 (0x16d), region = 88  ;;  %s2827_s16 = sld [smem:[#allocation13_spill]] (!%p1996_p7) }
  0x39   : > { %v744_v0 = vld [vmem:[%s686_s27] sm:$0xff] }
  0x3a   : > { %747 = vadd.xlane.f32.xlu0 %v744_v0  ;;  %v1997_v9 = vld [vmem:[%s2826_s10] ss:$0 sm:$0xff] }
  0x3b   : > { %v1998_v11 = vld [vmem:[%s2827_s16] ss:$0 sm:$0xff] }
  0xc3   : > { %v748_v1 = vpop.xlane.xlu0 %747 }
  0xc4   : > { %v750_v2 = vmul.f32 0.0078125, %v748_v1 }
  0xc6   : > { %v751_v3 = vsub.f32 %v744_v0, %v750_v2 }
  0xc8   : > { %v752_v4 = vmul.f32 %v751_v3, %v751_v3 }
  0xca   : > { %753 = vadd.xlane.f32.xlu0 %v752_v4 }
 0x153   : > { %v754_v5 = vpop.xlane.xlu0 %753 }
 0x154   : > { %v755_v6 = vmul.f32 0.0078125, %v754_v5 }
 0x156   : > { %v756_v7 = vadd.f32 1e-12, %v755_v6 }
 0x158   : > { %2237 = vrsqrt.f32 %v756_v7 }
 0x165   : > { %v2238_v8 = vpop.eup %2237 }
 0x166   : > { %v758_v10 = vmul.f32 %v2238_v8, %v751_v3 }
 0x168   : > { %v765_v12 = vmul.f32 %v1997_v9, %v758_v10 }
 0x16a   : > { %v772_v13 = vadd.f32 %v1998_v11, %v765_v12 }
 0x16c   : > { %773 = vst [vmem:[#allocation2] sm:$0xff] %v772_v13 }
 0x16d PF: > { %v2239_v14 = vld [vmem:[%s2516_s2 + $0xac] ss:$12 sps:$4 sm:$0xff]   ;;  %v2241_v15 = vld [vmem:[%s2516_s2 + $0xa8] ss:$12 sps:$4 sm:$0xff]   ;;  %v2375_v16 = vmov 0   ;;  %v2376_v17 = vmov 0.0   ;;  %v810_v42 = vlaneseq  ;;  %s2831_s21 = scalar_lea.vmem %s2783_s8, %s2500_s28 }
 0x16e   : > { %985 = vmatprep.mubr.bf16.mxu0 %v2375_v16  ;;  %2127 = vmatprep.subr.bf16.mxu1 %v2376_v17  ;;  %v2242_v18 = vld [vmem:[%s2516_s2 + $0x94] ss:$12 sps:$4 sm:$0xff]   ;;  %v2244_v19 = vld [vmem:[%s2516_s2 + $0x90] ss:$12 sps:$4 sm:$0xff]   ;;  %v2247_v21 = vld [vmem:[%s2516_s2 + $0x78] ss:$12 sps:$4 sm:$0xff]  }
 0x16f   : > { %953 = vmatprep.subr.bf16.mxu0 %v2239_v14  ;;  %v2245_v20 = vld [vmem:[%s2516_s2 + $0x7c] ss:$12 sps:$4 sm:$0xff]   ;;  %v2248_v22 = vld [vmem:[%s2516_s2 + $0x64] ss:$12 sps:$4 sm:$0xff]   ;;  %v2250_v23 = vld [vmem:[%s2516_s2 + $0x60] ss:$12 sps:$4 sm:$0xff]  }
 0x170   : > { %954 = vmatpush1.bf16.msra.mxu0 %v2241_v15  ;;  %v2263_v24 = vld [vmem:[%s2516_s2 + $0xb0] ss:$12 sps:$4 sm:$0xff]   ;;  %v2251_v25 = vld [vmem:[%s2516_s2 + $0x4c] ss:$12 sps:$4 sm:$0xff]   ;;  %v2253_v27 = vld [vmem:[%s2516_s2 + $0x48] ss:$12 sps:$4 sm:$0xff]  }
 0x171   : > { %955 = vmatprep.subr.bf16.mxu0 %v2242_v18  ;;  %2128 = vmatpush3.bf16.msra.mxu1 %v2263_v24  ;;  %v2264_v26 = vld [vmem:[%s2516_s2 + $0x98] ss:$12 sps:$4 sm:$0xff]   ;;  %v2254_v28 = vld [vmem:[%s2516_s2 + $0x34] ss:$12 sps:$4 sm:$0xff]   ;;  %v2256_v29 = vld [vmem:[%s2516_s2 + $0x30] ss:$12 sps:$4 sm:$0xff]  }
 0x172   : > { %2129 = vmatprep.subr.bf16.mxu1 %v2376_v17  ;;  %v2265_v30 = vld [vmem:[%s2516_s2 + $0x80] ss:$12 sps:$4 sm:$0xff]   ;;  %v2257_v31 = vld [vmem:[%s2516_s2 + $0x1c] ss:$12 sps:$4 sm:$0xff]   ;;  %v2259_v33 = vld [vmem:[%s2516_s2 + $0x18] ss:$12 sps:$4 sm:$0xff]  }
 0x173   : > { %v2266_v32 = vld [vmem:[%s2516_s2 + $0x68] ss:$12 sps:$4 sm:$0xff]   ;;  %v2260_v34 = vld [vmem:[%s2516_s2 + $0x4] ss:$12 sps:$4 sm:$0xff]   ;;  %v2262_v36 = vld [vmem:[%s2516_s2] ss:$12 sps:$4 sm:$0xff]  }
 0x174   : > { %956 = vmatpush1.bf16.msra.mxu0 %v2244_v19  ;;  %v2267_v35 = vld [vmem:[%s2516_s2 + $0x50] ss:$12 sps:$4 sm:$0xff]   ;;  %v2606_v37 = vld [vmem:[#allocation2] sm:$0xff]  ;;  %v2270_v41 = vld [vmem:[%s2516_s2 + $0x8] ss:$12 sps:$4 sm:$0xff]   ;;  %vm2377_vm0 = vmmov 0  }
 0x175   : > { %957 = vmatprep.subr.bf16.mxu0 %v2245_v20  ;;  %2130 = vmatpush3.bf16.msra.mxu1 %v2264_v26  ;;  %v2268_v38 = vld [vmem:[%s2516_s2 + $0x38] ss:$12 sps:$4 sm:$0xff]   ;;  %v775_v39 = vpack.c.bf16 %v2606_v37, %v2606_v37  ;;  %v2269_v40 = vld [vmem:[%s2516_s2 + $0x20] ss:$12 sps:$4 sm:$0xff]   ;;  %v2625_v43 = vshrl.u32 %v810_v42, 7  ;;  %vm1038_vm1 = vcmask 523264  }
 0x176   : > { %2131 = vmatprep.subr.bf16.mxu1 %v2376_v17  ;;  %2143 = vmatprep.mubr.msk.bf16.mxu1 %vm2377_vm0, %v2376_v17  ;;  %v808_v46 = vld [vmem:[%s2526_s29] sm:$0x7]  ;;  %s2378_s2 = smov 64   ;;  %vm1109_vm2 = vcmask 1043456   ;;  %s2828_s19 = sld [smem:[#allocation11_spill]]  ;;  %vm1093_vm3 = vcmask 64512  }
 0x177   : > { %v816_v44 = vsub.s32 1, %v2625_v43  ;;  %v812_v45 = vsub.s32 0, %v2625_v43  ;;  %v820_v58 = vsub.s32 2, %v2625_v43  ;;  %s2832_s4 = sld [smem:[#allocation17_spill]] }
 0x178   : > { %958 = vmatpush1.bf16.msra.mxu0 %v2247_v21  ;;  %s2834_s10 = sld [smem:[#allocation9_spill]] }
 0x179   : > { %959 = vmatprep.subr.bf16.mxu0 %v2248_v22  ;;  %2132 = vmatpush3.bf16.msra.mxu1 %v2265_v30  ;;  %v817_v47 = vrot.slane %v808_v46, %v816_v44  ;;  %v813_v49 = vrot.slane %v808_v46, %v812_v45  ;;  %v821_v59 = vrot.slane %v808_v46, %v820_v58 }
 0x17a   : > { %2133 = vmatprep.subr.bf16.mxu1 %v2376_v17 }
 0x17c   : > { %960 = vmatpush1.bf16.msra.mxu0 %v2250_v23  ;;  %s2829_s20 = scalar_lea.vmem %s2828_s19, %s2849_s22 }
 0x17d   : > { %961 = vmatprep.subr.bf16.mxu0 %v2251_v25  ;;  %2134 = vmatpush3.bf16.msra.mxu1 %v2266_v32  ;;  %v2024_v4 = vld [vmem:[%s2829_s20] ss:$0 sm:$0xff]  ;;  %s2833_s5 = scalar_lea.vmem %s2832_s4, %s2500_s28 }
 0x17e   : > { %2135 = vmatprep.subr.bf16.mxu1 %v2376_v17 }
 0x180   : > { %962 = vmatpush1.bf16.msra.mxu0 %v2253_v27 }
 0x181   : > { %963 = vmatprep.subr.bf16.mxu0 %v2254_v28  ;;  %2136 = vmatpush3.bf16.msra.mxu1 %v2267_v35 }
 0x182   : > { %2137 = vmatprep.subr.bf16.mxu1 %v2376_v17 }
 0x184   : > { %964 = vmatpush1.bf16.msra.mxu0 %v2256_v29 }
 0x185   : > { %965 = vmatprep.subr.bf16.mxu0 %v2257_v31  ;;  %2138 = vmatpush3.bf16.msra.mxu1 %v2268_v38 }
 0x186   : > { %2139 = vmatprep.subr.bf16.mxu1 %v2376_v17 }
 0x188   : > { %966 = vmatpush1.bf16.msra.mxu0 %v2259_v33 }
 0x189   : > { %967 = vmatprep.subr.bf16.mxu0 %v2260_v34  ;;  %2140 = vmatpush3.bf16.msra.mxu1 %v2269_v40 }
 0x18a   : > { %2141 = vmatprep.subr.bf16.mxu1 %v2376_v17 }
 0x18c   : > { %968 = vmatpush1.bf16.msra.mxu0 %v2262_v36 }
 0x18d   : > { %2171 = vmatprep.subr.bf16.mxu0 %v2376_v17  ;;  %2142 = vmatpush3.bf16.msra.mxu1 %v2270_v41 }
 0x18e   : > { %2147 = vmatprep.subr.bf16.mxu1 %v2376_v17 }
 0x18f   : > { %986 = vmatmul.mubr.bf16.vlgmr.msra.gmra.mxu0 %v775_v39 }
 0x190   : > { %2187 = vmatprep.mubr.msk.bf16.mxu0 %vm2377_vm0, %v2376_v17  ;;  %2144 = vmatmul.mubr.bf16.vlgmr.msra.gmra.mxu1 %v775_v39 }
 0x191   : > { %2149 = vmatprep.mubr.msk.bf16.mxu1 %vm2377_vm0, %v2376_v17 }
 0x24f   : > { %v987_v48 = vpop.f32.mrf.mxu0 }
 0x250   : > { %v988_v53 = vadd.f32 %v987_v48, %v813_v49  ;;  %v1028_v60 = vpop.f32.mrf.mxu1 }
 0x251   : > { %v989_v50 = vpop.f32.mrf.mxu0  ;;  %v1029_v61 = vadd.f32 %v1028_v60, %v821_v59 }
 0x252   : > { %v990_v51 = vadd.f32 %v989_v50, %v817_v47  ;;  %v1035_v57 = vpack.c.bf16 %v988_v53, %v988_v53  ;;  %v2145_v62 = vpop.f32.mrf.mxu1  ;;  %v2273_v53 = vld [vmem:[%s2521_s30 + $0x28] sm:$0xff]  }
 0x253   : > { %v991_v52 = vpop.f32.mrf.mxu0  ;;  %v1037_v63 = vpack.c.bf16 %v1029_v61, %v1029_v61 }
 0x254   : > { %v1036_v54 = vpack.c.bf16 %v990_v51, %v990_v51  ;;  %v1031_v0 = vpop.f32.mrf.mxu1  ;;  %v2271_v51 = vld [vmem:[%s2521_s30 + $0x38] sm:$0xff]   ;;  %v2272_v52 = vld [vmem:[%s2521_s30 + $0x30] sm:$0xff]  }
 0x255   : > { %v992_v55 = vpop.f32.mrf.mxu0  ;;  %v1111_v1 = vsel %vm1109_vm2, %v1037_v63, 0  ;;  %2172 = vmatpush3.bf16.msra.mxu0 %v2271_v51  ;;  %v2312_v51 = vld [vmem:[%s2555_s1 + $0x18] sm:$0xff]  }
 0x256   : > { %v1043_v56 = vsel %vm1038_vm1, %v1036_v54, 0  ;;  %1157 = vrot.lane.b32.xlu1 %v1036_v54, %s2378_s2  ;;  %v2146_v2 = vpop.f32.mrf.mxu1  ;;  %2173 = vmatprep.subr.bf16.mxu0 %v2376_v17  ;;  %v2274_v54 = vld [vmem:[%s2521_s30 + $0x20] sm:$0xff]   ;;  %v2275_v55 = vld [vmem:[%s2521_s30 + $0x18] sm:$0xff]  }
 0x257   : > { %2148 = vmatpush3.bf16.xpose.msra.mxu1 %v1043_v56  ;;  %v2277_v56 = vld [vmem:[%s2521_s30 + $0x8] sm:$0xff]  }
 0x258   : > { %2153 = vmatprep.subr.bf16.mxu1 %v2376_v17 }
 0x259   : > { %2174 = vmatpush3.bf16.msra.mxu0 %v2272_v52  ;;  %v2313_v52 = vld [vmem:[%s2555_s1 + $0x50] sm:$0xff]  }
 0x25a   : > { %1154 = vrot.lane.b32.xlu1 %v1035_v57, %s2378_s2  ;;  %2175 = vmatprep.subr.bf16.mxu0 %v2376_v17 }
 0x25d   : > { %2176 = vmatpush3.bf16.msra.mxu0 %v2273_v53  ;;  %v2314_v53 = vld [vmem:[%s2555_s1 + $0x10] sm:$0xff]  }
 0x25e   : > { %2150 = vmatmul.mubr.msk.bf16.vlgmr.msra.gmra.mxu1 %vm1038_vm1, %v1035_v57  ;;  %2177 = vmatprep.subr.bf16.mxu0 %v2376_v17  ;;  %v2278_v57 = vld [vmem:[%s2521_s30] sm:$0xff]  }
 0x25f   : > { %2155 = vmatprep.mubr.msk.bf16.mxu1 %vm2377_vm0, %v2376_v17  ;;  %2154 = vmatpush3.bf16.msra.mxu1 %v1111_v1 }
 0x260   : > { %2159 = vmatprep.subr.bf16.mxu1 %v2376_v17 }
 0x261   : > { %2178 = vmatpush3.bf16.msra.mxu0 %v2274_v54  ;;  %v2315_v54 = vld [vmem:[%s2555_s1 + $0x48] sm:$0xff]  }
 0x262   : > { %2179 = vmatprep.subr.bf16.mxu0 %v2376_v17 }
 0x265   : > { %2180 = vmatpush3.bf16.msra.mxu0 %v2275_v55  ;;  %v2316_v55 = vld [vmem:[%s2555_s1 + $0x8] sm:$0xff]  }
 0x266   : > { %2181 = vmatprep.subr.bf16.mxu0 %v2376_v17 }
 0x2c8   : > { %v1158_v21 = vpop.permute.xlu1 %1157 }
 0x2c9   : > { %v1163_v23 = vsel %vm1038_vm1, %v1158_v21, 0  ;;  %v2291_v21 = vld [vmem:[%s2545_s0 + $0x30] ss:$8 sps:$4 sm:$0xff]  }
 0x2cc   : > { %v1155_v24 = vpop.permute.xlu1 %1154 }
 0x31e   : > { %v1079_v3 = vpop.f32.mrf.mxu1 }
 0x31f   : > { %v1085_v5 = vmul.f32 0.125, %v1079_v3 }
 0x320   : > { %v2151_v6 = vpop.f32.mrf.mxu1 }
 0x321   : > { %v1092_v7 = vadd.f32 %v2024_v4, %v1085_v5 }
 0x322   : > { %v1082_v8 = vpop.f32.mrf.mxu1 }
 0x323   : > { %v1094_v9 = vsel %vm1093_vm3, %v1092_v7, -inf  ;;  %v2281_v8 = vld [vmem:[%s2545_s0 + $0x74] ss:$8 sps:$4 sm:$0xff]  }
 0x324   : > { %1095 = vmax.xlane.f32.xlu0 %v1094_v9  ;;  %v2152_v10 = vpop.f32.mrf.mxu1  ;;  %v2284_v9 = vld [vmem:[%s2545_s0 + $0x64] ss:$8 sps:$4 sm:$0xff]  }
 0x325   : > { %v2282_v10 = vld [vmem:[%s2545_s0 + $0x60] ss:$8 sps:$4 sm:$0xff]  }
 0x3ad   : > { %v1096_v11 = vpop.xlane.xlu0 %1095 }
 0x3ae   : > { %v1097_v12 = vsub.f32 %v1092_v7, %v1096_v11  ;;  %v2279_v7 = vld [vmem:[%s2545_s0 + $0x70] ss:$8 sps:$4 sm:$0xff]  }
 0x3b0   : > { %v1098_v13 = vmul.f32 1.442695, %v1097_v12 }
 0x3b2   : > { %2319 = vpow2.f32 %v1098_v13 }
 0x3bf   : > { %v2320_v14 = vpop.eup %2319 }
 0x3c0   : > { %v1100_v15 = vsel %vm1093_vm3, %v2320_v14, 0.0 }
 0x3c1   : > { %1101 = vadd.xlane.f32.xlu0 %v1100_v15  ;;  %v2285_v15 = vld [vmem:[%s2545_s0 + $0x50] ss:$8 sps:$4 sm:$0xff]  }
 0x44a   : > { %v1102_v18 = vpop.xlane.xlu0 %1101 }
 0x44b   : > { %2321 = vrcp.f32 %v1102_v18  ;;  %v2288_v18 = vld [vmem:[%s2545_s0 + $0x40] ss:$8 sps:$4 sm:$0xff]  }
 0x458   : > { %v2322_v19 = vpop.eup %2321 }
 0x459   : > { %v1104_v20 = vmul.f32 %v2322_v19, %v2320_v14  ;;  %v2287_v14 = vld [vmem:[%s2545_s0 + $0x54] ss:$8 sps:$4 sm:$0xff]   ;;  %v2290_v19 = vld [vmem:[%s2545_s0 + $0x44] ss:$8 sps:$4 sm:$0xff]  }
 0x45b   : > { %v1105_v22 = vpack.c.bf16 %v1104_v20, %v1104_v20  ;;  %v2293_v20 = vld [vmem:[%s2545_s0 + $0x34] ss:$8 sps:$4 sm:$0xff]  }
 0x45d   : > { %2156 = vmatmul.mubr.msk.bf16.vlgmr.msra.gmra.mxu1 %vm1093_vm3, %v1105_v22  ;;  %v2296_v22 = vld [vmem:[%s2545_s0 + $0x24] ss:$8 sps:$4 sm:$0xff]  }
 0x45e   : > { %2160 = vmatpush3.bf16.xpose.msra.mxu1 %v1163_v23  ;;  %2161 = vmatprep.mubr.msk.bf16.mxu1 %vm2377_vm0, %v2376_v17  ;;  %v2294_v23 = vld [vmem:[%s2545_s0 + $0x20] ss:$8 sps:$4 sm:$0xff]  }
 0x45f   : > { %2165 = vmatprep.subr.bf16.mxu1 %v2376_v17 }
 0x465   : > { %2162 = vmatmul.mubr.msk.bf16.vlgmr.msra.gmra.mxu1 %vm1038_vm1, %v1155_v24  ;;  %v2299_v24 = vld [vmem:[%s2545_s0 + $0x14] ss:$8 sps:$4 sm:$0xff]  }
 0x466   : > { %2167 = vmatprep.mubr.msk.bf16.mxu1 %vm2377_vm0, %v2376_v17 }
 0x51d   : > { %v1147_v25 = vpop.f32.mrf.mxu1 }
 0x51f   : > { %v2157_v26 = vpop.f32.mrf.mxu1 }
 0x520   : > { %v2302_v26 = vld [vmem:[%s2545_s0 + $0x4] ss:$8 sps:$4 sm:$0xff]  }
 0x521   : > { %v1150_v27 = vpop.f32.mrf.mxu1 }
 0x522   : > { %v2300_v27 = vld [vmem:[%s2545_s0] ss:$8 sps:$4 sm:$0xff]  }
 0x523   : > { %v2158_v28 = vpop.f32.mrf.mxu1 }
 0x525   : > { %v1199_v29 = vpop.f32.mrf.mxu1 }
 0x526   : > { %v1205_v30 = vmul.f32 0.125, %v1199_v29 }
 0x527   : > { %v2163_v31 = vpop.f32.mrf.mxu1 }
 0x528   : > { %v1206_v32 = vadd.f32 %v2024_v4, %v1205_v30 }
 0x529   : > { %v1202_v33 = vpop.f32.mrf.mxu1 }
 0x52a   : > { %v1207_v34 = vsel %vm1093_vm3, %v1206_v32, -inf }
 0x52b   : > { %1208 = vmax.xlane.f32.xlu0 %v1207_v34  ;;  %v2164_v35 = vpop.f32.mrf.mxu1  ;;  %v2038_v34 = vld [vmem:[%s2833_s5] ss:$0 sm:$0xff] }
 0x541   : > { %1220 = vrot.lane.b32.xlu0 %v1037_v63, %s2378_s2 }
 0x5b4   : > { %v1209_v36 = vpop.xlane.xlu0 %1208 }
 0x5b5   : > { %v1210_v38 = vsub.f32 %v1206_v32, %v1209_v36  ;;  %v2037_v32 = vld [vmem:[%s2831_s21] ss:$0 sm:$0xff] }
 0x5b7   : > { %v1211_v39 = vmul.f32 1.442695, %v1210_v38 }
 0x5b8   : > { %v1221_v40 = vpop.permute.xlu0 %1220 }
 0x5b9   : > { %2323 = vpow2.f32 %v1211_v39  ;;  %v1226_v41 = vsel %vm1109_vm2, %v1221_v40, 0  ;;  %v2303_v39 = vld [vmem:[%s2555_s1 + $0x78] sm:$0xff]  }
 0x5ba   : > { %2166 = vmatpush3.bf16.msra.mxu1 %v1226_v41  ;;  %v2304_v40 = vld [vmem:[%s2555_s1 + $0x38] sm:$0xff]   ;;  %v2305_v41 = vld [vmem:[%s2555_s1 + $0x70] sm:$0xff]  }
 0x5bb   : > { %1523 = vmatprep.subr.bf16.mxu1 %v2281_v8 }
 0x5c6   : > { %v2324_v42 = vpop.eup %2323 }
 0x5c7   : > { %v1213_v46 = vsel %vm1093_vm3, %v2324_v42, 0.0 }
 0x5c8   : > { %1214 = vadd.xlane.f32.xlu1 %v1213_v46  ;;  %v2307_v46 = vld [vmem:[%s2555_s1 + $0x68] sm:$0xff]  }
 0x651   : > { %v1215_v47 = vpop.xlane.xlu1 %1214 }
 0x652   : > { %2325 = vrcp.f32 %v1215_v47  ;;  %v2308_v47 = vld [vmem:[%s2555_s1 + $0x28] sm:$0xff]  }
 0x65f   : > { %v2326_v48 = vpop.eup %2325 }
 0x660   : > { %v1217_v49 = vmul.f32 %v2326_v48, %v2324_v42  ;;  %v2306_v42 = vld [vmem:[%s2555_s1 + $0x30] sm:$0xff]   ;;  %v2309_v48 = vld [vmem:[%s2555_s1 + $0x60] sm:$0xff]  }
 0x662   : > { %v1218_v50 = vpack.c.bf16 %v1217_v49, %v1217_v49  ;;  %v2310_v49 = vld [vmem:[%s2555_s1 + $0x20] sm:$0xff]  }
 0x664   : > { %2168 = vmatmul.mubr.msk.bf16.vlgmr.msra.gmra.mxu1 %vm1093_vm3, %v1218_v50  ;;  %v2311_v50 = vld [vmem:[%s2555_s1 + $0x58] sm:$0xff]  }
 0x665   : > { %1555 = vmatprep.mubr.bf16.mxu1 %v2375_v16  ;;  %v2276_v16 = vld [vmem:[%s2521_s30 + $0x10] sm:$0xff]   ;;  %s2830_s30 = scalar_lea.vmem %s2782_s7, %s2500_s28  ;;  %1524 = vmatpush1.bf16.msra.mxu1 %v2279_v7 }
 0x666   : > { %2182 = vmatpush3.bf16.msra.mxu0 %v2276_v16  ;;  %1525 = vmatprep.subr.bf16.mxu1 %v2284_v9  ;;  %v2317_v16 = vld [vmem:[%s2555_s1 + $0x40] sm:$0xff]  }
 0x667   : > { %2183 = vmatprep.subr.bf16.mxu0 %v2376_v17 }
 0x669   : > { %1526 = vmatpush1.bf16.msra.mxu1 %v2282_v10 }
 0x66a   : > { %2184 = vmatpush3.bf16.msra.mxu0 %v2277_v56  ;;  %1527 = vmatprep.subr.bf16.mxu1 %v2287_v14  ;;  %v2318_v56 = vld [vmem:[%s2555_s1] sm:$0xff]  }
 0x66b   : > { %2185 = vmatprep.subr.bf16.mxu0 %v2376_v17  ;;  %v2028_v17 = vld [vmem:[%s2830_s30] ss:$0 sm:$0xff] }
 0x66d   : > { %1528 = vmatpush1.bf16.msra.mxu1 %v2285_v15 }
 0x66e   : > { %2186 = vmatpush3.bf16.msra.mxu0 %v2278_v57  ;;  %1529 = vmatprep.subr.bf16.mxu1 %v2290_v19  ;;  %v1431_v57 = vld [vmem:[%s2834_s10] sm:$0x3] }
 0x66f   : > { %2105 = vmatprep.subr.bf16.mxu0 %v2303_v39 }
 0x671   : > { %1530 = vmatpush1.bf16.msra.mxu1 %v2288_v18 }
 0x672   : > { %1531 = vmatprep.subr.bf16.mxu1 %v2293_v20  ;;  %v2055_v20 = vld [vmem:[%s729_s26] ss:$0 sm:$0xff] }
 0x675   : > { %1532 = vmatpush1.bf16.msra.mxu1 %v2291_v21 }
 0x676   : > { %1533 = vmatprep.subr.bf16.mxu1 %v2296_v22 }
 0x679   : > { %1534 = vmatpush1.bf16.msra.mxu1 %v2294_v23 }
 0x67a   : > { %1535 = vmatprep.subr.bf16.mxu1 %v2299_v24 }
 0x724   : > { %v1262_v58 = vpop.f32.mrf.mxu1 }
 0x725   : > { %1269 = vrot.lane.b32.xlu0 %v1262_v58, %s2378_s2  ;;  %v1436_v58 = vrot.slane %v1431_v57, %v812_v45 }
 0x726   : > { %v2169_v59 = vpop.f32.mrf.mxu1 }
 0x727   : > { %v1440_v59 = vrot.slane %v1431_v57, %v816_v44 }
 0x728   : > { %v1265_v60 = vpop.f32.mrf.mxu1 }
 0x72a   : > { %v2170_v61 = vpop.f32.mrf.mxu1 }
 0x797   : > { %v1270_v62 = vpop.permute.xlu0 %1269 }
 0x798   : > { %v1272_v63 = vsel %vm1038_vm1, %v1147_v25, %v1270_v62  ;;  %v2297_v25 = vld [vmem:[%s2545_s0 + $0x10] ss:$8 sps:$4 sm:$0xff]  }
 0x799   : > { %v1273_v0 = vpack.c.bf16 %v1272_v63, %v1272_v63  ;;  %1536 = vmatpush1.bf16.msra.mxu1 %v2297_v25 }
 0x79a   : > { %1537 = vmatprep.subr.bf16.mxu1 %v2302_v26 }
 0x79b   : > { %2188 = vmatmul.mubr.bf16.vlgmr.msra.gmra.mxu0 %v1273_v0 }
 0x79c   : > { %2106 = vmatpush3.bf16.msra.mxu0 %v2304_v40 }
 0x79d   : > { %1538 = vmatpush1.bf16.msra.mxu1 %v2300_v27  ;;  %2107 = vmatprep.subr.bf16.mxu0 %v2305_v41 }
 0x7a0   : > { %2108 = vmatpush3.bf16.msra.mxu0 %v2306_v42 }
 0x7a1   : > { %2109 = vmatprep.subr.bf16.mxu0 %v2307_v46 }
 0x7a4   : > { %2110 = vmatpush3.bf16.msra.mxu0 %v2308_v47 }
 0x7a5   : > { %2111 = vmatprep.subr.bf16.mxu0 %v2309_v48 }
 0x7a8   : > { %2112 = vmatpush3.bf16.msra.mxu0 %v2310_v49 }
 0x7a9   : > { %2113 = vmatprep.subr.bf16.mxu0 %v2311_v50 }
 0x7ac   : > { %2114 = vmatpush3.bf16.msra.mxu0 %v2312_v51 }
 0x7ad   : > { %2115 = vmatprep.subr.bf16.mxu0 %v2313_v52 }
 0x7b0   : > { %2116 = vmatpush3.bf16.msra.mxu0 %v2314_v53 }
 0x7b1   : > { %2117 = vmatprep.subr.bf16.mxu0 %v2315_v54 }
 0x7b4   : > { %2118 = vmatpush3.bf16.msra.mxu0 %v2316_v55 }
 0x7b5   : > { %2119 = vmatprep.subr.bf16.mxu0 %v2317_v16 }
 0x7b8   : > { %2120 = vmatpush3.bf16.msra.mxu0 %v2318_v56 }
 0x85b   : > { %v1379_v1 = vpop.f32.mrf.mxu0 }
 0x85c   : > { %v1380_v2 = vadd.f32 %v2028_v17, %v1379_v1 }
 0x85d   : > { %v2189_v3 = vpop.f32.mrf.mxu0 }
 0x85e   : > { %v1385_v4 = vadd.f32 %v1380_v2, %v2606_v37 }
 0x85f   : > { %v1382_v5 = vpop.f32.mrf.mxu0 }
 0x860   : > { %1388 = vadd.xlane.f32.xlu0 %v1385_v4 }
 0x861   : > { %v2190_v6 = vpop.f32.mrf.mxu0 }
 0x8e9   : > { %v1389_v11 = vpop.xlane.xlu0 %1388 }
 0x8ea   : > { %v1391_v37 = vmul.f32 0.0078125, %v1389_v11 }
 0x8ec   : > { %v1392_v12 = vsub.f32 %v1385_v4, %v1391_v37 }
 0x8ee   : > { %v1393_v13 = vmul.f32 %v1392_v12, %v1392_v12 }
 0x8f0   : > { %1394 = vadd.xlane.f32.xlu1 %v1393_v13 }
 0x979   : > { %v1395_v28 = vpop.xlane.xlu1 %1394 }
 0x97a   : > { %v1396_v29 = vmul.f32 0.0078125, %v1395_v28 }
 0x97c   : > { %v1397_v30 = vadd.f32 1e-12, %v1396_v29 }
 0x97e   : > { %2327 = vrsqrt.f32 %v1397_v30 }
 0x98b   : > { %v2328_v31 = vpop.eup %2327 }
 0x98c   : > { %v1399_v33 = vmul.f32 %v2328_v31, %v1392_v12 }
 0x98e   : > { %v1406_v35 = vmul.f32 %v2037_v32, %v1399_v33 }
 0x990   : > { %v2714_v36 = vadd.f32 %v2038_v34, %v1406_v35  ;;  %v2072_v35 = vld [vmem:[%s732_s6] ss:$0 sm:$0xff] }
 0x992   : > { %v1414_v38 = vpack.c.bf16 %v2714_v36, %v2714_v36 }
 0x994   : > { %1556 = vmatmul.mubr.bf16.vlgmr.msra.gmra.mxu1 %v1414_v38 }
 0xa54   : > { %v1557_v60 = vpop.f32.mrf.mxu1 }
 0xa55   : > { %v1558_v61 = vadd.f32 %v1557_v60, %v1436_v58 }
 0xa56   : > { %v1559_v62 = vpop.f32.mrf.mxu1 }
 0xa57   : > { %v1566_v63 = vmul.f32 0.044715, %v1558_v61  ;;  %v1560_v0 = vadd.f32 %v1559_v62, %v1440_v59  ;;  %v1564_v11 = vmul.f32 0.5, %v1558_v61 }
 0xa58   : > { %v1561_v17 = vpop.f32.mrf.mxu1 }
 0xa59   : > { %v1568_v1 = vmul.f32 %v1566_v63, %v1558_v61  ;;  %v1567_v2 = vmul.f32 0.044715, %v1560_v0  ;;  %v1565_v37 = vmul.f32 0.5, %v1560_v0 }
 0xa5a   : > { %v1562_v3 = vpop.f32.mrf.mxu1 }
 0xa5b   : > { %v1570_v4 = vmul.f32 %v1568_v1, %v1558_v61  ;;  %v1569_v5 = vmul.f32 %v1567_v2, %v1560_v0 }
 0xa5d   : > { %v1572_v6 = vadd.f32 %v1570_v4, %v1558_v61  ;;  %v1571_v7 = vmul.f32 %v1569_v5, %v1560_v0 }
 0xa5f   : > { %v1574_v8 = vmul.f32 0.7978846, %v1572_v6  ;;  %v1573_v9 = vadd.f32 %v1571_v7, %v1560_v0 }
 0xa61   : > { %v1575_v10 = vmul.f32 0.7978846, %v1573_v9  ;;  %2329 = vtanh.f32 %v1574_v8 }
 0xa63   : > { %2331 = vtanh.f32 %v1575_v10 }
 0xa6e   : > { %v2330_v43 = vpop.eup %2329 }
 0xa6f   : > { %v1578_v44 = vadd.f32 1.0, %v2330_v43 }
 0xa70   : > { %v2332_v45 = vpop.eup %2331 }
 0xa71   : > { %v1579_v12 = vadd.f32 1.0, %v2332_v45  ;;  %v1580_v13 = vmul.f32 %v1578_v44, %v1564_v11 }
 0xa73   : > { %v1581_v14 = vmul.f32 %v1579_v12, %v1565_v37  ;;  %v1582_v18 = vpack.c.bf16 %v1580_v13, %v1580_v13 }
 0xa75   : > { %v1583_v15 = vpack.c.bf16 %v1581_v14, %v1581_v14 }
 0xa77   : > { %1751 = vmatprep.mubr.bf16.mxu0 %v1583_v15 }
 0xa78   : > { %1752 = vmatmul.mubr.bf16.vlgmr.msra.gmra.mxu0 %v1582_v18 }
 0xb38   : > { %v2121_v19 = vpop.f32.mrf.mxu0 }
 0xb3a   : > { %v2122_v21 = vpop.f32.mrf.mxu0 }
 0xb3b   : > { %v2123_v22 = vadd.f32 %v2122_v21, %v2121_v19 }
 0xb3c   : > { %v2124_v23 = vpop.f32.mrf.mxu0 }
 0xb3d   : > { %v1754_v24 = vadd.f32 %v2123_v22, %v2055_v20 }
 0xb3e   : > { %v2125_v25 = vpop.f32.mrf.mxu0 }
 0xb3f   : > { %v1759_v26 = vadd.f32 %v1754_v24, %v2714_v36  ;;  %v2073_v36 = vld [vmem:[%s735_s9] ss:$0 sm:$0xff] }
 0xb41   : > { %1762 = vadd.xlane.f32.xlu1 %v1759_v26 }
 0xbca   : > { %v1763_v27 = vpop.xlane.xlu1 %1762 }
 0xbcb   : > { %v1764_v28 = vmul.f32 0.0078125, %v1763_v27 }
 0xbcd   : > { %v1765_v29 = vsub.f32 %v1759_v26, %v1764_v28 }
 0xbcf   : > { %v1766_v30 = vmul.f32 %v1765_v29, %v1765_v29 }
 0xbd1   : > { %1767 = vadd.xlane.f32.xlu1 %v1766_v30 }
 0xc5a   : > { %v1768_v31 = vpop.xlane.xlu1 %1767 }
 0xc5b   : > { %v1769_v32 = vmul.f32 0.0078125, %v1768_v31 }
 0xc5d   : > { %v1770_v33 = vadd.f32 1e-12, %v1769_v32 }
 0xc5f   : > { %2333 = vrsqrt.f32 %v1770_v33 }
 0xc6c   : > { %v2334_v34 = vpop.eup %2333 }
 0xc6d   : > { %v1772_v38 = vmul.f32 %v2334_v34, %v1765_v29 }
 0xc6f   : > { %v1779_v39 = vmul.f32 %v2072_v35, %v1772_v38 }
 0xc71   : > { %v1786_v40 = vadd.f32 %v2073_v36, %v1779_v39 }
 0xc73   : > { %1787 = vst [vmem:[#allocation2] sm:$0xff] %v1786_v40  ;;  %1788 = vst [vmem:[%s738_s11] sm:$0x1] %v1786_v40 }
 0xc74 PF: > { %s2837_s15 = sld [smem:[#allocation6_spill]] }
 0xc75   : > { %s2838_s21 = sld [smem:[#allocation4_spill]] }
 0xc76   : > { %s2839_s22 = sld [smem:[#allocation5_spill]] }
 0xc77   : > { %s2840_s23 = sld [smem:[#allocation7_spill]] }
 0xc78   : > { %s2841_s24 = sld [smem:[#allocation8_spill]] }
 0xc7a   : > { %s26_s25 = sadd.s32 1, %s2837_s15  }
 0xc7b   : > { %p23_p8 = scmp.ge.s32.totalorder %s26_s25, 6  }
 0xc7d   :  { %25 = sbr.rel (!%p23_p8) target bundleno = 13 (0xd), region = 157 }

// kernel: muril_image_classifier.9
= control target key start
LH: loop header
LB: loop body
LE: loop exit
PB: predicated region body
PF: predicated region fallthrough
CT: control target
= control target key end

     0   :  { %v1691_v2 = vmov 0   ;;  %s2211_s0 = inlined_call_operand.vmem [shape: f32[2,128], index: 0, kind: input, shape index: {}]   ;;  %s2212_s1 = inlined_call_operand.vmem [shape: f32[2,128], index: 1, kind: input, shape index: {}]   ;;  %s2213_s2 = inlined_call_operand.vmem [shape: bf16[128,512], index: 2, kind: input, shape index: {}]   ;;  %s2214_s3 = inlined_call_operand.vmem [shape: bf16[128,512], index: 3, kind: input, shape index: {}]   ;;  %s2215_s4 = inlined_call_operand.vmem [shape: f32[1,512], index: 4, kind: input, shape index: {}]   ;;  %s2216_s5 = inlined_call_operand.vmem [shape: bf16[512,256], index: 5, kind: input, shape index: {}]   ;;  %s2217_s6 = inlined_call_operand.vmem [shape: f32[1,256], index: 6, kind: input, shape index: {}]   ;;  %s2218_s7 = inlined_call_operand.vmem [shape: bf16[256,128], index: 7, kind: input, shape index: {}]   ;;  %s2219_s8 = inlined_call_operand.vmem [shape: f32[1,128], index: 8, kind: input, shape index: {}]   ;;  %s2220_s9 = inlined_call_operand.hbm [shape: f32[2,128], index: 9, kind: output, shape index: {}]  }
   0x1   :  { %v1461_v0 = vld [vmem:[%s2214_s3 + $0xe4] ss:$16 sps:$4 sm:$0xff]   ;;  %v1463_v1 = vld [vmem:[%s2214_s3 + $0xec] ss:$16 sps:$4 sm:$0xff]   ;;  %294 = vmatprep.mubr.bf16.mxu0 %v1691_v2  ;;  %335 = vmatprep.mubr.bf16.mxu1 %v1691_v2  ;;  %v1465_v3 = vld [vmem:[%s2214_s3 + $0xe0] ss:$16 sps:$4 sm:$0xff]  }
   0x2   :  { %262 = vmatprep.subr.bf16.mxu0 %v1461_v0  ;;  %v1466_v4 = vld [vmem:[%s2214_s3 + $0xe8] ss:$16 sps:$4 sm:$0xff]   ;;  %303 = vmatprep.subr.bf16.mxu1 %v1463_v1  ;;  %v1467_v5 = vld [vmem:[%s2214_s3 + $0xc4] ss:$16 sps:$4 sm:$0xff]   ;;  %v1469_v6 = vld [vmem:[%s2214_s3 + $0xcc] ss:$16 sps:$4 sm:$0xff]  }
   0x3   :  { %263 = vmatpush1.bf16.msra.mxu0 %v1465_v3  ;;  %304 = vmatpush1.bf16.msra.mxu1 %v1466_v4  ;;  %v1471_v7 = vld [vmem:[%s2214_s3 + $0xc0] ss:$16 sps:$4 sm:$0xff]   ;;  %v1472_v8 = vld [vmem:[%s2214_s3 + $0xc8] ss:$16 sps:$4 sm:$0xff]   ;;  %v1473_v9 = vld [vmem:[%s2214_s3 + $0xa4] ss:$16 sps:$4 sm:$0xff]  }
   0x4   :  { %264 = vmatprep.subr.bf16.mxu0 %v1467_v5  ;;  %305 = vmatprep.subr.bf16.mxu1 %v1469_v6  ;;  %v1475_v10 = vld [vmem:[%s2214_s3 + $0xac] ss:$16 sps:$4 sm:$0xff]   ;;  %v1477_v11 = vld [vmem:[%s2214_s3 + $0xa0] ss:$16 sps:$4 sm:$0xff]   ;;  %v1478_v12 = vld [vmem:[%s2214_s3 + $0xa8] ss:$16 sps:$4 sm:$0xff]  }
   0x5   :  { %v1479_v13 = vld [vmem:[%s2214_s3 + $0x84] ss:$16 sps:$4 sm:$0xff]   ;;  %v1481_v14 = vld [vmem:[%s2214_s3 + $0x8c] ss:$16 sps:$4 sm:$0xff]   ;;  %v1483_v15 = vld [vmem:[%s2214_s3 + $0x80] ss:$16 sps:$4 sm:$0xff]  }
   0x6   :  { %v1484_v16 = vld [vmem:[%s2214_s3 + $0x88] ss:$16 sps:$4 sm:$0xff]   ;;  %v1485_v17 = vld [vmem:[%s2214_s3 + $0x64] ss:$16 sps:$4 sm:$0xff]   ;;  %v1487_v18 = vld [vmem:[%s2214_s3 + $0x6c] ss:$16 sps:$4 sm:$0xff]  }
   0x7   :  { %265 = vmatpush1.bf16.msra.mxu0 %v1471_v7  ;;  %306 = vmatpush1.bf16.msra.mxu1 %v1472_v8  ;;  %v1489_v19 = vld [vmem:[%s2214_s3 + $0x60] ss:$16 sps:$4 sm:$0xff]   ;;  %v1490_v20 = vld [vmem:[%s2214_s3 + $0x68] ss:$16 sps:$4 sm:$0xff]   ;;  %v1491_v21 = vld [vmem:[%s2214_s3 + $0x44] ss:$16 sps:$4 sm:$0xff]  }
   0x8   :  { %266 = vmatprep.subr.bf16.mxu0 %v1473_v9  ;;  %307 = vmatprep.subr.bf16.mxu1 %v1475_v10  ;;  %v1493_v22 = vld [vmem:[%s2214_s3 + $0x4c] ss:$16 sps:$4 sm:$0xff]   ;;  %v1495_v23 = vld [vmem:[%s2214_s3 + $0x40] ss:$16 sps:$4 sm:$0xff]   ;;  %v1496_v24 = vld [vmem:[%s2214_s3 + $0x48] ss:$16 sps:$4 sm:$0xff]  }
   0x9   :  { %v1497_v25 = vld [vmem:[%s2214_s3 + $0x24] ss:$16 sps:$4 sm:$0xff]   ;;  %v1499_v26 = vld [vmem:[%s2214_s3 + $0x2c] ss:$16 sps:$4 sm:$0xff]   ;;  %v1501_v27 = vld [vmem:[%s2214_s3 + $0x20] ss:$16 sps:$4 sm:$0xff]  }
   0xa   :  { %v1502_v28 = vld [vmem:[%s2214_s3 + $0x28] ss:$16 sps:$4 sm:$0xff]   ;;  %v1503_v29 = vld [vmem:[%s2214_s3 + $0x4] ss:$16 sps:$4 sm:$0xff]   ;;  %v1505_v30 = vld [vmem:[%s2214_s3 + $0xc] ss:$16 sps:$4 sm:$0xff]  }
   0xb   :  { %267 = vmatpush1.bf16.msra.mxu0 %v1477_v11  ;;  %308 = vmatpush1.bf16.msra.mxu1 %v1478_v12  ;;  %v1507_v31 = vld [vmem:[%s2214_s3] ss:$16 sps:$4 sm:$0xff]   ;;  %v1508_v32 = vld [vmem:[%s2214_s3 + $0x8] ss:$16 sps:$4 sm:$0xff]   ;;  %v1511_v34 = vld [vmem:[%s2213_s2 + $0xe4] ss:$16 sps:$4 sm:$0xff]  }
   0xc   :  { %268 = vmatprep.subr.bf16.mxu0 %v1479_v13  ;;  %309 = vmatprep.subr.bf16.mxu1 %v1481_v14  ;;  %v68_v33 = vld [vmem:[%s2212_s1] sm:$0x3]  ;;  %v1514_v35 = vld [vmem:[%s2213_s2 + $0xec] ss:$16 sps:$4 sm:$0xff]   ;;  %v1512_v38 = vld [vmem:[%s2213_s2 + $0xe8] ss:$16 sps:$4 sm:$0xff]  }
   0xd   :  { %v69_v36 = vpack.c.bf16 %v68_v33, %v68_v33  ;;  %v1509_v37 = vld [vmem:[%s2213_s2 + $0xe0] ss:$16 sps:$4 sm:$0xff]   ;;  %v1517_v39 = vld [vmem:[%s2213_s2 + $0xc4] ss:$16 sps:$4 sm:$0xff]   ;;  %v1520_v40 = vld [vmem:[%s2213_s2 + $0xcc] ss:$16 sps:$4 sm:$0xff]  }
   0xe   :  { %v1515_v41 = vld [vmem:[%s2213_s2 + $0xc0] ss:$16 sps:$4 sm:$0xff]   ;;  %v1518_v42 = vld [vmem:[%s2213_s2 + $0xc8] ss:$16 sps:$4 sm:$0xff]   ;;  %v1523_v43 = vld [vmem:[%s2213_s2 + $0xa4] ss:$16 sps:$4 sm:$0xff]  }
   0xf   :  { %269 = vmatpush1.bf16.msra.mxu0 %v1483_v15  ;;  %310 = vmatpush1.bf16.msra.mxu1 %v1484_v16  ;;  %v1526_v44 = vld [vmem:[%s2213_s2 + $0xac] ss:$16 sps:$4 sm:$0xff]   ;;  %v1521_v45 = vld [vmem:[%s2213_s2 + $0xa0] ss:$16 sps:$4 sm:$0xff]   ;;  %v1524_v46 = vld [vmem:[%s2213_s2 + $0xa8] ss:$16 sps:$4 sm:$0xff]  }
  0x10   :  { %270 = vmatprep.subr.bf16.mxu0 %v1485_v17  ;;  %311 = vmatprep.subr.bf16.mxu1 %v1487_v18  ;;  %v1529_v47 = vld [vmem:[%s2213_s2 + $0x84] ss:$16 sps:$4 sm:$0xff]   ;;  %v1532_v48 = vld [vmem:[%s2213_s2 + $0x8c] ss:$16 sps:$4 sm:$0xff]   ;;  %v1527_v49 = vld [vmem:[%s2213_s2 + $0x80] ss:$16 sps:$4 sm:$0xff]  }
  0x11   :  { %v1530_v50 = vld [vmem:[%s2213_s2 + $0x88] ss:$16 sps:$4 sm:$0xff]   ;;  %v1535_v51 = vld [vmem:[%s2213_s2 + $0x64] ss:$16 sps:$4 sm:$0xff]   ;;  %v1538_v52 = vld [vmem:[%s2213_s2 + $0x6c] ss:$16 sps:$4 sm:$0xff]  }
  0x12   :  { %v1533_v53 = vld [vmem:[%s2213_s2 + $0x60] ss:$16 sps:$4 sm:$0xff]   ;;  %v1536_v54 = vld [vmem:[%s2213_s2 + $0x68] ss:$16 sps:$4 sm:$0xff]   ;;  %v1541_v55 = vld [vmem:[%s2213_s2 + $0x44] ss:$16 sps:$4 sm:$0xff]  }
  0x13   :  { %271 = vmatpush1.bf16.msra.mxu0 %v1489_v19  ;;  %312 = vmatpush1.bf16.msra.mxu1 %v1490_v20  ;;  %v1544_v56 = vld [vmem:[%s2213_s2 + $0x4c] ss:$16 sps:$4 sm:$0xff]   ;;  %v1539_v57 = vld [vmem:[%s2213_s2 + $0x40] ss:$16 sps:$4 sm:$0xff]   ;;  %v1542_v58 = vld [vmem:[%s2213_s2 + $0x48] ss:$16 sps:$4 sm:$0xff]  }
  0x14   :  { %272 = vmatprep.subr.bf16.mxu0 %v1491_v21  ;;  %313 = vmatprep.subr.bf16.mxu1 %v1493_v22  ;;  %v1547_v59 = vld [vmem:[%s2213_s2 + $0x24] ss:$16 sps:$4 sm:$0xff]   ;;  %v1550_v60 = vld [vmem:[%s2213_s2 + $0x2c] ss:$16 sps:$4 sm:$0xff]   ;;  %v1545_v61 = vld [vmem:[%s2213_s2 + $0x20] ss:$16 sps:$4 sm:$0xff]  }
  0x15   :  { %v1548_v62 = vld [vmem:[%s2213_s2 + $0x28] ss:$16 sps:$4 sm:$0xff]   ;;  %v1553_v63 = vld [vmem:[%s2213_s2 + $0x4] ss:$16 sps:$4 sm:$0xff]   ;;  %v1556_v0 = vld [vmem:[%s2213_s2 + $0xc] ss:$16 sps:$4 sm:$0xff]  }
  0x16   :  { %v1551_v1 = vld [vmem:[%s2213_s2] ss:$16 sps:$4 sm:$0xff]   ;;  %v1559_v4 = vld [vmem:[%s2216_s5 + $0x74] ss:$8 sps:$4 sm:$0xff]   ;;  %v1565_v9 = vld [vmem:[%s2216_s5 + $0x64] ss:$8 sps:$4 sm:$0xff]  }
  0x17   :  { %273 = vmatpush1.bf16.msra.mxu0 %v1495_v23  ;;  %314 = vmatpush1.bf16.msra.mxu1 %v1496_v24  ;;  %v34_v3 = vld [vmem:[%s2211_s0] sm:$0x3]  ;;  %v1562_v5 = vld [vmem:[%s2216_s5 + $0x174] ss:$8 sps:$4 sm:$0xff]   ;;  %v1557_v6 = vld [vmem:[%s2216_s5 + $0x70] ss:$8 sps:$4 sm:$0xff]  }
  0x18   :  { %274 = vmatprep.subr.bf16.mxu0 %v1497_v25  ;;  %315 = vmatprep.subr.bf16.mxu1 %v1499_v26  ;;  %v1560_v7 = vld [vmem:[%s2216_s5 + $0x170] ss:$8 sps:$4 sm:$0xff]   ;;  %v35_v8 = vpack.c.bf16 %v34_v3, %v34_v3  ;;  %v1568_v10 = vld [vmem:[%s2216_s5 + $0x164] ss:$8 sps:$4 sm:$0xff]   ;;  %v1563_v11 = vld [vmem:[%s2216_s5 + $0x60] ss:$8 sps:$4 sm:$0xff]  }
  0x19   :  { %v1566_v12 = vld [vmem:[%s2216_s5 + $0x160] ss:$8 sps:$4 sm:$0xff]   ;;  %v1571_v13 = vld [vmem:[%s2216_s5 + $0x54] ss:$8 sps:$4 sm:$0xff]   ;;  %v1569_v15 = vld [vmem:[%s2216_s5 + $0x50] ss:$8 sps:$4 sm:$0xff]  }
  0x1a   :  { %v1574_v14 = vld [vmem:[%s2216_s5 + $0x154] ss:$8 sps:$4 sm:$0xff]   ;;  %v1572_v16 = vld [vmem:[%s2216_s5 + $0x150] ss:$8 sps:$4 sm:$0xff]   ;;  %v1577_v17 = vld [vmem:[%s2216_s5 + $0x44] ss:$8 sps:$4 sm:$0xff]  }
  0x1b   :  { %275 = vmatpush1.bf16.msra.mxu0 %v1501_v27  ;;  %316 = vmatpush1.bf16.msra.mxu1 %v1502_v28  ;;  %v1580_v18 = vld [vmem:[%s2216_s5 + $0x144] ss:$8 sps:$4 sm:$0xff]   ;;  %v1575_v19 = vld [vmem:[%s2216_s5 + $0x40] ss:$8 sps:$4 sm:$0xff]   ;;  %v1583_v21 = vld [vmem:[%s2216_s5 + $0x34] ss:$8 sps:$4 sm:$0xff]  }
  0x1c   :  { %276 = vmatprep.subr.bf16.mxu0 %v1503_v29  ;;  %317 = vmatprep.subr.bf16.mxu1 %v1505_v30  ;;  %v1578_v20 = vld [vmem:[%s2216_s5 + $0x140] ss:$8 sps:$4 sm:$0xff]   ;;  %v1586_v22 = vld [vmem:[%s2216_s5 + $0x134] ss:$8 sps:$4 sm:$0xff]   ;;  %v1581_v23 = vld [vmem:[%s2216_s5 + $0x30] ss:$8 sps:$4 sm:$0xff]  }
  0x1d   :  { %v1584_v24 = vld [vmem:[%s2216_s5 + $0x130] ss:$8 sps:$4 sm:$0xff]  }
  0x1f   :  { %277 = vmatpush1.bf16.msra.mxu0 %v1507_v31  ;;  %318 = vmatpush1.bf16.msra.mxu1 %v1508_v32 }
  0x20   :  { %504 = vmatprep.subr.bf16.mxu0 %v1511_v34  ;;  %545 = vmatprep.subr.bf16.mxu1 %v1514_v35 }
  0x22   :  { %295 = vmatmul.mubr.bf16.vlgmr.msra.gmra.mxu0 %v69_v36  ;;  %336 = vmatmul.mubr.bf16.vlgmr.msra.gmra.mxu1 %v69_v36 }
  0x23   :  { %505 = vmatpush1.bf16.msra.mxu0 %v1509_v37  ;;  %546 = vmatpush1.bf16.msra.mxu1 %v1512_v38 }
  0x24   :  { %506 = vmatprep.subr.bf16.mxu0 %v1517_v39  ;;  %547 = vmatprep.subr.bf16.mxu1 %v1520_v40 }
  0x25   :  { %536 = vmatprep.mubr.bf16.mxu0 %v1691_v2  ;;  %577 = vmatprep.mubr.bf16.mxu1 %v1691_v2  ;;  %v1554_v2 = vld [vmem:[%s2213_s2 + $0x8] ss:$16 sps:$4 sm:$0xff]  }
  0x27   :  { %507 = vmatpush1.bf16.msra.mxu0 %v1515_v41  ;;  %548 = vmatpush1.bf16.msra.mxu1 %v1518_v42 }
  0x28   :  { %508 = vmatprep.subr.bf16.mxu0 %v1523_v43  ;;  %549 = vmatprep.subr.bf16.mxu1 %v1526_v44 }
  0x2b   :  { %509 = vmatpush1.bf16.msra.mxu0 %v1521_v45  ;;  %550 = vmatpush1.bf16.msra.mxu1 %v1524_v46 }
  0x2c   :  { %510 = vmatprep.subr.bf16.mxu0 %v1529_v47  ;;  %551 = vmatprep.subr.bf16.mxu1 %v1532_v48 }
  0x2f   :  { %511 = vmatpush1.bf16.msra.mxu0 %v1527_v49  ;;  %552 = vmatpush1.bf16.msra.mxu1 %v1530_v50 }
  0x30   :  { %512 = vmatprep.subr.bf16.mxu0 %v1535_v51  ;;  %553 = vmatprep.subr.bf16.mxu1 %v1538_v52 }
  0x33   :  { %513 = vmatpush1.bf16.msra.mxu0 %v1533_v53  ;;  %554 = vmatpush1.bf16.msra.mxu1 %v1536_v54 }
  0x34   :  { %514 = vmatprep.subr.bf16.mxu0 %v1541_v55  ;;  %555 = vmatprep.subr.bf16.mxu1 %v1544_v56 }
  0x37   :  { %515 = vmatpush1.bf16.msra.mxu0 %v1539_v57  ;;  %556 = vmatpush1.bf16.msra.mxu1 %v1542_v58 }
  0x38   :  { %516 = vmatprep.subr.bf16.mxu0 %v1547_v59  ;;  %557 = vmatprep.subr.bf16.mxu1 %v1550_v60 }
  0x3b   :  { %517 = vmatpush1.bf16.msra.mxu0 %v1545_v61  ;;  %558 = vmatpush1.bf16.msra.mxu1 %v1548_v62 }
  0x3c   :  { %518 = vmatprep.subr.bf16.mxu0 %v1553_v63  ;;  %559 = vmatprep.subr.bf16.mxu1 %v1556_v0 }
  0x3f   :  { %519 = vmatpush1.bf16.msra.mxu0 %v1551_v1  ;;  %560 = vmatpush1.bf16.msra.mxu1 %v1554_v2 }
  0x40   :  { %1016 = vmatprep.subr.bf16.mxu0 %v1559_v4  ;;  %1057 = vmatprep.subr.bf16.mxu1 %v1562_v5 }
  0x42   :  { %537 = vmatmul.mubr.bf16.vlgmr.msra.gmra.mxu0 %v35_v8  ;;  %578 = vmatmul.mubr.bf16.vlgmr.msra.gmra.mxu1 %v35_v8 }
  0x43   :  { %1017 = vmatpush1.bf16.msra.mxu0 %v1557_v6  ;;  %1058 = vmatpush1.bf16.msra.mxu1 %v1560_v7 }
  0x44   :  { %1018 = vmatprep.subr.bf16.mxu0 %v1565_v9  ;;  %1059 = vmatprep.subr.bf16.mxu1 %v1568_v10 }
  0x47   :  { %1019 = vmatpush1.bf16.msra.mxu0 %v1563_v11  ;;  %1060 = vmatpush1.bf16.msra.mxu1 %v1566_v12 }
  0x48   :  { %1020 = vmatprep.subr.bf16.mxu0 %v1571_v13  ;;  %1061 = vmatprep.subr.bf16.mxu1 %v1574_v14 }
  0x4b   :  { %1021 = vmatpush1.bf16.msra.mxu0 %v1569_v15  ;;  %1062 = vmatpush1.bf16.msra.mxu1 %v1572_v16 }
  0x4c   :  { %1022 = vmatprep.subr.bf16.mxu0 %v1577_v17  ;;  %1063 = vmatprep.subr.bf16.mxu1 %v1580_v18 }
  0x4f   :  { %1023 = vmatpush1.bf16.msra.mxu0 %v1575_v19  ;;  %1064 = vmatpush1.bf16.msra.mxu1 %v1578_v20 }
  0x50   :  { %1024 = vmatprep.subr.bf16.mxu0 %v1583_v21  ;;  %1065 = vmatprep.subr.bf16.mxu1 %v1586_v22 }
  0x51   :  { %14 = vsyncpa [#allocation3], 0  ;;  %v1589_v25 = vld [vmem:[%s2216_s5 + $0x24] ss:$8 sps:$4 sm:$0xff]   ;;  %v1587_v27 = vld [vmem:[%s2216_s5 + $0x20] ss:$8 sps:$4 sm:$0xff]   ;;  %v588_v14 = vlaneseq }
  0x52   :  { %v1592_v26 = vld [vmem:[%s2216_s5 + $0x124] ss:$8 sps:$4 sm:$0xff]   ;;  %v1590_v28 = vld [vmem:[%s2216_s5 + $0x120] ss:$8 sps:$4 sm:$0xff]   ;;  %v1595_v29 = vld [vmem:[%s2216_s5 + $0x14] ss:$8 sps:$4 sm:$0xff]  }
  0x53   :  { %1025 = vmatpush1.bf16.msra.mxu0 %v1581_v23  ;;  %1066 = vmatpush1.bf16.msra.mxu1 %v1584_v24  ;;  %v1598_v30 = vld [vmem:[%s2216_s5 + $0x114] ss:$8 sps:$4 sm:$0xff]   ;;  %v1593_v31 = vld [vmem:[%s2216_s5 + $0x10] ss:$8 sps:$4 sm:$0xff]   ;;  %v1599_v33 = vld [vmem:[%s2216_s5] ss:$8 sps:$4 sm:$0xff]  }
  0x54   :  { %1026 = vmatprep.subr.bf16.mxu0 %v1589_v25  ;;  %1067 = vmatprep.subr.bf16.mxu1 %v1592_v26  ;;  %v1596_v32 = vld [vmem:[%s2216_s5 + $0x110] ss:$8 sps:$4 sm:$0xff]   ;;  %v1601_v34 = vld [vmem:[%s2216_s5 + $0x4] ss:$8 sps:$4 sm:$0xff]   ;;  %v1602_v35 = vld [vmem:[%s2216_s5 + $0x100] ss:$8 sps:$4 sm:$0xff]  }
  0x55   :  { %v1604_v36 = vld [vmem:[%s2216_s5 + $0x104] ss:$8 sps:$4 sm:$0xff]   ;;  %v1607_v37 = vld [vmem:[%s2216_s5 + $0xf4] ss:$8 sps:$4 sm:$0xff]   ;;  %v1605_v39 = vld [vmem:[%s2216_s5 + $0xf0] ss:$8 sps:$4 sm:$0xff]  }
  0x56   :  { %v1610_v38 = vld [vmem:[%s2216_s5 + $0x1f4] ss:$8 sps:$4 sm:$0xff]   ;;  %v1608_v40 = vld [vmem:[%s2216_s5 + $0x1f0] ss:$8 sps:$4 sm:$0xff]   ;;  %v1613_v41 = vld [vmem:[%s2216_s5 + $0xe4] ss:$8 sps:$4 sm:$0xff]  }
  0x57   :  { %1027 = vmatpush1.bf16.msra.mxu0 %v1587_v27  ;;  %1068 = vmatpush1.bf16.msra.mxu1 %v1590_v28  ;;  %v1616_v42 = vld [vmem:[%s2216_s5 + $0x1e4] ss:$8 sps:$4 sm:$0xff]   ;;  %v1611_v43 = vld [vmem:[%s2216_s5 + $0xe0] ss:$8 sps:$4 sm:$0xff]   ;;  %v1619_v45 = vld [vmem:[%s2216_s5 + $0xd4] ss:$8 sps:$4 sm:$0xff]  }
  0x58   :  { %1028 = vmatprep.subr.bf16.mxu0 %v1595_v29  ;;  %1069 = vmatprep.subr.bf16.mxu1 %v1598_v30  ;;  %v1614_v44 = vld [vmem:[%s2216_s5 + $0x1e0] ss:$8 sps:$4 sm:$0xff]   ;;  %v1622_v46 = vld [vmem:[%s2216_s5 + $0x1d4] ss:$8 sps:$4 sm:$0xff]   ;;  %v1617_v47 = vld [vmem:[%s2216_s5 + $0xd0] ss:$8 sps:$4 sm:$0xff]  }
  0x59   :  { %v1620_v48 = vld [vmem:[%s2216_s5 + $0x1d0] ss:$8 sps:$4 sm:$0xff]   ;;  %v1625_v49 = vld [vmem:[%s2216_s5 + $0xc4] ss:$8 sps:$4 sm:$0xff]   ;;  %v1623_v51 = vld [vmem:[%s2216_s5 + $0xc0] ss:$8 sps:$4 sm:$0xff]  }
  0x5a   :  { %v1628_v50 = vld [vmem:[%s2216_s5 + $0x1c4] ss:$8 sps:$4 sm:$0xff]   ;;  %v1626_v52 = vld [vmem:[%s2216_s5 + $0x1c0] ss:$8 sps:$4 sm:$0xff]   ;;  %v1631_v53 = vld [vmem:[%s2216_s5 + $0xb4] ss:$8 sps:$4 sm:$0xff]  }
  0x5b   :  { %1029 = vmatpush1.bf16.msra.mxu0 %v1593_v31  ;;  %1070 = vmatpush1.bf16.msra.mxu1 %v1596_v32  ;;  %v1634_v54 = vld [vmem:[%s2216_s5 + $0x1b4] ss:$8 sps:$4 sm:$0xff]   ;;  %v1629_v55 = vld [vmem:[%s2216_s5 + $0xb0] ss:$8 sps:$4 sm:$0xff]   ;;  %v1637_v57 = vld [vmem:[%s2216_s5 + $0xa4] ss:$8 sps:$4 sm:$0xff]  }
  0x5c   :  { %1030 = vmatprep.subr.bf16.mxu0 %v1601_v34  ;;  %1071 = vmatprep.subr.bf16.mxu1 %v1604_v36  ;;  %v1632_v56 = vld [vmem:[%s2216_s5 + $0x1b0] ss:$8 sps:$4 sm:$0xff]   ;;  %v1640_v58 = vld [vmem:[%s2216_s5 + $0x1a4] ss:$8 sps:$4 sm:$0xff]   ;;  %v1635_v59 = vld [vmem:[%s2216_s5 + $0xa0] ss:$8 sps:$4 sm:$0xff]  }
  0x5d   :  { %v1638_v60 = vld [vmem:[%s2216_s5 + $0x1a0] ss:$8 sps:$4 sm:$0xff]   ;;  %v1643_v61 = vld [vmem:[%s2216_s5 + $0x94] ss:$8 sps:$4 sm:$0xff]   ;;  %v1641_v63 = vld [vmem:[%s2216_s5 + $0x90] ss:$8 sps:$4 sm:$0xff]  }
  0x5e   :  { %v1646_v62 = vld [vmem:[%s2216_s5 + $0x194] ss:$8 sps:$4 sm:$0xff]   ;;  %v1644_v0 = vld [vmem:[%s2216_s5 + $0x190] ss:$8 sps:$4 sm:$0xff]   ;;  %v1649_v1 = vld [vmem:[%s2216_s5 + $0x84] ss:$8 sps:$4 sm:$0xff]  }
  0x5f   :  { %1031 = vmatpush1.bf16.msra.mxu0 %v1599_v33  ;;  %1072 = vmatpush1.bf16.msra.mxu1 %v1602_v35  ;;  %v1652_v2 = vld [vmem:[%s2216_s5 + $0x184] ss:$8 sps:$4 sm:$0xff]   ;;  %v1647_v3 = vld [vmem:[%s2216_s5 + $0x80] ss:$8 sps:$4 sm:$0xff]   ;;  %v1653_v5 = vld [vmem:[%s2218_s7 + $0x78] sm:$0xff]   ;;  %v2140_v15 = vshrl.u32 %v588_v14, 7 }
  0x60   :  { %1032 = vmatprep.subr.bf16.mxu0 %v1607_v37  ;;  %1073 = vmatprep.subr.bf16.mxu1 %v1610_v38  ;;  %v1650_v4 = vld [vmem:[%s2216_s5 + $0x180] ss:$8 sps:$4 sm:$0xff]   ;;  %s1692_s17 = smov [#allocation2]  }
  0x61   :  { %v590_v16 = vsub.s32 0, %v2140_v15  ;;  %v598_v17 = vsub.s32 2, %v2140_v15  ;;  %v586_v18 = vld [vmem:[%s2215_s4] sm:$0xf]  ;;  %v594_v19 = vsub.s32 1, %v2140_v15  ;;  %v602_v20 = vsub.s32 3, %v2140_v15 }
  0x62   :  { %s1284_s3 = sshll.u32 %s1692_s17, 4  ;;  %s1285_s3 = int_to_ptr.vmem [resolvable:$true] %s1284_s3 }
  0x63   :  { %1033 = vmatpush2.bf16.msra.mxu0 %v1605_v39  ;;  %1074 = vmatpush2.bf16.msra.mxu1 %v1608_v40  ;;  %v591_v21 = vrot.slane %v586_v18, %v590_v16  ;;  %v599_v22 = vrot.slane %v586_v18, %v598_v17  ;;  %v595_v27 = vrot.slane %v586_v18, %v594_v19  ;;  %s1669_s18 = scalar_lea.vmem %s1285_s3, 32  ;;  %p1674_p1 = scmp.lt.s32.totalorder %s1285_s3, %s1285_s3 }
  0x64   :  { %1034 = vmatprep.subr.bf16.mxu0 %v1613_v41  ;;  %1075 = vmatprep.subr.bf16.mxu1 %v1616_v42  ;;  %v603_v28 = vrot.slane %v586_v18, %v602_v20  ;;  %p1670_p0 = scmp.ne.s32.totalorder %s1285_s3, %s1669_s18  ;;  %p1675_p2 = scmp.lt.s32.totalorder %s1669_s18, %s1669_s18 }
  0x66   :  { %p1676_p3 = por %p1675_p2, %p1674_p1 }
  0x67   :  { %1035 = vmatpush2.bf16.msra.mxu0 %v1611_v43  ;;  %1076 = vmatpush2.bf16.msra.mxu1 %v1614_v44 }
  0x68   :  { %1036 = vmatprep.subr.bf16.mxu0 %v1619_v45  ;;  %1077 = vmatprep.subr.bf16.mxu1 %v1622_v46  ;;  %p1677_p4 = pnand %p1676_p3, %p1670_p0 }
  0x6b   :  { %1037 = vmatpush2.bf16.msra.mxu0 %v1617_v47  ;;  %1078 = vmatpush2.bf16.msra.mxu1 %v1620_v48  ;;  %v1654_v47 = vld [vmem:[%s2218_s7 + $0x38] sm:$0xff]  }
  0x6c   :  { %1038 = vmatprep.subr.bf16.mxu0 %v1625_v49  ;;  %1079 = vmatprep.subr.bf16.mxu1 %v1628_v50  ;;  %v1655_v50 = vld [vmem:[%s2218_s7 + $0x70] sm:$0xff]  }
  0x6f   :  { %1039 = vmatpush2.bf16.msra.mxu0 %v1623_v51  ;;  %1080 = vmatpush2.bf16.msra.mxu1 %v1626_v52  ;;  %v1656_v51 = vld [vmem:[%s2218_s7 + $0x30] sm:$0xff]   ;;  %v1657_v52 = vld [vmem:[%s2218_s7 + $0x68] sm:$0xff]  }
  0x70   :  { %1040 = vmatprep.subr.bf16.mxu0 %v1631_v53  ;;  %1081 = vmatprep.subr.bf16.mxu1 %v1634_v54  ;;  %v1658_v53 = vld [vmem:[%s2218_s7 + $0x28] sm:$0xff]   ;;  %v1659_v54 = vld [vmem:[%s2218_s7 + $0x60] sm:$0xff]  }
  0x73   :  { %1041 = vmatpush2.bf16.msra.mxu0 %v1629_v55  ;;  %1082 = vmatpush2.bf16.msra.mxu1 %v1632_v56  ;;  %v1660_v55 = vld [vmem:[%s2218_s7 + $0x20] sm:$0xff]   ;;  %v1661_v56 = vld [vmem:[%s2218_s7 + $0x58] sm:$0xff]  }
  0x74   :  { %1042 = vmatprep.subr.bf16.mxu0 %v1637_v57  ;;  %1083 = vmatprep.subr.bf16.mxu1 %v1640_v58  ;;  %v1662_v57 = vld [vmem:[%s2218_s7 + $0x18] sm:$0xff]   ;;  %v1663_v58 = vld [vmem:[%s2218_s7 + $0x50] sm:$0xff]  }
  0x77   :  { %1043 = vmatpush2.bf16.msra.mxu0 %v1635_v59  ;;  %1084 = vmatpush2.bf16.msra.mxu1 %v1638_v60  ;;  %v1664_v59 = vld [vmem:[%s2218_s7 + $0x10] sm:$0xff]   ;;  %v1665_v60 = vld [vmem:[%s2218_s7 + $0x48] sm:$0xff]  }
  0x78   :  { %1044 = vmatprep.subr.bf16.mxu0 %v1643_v61  ;;  %1085 = vmatprep.subr.bf16.mxu1 %v1646_v62  ;;  %v1666_v61 = vld [vmem:[%s2218_s7 + $0x8] sm:$0xff]   ;;  %v1667_v62 = vld [vmem:[%s2218_s7 + $0x40] sm:$0xff]  }
  0x7b   :  { %1045 = vmatpush2.bf16.msra.mxu0 %v1641_v63  ;;  %1086 = vmatpush2.bf16.msra.mxu1 %v1644_v0  ;;  %v1668_v63 = vld [vmem:[%s2218_s7] sm:$0xff]  }
  0x7c   :  { %1046 = vmatprep.subr.bf16.mxu0 %v1649_v1  ;;  %1087 = vmatprep.subr.bf16.mxu1 %v1652_v2  ;;  %v684_v0 = vld [vmem:[%s2217_s6] sm:$0x3] }
  0x7d   :  { %v689_v1 = vrot.slane %v684_v0, %v590_v16  ;;  %v693_v2 = vrot.slane %v684_v0, %v594_v19  ;;  %v1420_v19 = vld [vmem:[%s2219_s8] ss:$0 sm:$0xff] }
  0x7f   :  { %1047 = vmatpush2.bf16.msra.mxu0 %v1647_v3  ;;  %1088 = vmatpush2.bf16.msra.mxu1 %v1650_v4 }
  0x80   :  { %1437 = vmatprep.subr.bf16.mxu0 %v1653_v5 }
  0xe2   :  { %v296_v6 = vpop.f32.mrf.mxu0  ;;  %v337_v7 = vpop.f32.mrf.mxu1 }
  0xe4   :  { %v298_v8 = vpop.f32.mrf.mxu0  ;;  %v339_v9 = vpop.f32.mrf.mxu1 }
  0xe6   :  { %v300_v10 = vpop.f32.mrf.mxu0  ;;  %v341_v11 = vpop.f32.mrf.mxu1 }
  0xe8   :  { %v301_v12 = vpop.f32.mrf.mxu0  ;;  %v342_v13 = vpop.f32.mrf.mxu1 }
 0x102   :  { %v538_v23 = vpop.f32.mrf.mxu0  ;;  %v579_v24 = vpop.f32.mrf.mxu1 }
 0x103   :  { %v539_v25 = vadd.f32 %v538_v23, %v296_v6  ;;  %v580_v26 = vadd.f32 %v579_v24, %v337_v7 }
 0x104   :  { %v540_v29 = vpop.f32.mrf.mxu0  ;;  %v581_v30 = vpop.f32.mrf.mxu1 }
 0x105   :  { %v608_v31 = vadd.f32 %v591_v21, %v539_v25  ;;  %v610_v32 = vadd.f32 %v599_v22, %v580_v26  ;;  %v541_v33 = vadd.f32 %v540_v29, %v298_v8  ;;  %v582_v34 = vadd.f32 %v581_v30, %v339_v9 }
 0x106   :  { %v542_v35 = vpop.f32.mrf.mxu0  ;;  %v583_v36 = vpop.f32.mrf.mxu1 }
 0x107   :  { %v609_v37 = vadd.f32 %v595_v27, %v541_v33  ;;  %v611_v38 = vadd.f32 %v603_v28, %v582_v34  ;;  %v612_v39 = vmax.f32 %v608_v31, 0.0  ;;  %v614_v40 = vmax.f32 %v610_v32, 0.0 }
 0x108   :  { %v543_v41 = vpop.f32.mrf.mxu0  ;;  %v584_v42 = vpop.f32.mrf.mxu1 }
 0x109   :  { %v613_v43 = vmax.f32 %v609_v37, 0.0  ;;  %v615_v44 = vmax.f32 %v611_v38, 0.0  ;;  %v616_v48 = vpack.c.bf16 %v612_v39, %v612_v39  ;;  %v618_v49 = vpack.c.bf16 %v614_v40, %v614_v40 }
 0x10b   :  { %v617_v45 = vpack.c.bf16 %v613_v43, %v613_v43  ;;  %v619_v46 = vpack.c.bf16 %v615_v44, %v615_v44 }
 0x10d   :  { %1048 = vmatprep.mubr.bf16.mxu0 %v617_v45  ;;  %1089 = vmatprep.mubr.bf16.mxu1 %v619_v46 }
 0x10e   :  { %1049 = vmatmul.mubr.bf16.vlgmr.msra.gmra.mxu0 %v616_v48  ;;  %1090 = vmatmul.mubr.bf16.vlgmr.msra.gmra.mxu1 %v618_v49 }
 0x10f   :  { %1438 = vmatpush3.bf16.msra.mxu0 %v1654_v47 }
 0x110   :  { %1439 = vmatprep.subr.bf16.mxu0 %v1655_v50 }
 0x113   :  { %1440 = vmatpush3.bf16.msra.mxu0 %v1656_v51 }
 0x114   :  { %1441 = vmatprep.subr.bf16.mxu0 %v1657_v52 }
 0x117   :  { %1442 = vmatpush3.bf16.msra.mxu0 %v1658_v53 }
 0x118   :  { %1443 = vmatprep.subr.bf16.mxu0 %v1659_v54 }
 0x11b   :  { %1444 = vmatpush3.bf16.msra.mxu0 %v1660_v55 }
 0x11c   :  { %1445 = vmatprep.subr.bf16.mxu0 %v1661_v56 }
 0x11f   :  { %1446 = vmatpush3.bf16.msra.mxu0 %v1662_v57 }
 0x120   :  { %1447 = vmatprep.subr.bf16.mxu0 %v1663_v58 }
 0x123   :  { %1448 = vmatpush3.bf16.msra.mxu0 %v1664_v59 }
 0x124   :  { %1449 = vmatprep.subr.bf16.mxu0 %v1665_v60 }
 0x127   :  { %1450 = vmatpush3.bf16.msra.mxu0 %v1666_v61 }
 0x128   :  { %1451 = vmatprep.subr.bf16.mxu0 %v1667_v62 }
 0x12b   :  { %1452 = vmatpush3.bf16.msra.mxu0 %v1668_v63 }
 0x1ce   :  { %v1050_v3 = vpop.f32.mrf.mxu0  ;;  %v1091_v4 = vpop.f32.mrf.mxu1 }
 0x1cf   :  { %v1051_v5 = vadd.f32 %v1050_v3, %v689_v1 }
 0x1d0   :  { %v1052_v6 = vpop.f32.mrf.mxu0  ;;  %v1093_v7 = vpop.f32.mrf.mxu1 }
 0x1d1   :  { %v1092_v8 = vadd.f32 %v1091_v4, %v1051_v5  ;;  %v1053_v9 = vadd.f32 %v1052_v6, %v693_v2 }
 0x1d2   :  { %v1054_v10 = vpop.f32.mrf.mxu0  ;;  %v1095_v11 = vpop.f32.mrf.mxu1 }
 0x1d3   :  { %v1094_v12 = vadd.f32 %v1093_v7, %v1053_v9  ;;  %v1098_v13 = vmax.f32 %v1092_v8, 0.0 }
 0x1d4   :  { %v1055_v14 = vpop.f32.mrf.mxu0  ;;  %v1096_v17 = vpop.f32.mrf.mxu1 }
 0x1d5   :  { %v1099_v18 = vmax.f32 %v1094_v12, 0.0  ;;  %v1100_v21 = vpack.c.bf16 %v1098_v13, %v1098_v13 }
 0x1d7   :  { %v1101_v20 = vpack.c.bf16 %v1099_v18, %v1099_v18 }
 0x1d9   :  { %1269 = vmatprep.mubr.bf16.mxu0 %v1101_v20 }
 0x1da   :  { %1270 = vmatmul.mubr.bf16.vlgmr.msra.gmra.mxu0 %v1100_v21 }
 0x29a   :  { %v1453_v15 = vpop.f32.mrf.mxu0 }
 0x29c   :  { %v1454_v16 = vpop.f32.mrf.mxu0 }
 0x29d   :  { %v1455_v22 = vadd.f32 %v1454_v16, %v1453_v15 }
 0x29e   :  { %v1456_v23 = vpop.f32.mrf.mxu0 }
 0x29f   :  { %v1272_v24 = vadd.f32 %v1455_v22, %v1420_v19 }
 0x2a0   :  { %v1457_v25 = vpop.f32.mrf.mxu0 }
 0x2a1   :  { %1277 = vst [vmem:[#allocation2] sm:$0x3] %v1272_v24 }
 0x2a2   :  { %1680 = shalt.err (!%p1677_p4)
}
 0x2a3   :  { %1287 = dma.vmem_to_hbm [thread:$0]  %s1285_s3, 32, %s2220_s9, [#allocation3]  }
 0x2a4   :  { %1689 = dma.done.wait [#allocation3], 32  }
 0x2a5   :  { %1690 = vsyncadd [#allocation3], 4294967264 }
 0x2a6   :  { %1291 = vsyncpa [#allocation3], 1 }

</bundles_post_ra>
